<compile_context>
chip_gen: v7x
topology: tpu7x:2x2x1
jax: 0.10.0
libtpu: 0.0.40
codegen_flags: <defaults>
</compile_context>

<pallas_src>
import functools

import jax
import jax.numpy as jnp
from jax.experimental import pallas as pl
from jax.experimental.pallas import tpu as pltpu

MEM_COUNT = 3                 # EMM.mem_count
ANS_COUNT = 2                 # DMN.ans_count
MATMUL_DTYPE = jnp.bfloat16   # MXU-native; set jnp.float32 for exact parity


def _round_up(x, m):
    return -(-x // m) * m


# ----------------------------------------------------------------------------
# Parameter-slab layouts (shared by the wrapper packing and the kernel).
# Combined gate layout for the fused sequence GRUs: [r_c|r_q|z_c|z_q|n_c|n_q].
# ----------------------------------------------------------------------------
def _weight_layout(I, H, A, O):
    blocks = [
        ("wic",    I,     6 * H),       # context input proj (gate-padded)
        ("wiq",    I,     6 * H),       # question input proj (gate-padded)
        ("whbd",   2 * H, 6 * H),       # block-diagonal fused recurrence
        ("attw",   H,     H),           # EMM attention bilinear weight
        ("w1base", 4 * H, A),           # rows: [c ; c*q ; |c-q| ; q]
        ("w1hop",  3 * H, A),           # rows: [c*m ; |c-m| ; m]
        ("gwi",    H,     3 * H),       # memory GRUCell input weights  (r|z|n)
        ("gwh",    H,     3 * H),       # memory GRUCell hidden weights (r|z|n)
        ("woh",    H,     O + 3 * H),   # [w_o | answer GRUCell hidden weights]
        ("awy",    O,     3 * H),       # answer GRUCell weights for y part
        ("awq",    H,     3 * H),       # answer GRUCell weights for q part
    ]
    layout, off = {}, 0
    for name, r, c in blocks:
        layout[name] = (off, r, c)
        off += _round_up(r, 16)         # bf16 sublane-tile alignment
    ncols = max(c for _, _, c in blocks)
    return layout, off, ncols


def _bias_layout(H, A, O):
    blocks = [
        ("bx",   1, 6 * H),   # [b_r_c|b_r_q|b_z_c|b_z_q|b_in_c|b_in_q]
        ("bhn",  1, 2 * H),   # [b_hn_c|b_hn_q]
        ("wd1",  1, A), ("wd2", 1, A), ("b1", 1, A), ("w2", 1, A),
        ("b2",   1, 1),
        ("gbx",  1, 3 * H), ("gbhn", 1, H),
        ("bo",   1, O),
        ("abx",  1, 3 * H), ("abhn", 1, H),
    ]
    layout, off = {}, 0
    for name, r, c in blocks:
        layout[name] = (off, r, c)
        off += _round_up(r, 8)          # f32 sublane-tile alignment
    ncols = max(c for _, _, c in blocks)
    return layout, off, ncols


def _pack_weights(params, I, H, A, O, dtype):
    ig, qg = params["input_gru"], params["question_gru"]
    em, an = params["emm"], params["ans"]
    layout, rows, cols = _weight_layout(I, H, A, O)

    zI = jnp.zeros((I, H), jnp.float32)
    zH = jnp.zeros((H, H), jnp.float32)
    wic = jnp.concatenate([ig["wi"][0], zI, ig["wi"][1], zI, ig["wi"][2], zI], 1)
    wiq = jnp.concatenate([zI, qg["wi"][0], zI, qg["wi"][1], zI, qg["wi"][2]], 1)
    whbd = jnp.concatenate([
        jnp.concatenate([ig["wh"][0], zH, ig["wh"][1], zH, ig["wh"][2], zH], 1),
        jnp.concatenate([zH, qg["wh"][0], zH, qg["wh"][1], zH, qg["wh"][2]], 1),
    ], 0)
    w1 = em["w1"]
    mats = {
        "wic": wic, "wiq": wiq, "whbd": whbd,
        "attw": em["att_w"],
        "w1base": jnp.concatenate([w1[0], w1[3], w1[5], w1[2]], 0),
        "w1hop":  jnp.concatenate([w1[4], w1[6], w1[1]], 0),
        "gwi": jnp.concatenate([em["g_wi"][0], em["g_wi"][1], em["g_wi"][2]], 1),
        "gwh": jnp.concatenate([em["g_wh"][0], em["g_wh"][1], em["g_wh"][2]], 1),
        "woh": jnp.concatenate(
            [an["w_o"],
             jnp.concatenate([an["a_wh"][0], an["a_wh"][1], an["a_wh"][2]], 1)], 1),
        "awy": jnp.concatenate([an["a_wy"][0], an["a_wy"][1], an["a_wy"][2]], 1),
        "awq": jnp.concatenate([an["a_wq"][0], an["a_wq"][1], an["a_wq"][2]], 1),
    }
    slab = jnp.zeros((rows, cols), jnp.float32)
    for name, (r0, nr, nc) in layout.items():
        m = mats[name]
        assert m.shape == (nr, nc), (name, m.shape, (nr, nc))
        slab = slab.at[r0:r0 + nr, 0:nc].set(m)
    return slab.astype(dtype), layout


def _pack_biases(params, H, A, O):
    ig, qg = params["input_gru"], params["question_gru"]
    em, an = params["emm"], params["ans"]
    layout, rows, cols = _bias_layout(H, A, O)
    w1b = em["w1b"]
    mats = {
        "bx":   jnp.concatenate([ig["b"][0], qg["b"][0], ig["b"][1], qg["b"][1],
                                 ig["b"][2], qg["b"][2]], 1),
        "bhn":  jnp.concatenate([ig["b"][3], qg["b"][3]], 1),
        "wd1":  w1b[0], "wd2": w1b[1], "b1": w1b[2], "w2": w1b[3],
        "b2":   em["b2"],
        "gbx":  jnp.concatenate([em["g_b"][0], em["g_b"][1], em["g_b"][2]], 1),
        "gbhn": em["g_b"][3],
        "bo":   an["b_o"],
        "abx":  jnp.concatenate([an["a_b"][0], an["a_b"][1], an["a_b"][2]], 1),
        "abhn": an["a_b"][3],
    }
    slab = jnp.zeros((rows, cols), jnp.float32)
    for name, (r0, nr, nc) in layout.items():
        m = mats[name]
        assert m.shape == (nr, nc), (name, m.shape, (nr, nc))
        slab = slab.at[r0:r0 + nr, 0:nc].set(m)
    return slab, layout


# ----------------------------------------------------------------------------
# Fused DMN kernel.
# ----------------------------------------------------------------------------
def dmn_kernel(cx_ref, qx_ref, h0_ref, cidx_ref, w_ref, b_ref, out_ref, *,
               B, I, H, A, O, L, Tc, Tq, wl, bl, out_w):
    f32 = jnp.float32
    H2, H3, H4 = 2 * H, 3 * H, 4 * H
    T = max(Tc, Tq)

    def wblk(name):
        r0, nr, nc = wl[name]
        return w_ref[r0:r0 + nr, 0:nc]

    def bblk(name):
        r0, nr, nc = bl[name]
        return b_ref[r0:r0 + nr, 0:nc]

    def mxu(a, w):   # bf16 (or f32) operands, f32 accumulation
        return jnp.dot(a.astype(w.dtype), w, preferred_element_type=f32)

    # ---------------- fused input+question GRU (block-diagonal) -------------
    wic, wiq, whbd = wblk("wic"), wblk("wiq"), wblk("whbd")
    bx, bhn = bblk("bx"), bblk("bhn")

    gxc = mxu(cx_ref[...], wic)          # [Tc*B, 6H] hoisted input projections
    gxq = mxu(qx_ref[...], wiq)          # [Tq*B, 6H]

    idx = cidx_ref[...]                  # [B, L] int32, -1 padded
    h = h0_ref[...]                      # [B, 2H] = [h_c | h_q]
    csel = jnp.zeros((B, L, H2), f32)
    q_lanes = jax.lax.broadcasted_iota(jnp.int32, (B, H2), 1) >= H

    for t in range(T):   # static unroll (small T; switch to fori/grid if large)
        gx = bx
        if t < Tc:
            gx = gx + gxc[t * B:(t + 1) * B, :]
        if t < Tq:
            gx = gx + gxq[t * B:(t + 1) * B, :]
        gh = mxu(h, whbd)                # one MXU push serves BOTH GRU chains
        g = gx + gh
        r = jax.nn.sigmoid(g[:, 0:H2])
        z = jax.nn.sigmoid(g[:, H2:2 * H2])
        n = jnp.tanh(gx[:, 2 * H2:3 * H2] + r * (gh[:, 2 * H2:3 * H2] + bhn))
        h_new = (1.0 - z) * n + z * h
        if t >= Tq:                      # question chain done -> freeze exactly
            h_new = jnp.where(q_lanes, h, h_new)
        if t >= Tc:                      # context chain done -> freeze exactly
            h_new = jnp.where(q_lanes, h_new, h)
        h = h_new
        if t < Tc:                       # in-loop sentence-end gather
            sel = (idx == t).astype(f32)                     # [B, L]
            csel = csel + sel[:, :, None] * h[:, None, :]

    c = csel[:, :, 0:H]                  # [B, L, H] gathered sentence-end states
    q = h[:, H:H2]                       # [B, H]    final question hidden (q_h)

    # ---------------- EMM: MEM_COUNT attention + memory hops ----------------
    attw, w1b_w, w1h_w = wblk("attw"), wblk("w1base"), wblk("w1hop")
    gwi, gwh = wblk("gwi"), wblk("gwh")
    wd1, wd2, b1, w2 = bblk("wd1"), bblk("wd2"), bblk("b1"), bblk("w2")
    b2, gbx, gbhn = bblk("b2"), bblk("gbx"), bblk("gbhn")

    c2 = c.reshape(B * L, H)
    cW = mxu(c2, attw).reshape(B, L, H)
    qb = jnp.broadcast_to(q[:, None, :], (B, L, H))
    d_q = jnp.sum(cW * qb, axis=2)                               # [B, L]
    lhs_base = jnp.concatenate([c, c * qb, jnp.abs(c - qb), qb],
                               axis=2).reshape(B * L, H4)
    base = (mxu(lhs_base, w1b_w).reshape(B, L, A)
            + d_q[:, :, None] * wd1 + b1)                        # m-independent

    lmask = idx >= 0
    lmaskf = lmask.astype(f32)

    att_rows = []
    m = q
    for _ in range(MEM_COUNT):
        mb = jnp.broadcast_to(m[:, None, :], (B, L, H))
        d_m = jnp.sum(cW * mb, axis=2)
        lhs_hop = jnp.concatenate([c * mb, jnp.abs(c - mb), mb],
                                  axis=2).reshape(B * L, H3)
        hid = jnp.tanh(base + mxu(lhs_hop, w1h_w).reshape(B, L, A)
                       + d_m[:, :, None] * wd2)
        score = jnp.sum(hid * w2, axis=2) + b2                   # [B, L]
        # length-masked softmax over the sentence axis
        score = jnp.where(lmask, score, jnp.float32(-1e30))
        score = score - jnp.max(score, axis=1, keepdims=True)
        p = jnp.exp(score) * lmaskf
        denom = jnp.maximum(jnp.sum(p, axis=1, keepdims=True), jnp.float32(1e-30))
        att = p * pl.reciprocal(denom, approx=True)              # internal only
        att_rows.append(att)
        e = jnp.sum(c * att[:, :, None], axis=1)                 # [B, H]
        # gate-fused GRUCell memory update: input e, hidden m
        gi = mxu(e, gwi) + gbx                                   # [B, 3H]
        ghm = mxu(m, gwh)                                        # [B, 3H]
        r = jax.nn.sigmoid(gi[:, 0:H] + ghm[:, 0:H])
        zg = jax.nn.sigmoid(gi[:, H:H2] + ghm[:, H:H2])
        n = jnp.tanh(gi[:, H2:H3] + r * (ghm[:, H2:H3] + gbhn))
        m = (1.0 - zg) * n + zg * m

    # ---------------- answer module ------------------------------------------
    woh, awy, awq = wblk("woh"), wblk("awy"), wblk("awq")
    bo, abx, abhn = bblk("bo"), bblk("abx"), bblk("abhn")
    aqg = mxu(q, awq)                       # q_h gate contribution (hoisted)

    def out_probs(logits):                  # EXACT softmax (final-output path)
        logits = logits - jnp.max(logits, axis=1, keepdims=True)
        ey = jnp.exp(logits)
        return ey / jnp.sum(ey, axis=1, keepdims=True)

    for _ in range(ANS_COUNT):
        mo = mxu(m, woh)                    # [B, O+3H]: [logits | hidden gates]
        y = out_probs(mo[:, 0:O] + bo)
        gha = mo[:, O:O + H3]
        gi = mxu(y, awy) + aqg + abx
        r = jax.nn.sigmoid(gi[:, 0:H] + gha[:, 0:H])
        zg = jax.nn.sigmoid(gi[:, H:H2] + gha[:, H:H2])
        n = jnp.tanh(gi[:, H2:H3] + r * (gha[:, H2:H3] + abhn))
        m = (1.0 - zg) * n + zg * m

    y_final = out_probs(mxu(m, woh)[:, 0:O] + bo)

    # ---------------- single lane-dense packed store --------------------------
    pieces = [y_final] + att_rows
    used = O + MEM_COUNT * L
    if out_w > used:
        pieces.append(jnp.zeros((B, out_w - used), f32))
    out_ref[...] = jnp.concatenate(pieces, axis=1)


# ----------------------------------------------------------------------------
# Single pallas_call for the whole DMN forward.
# ----------------------------------------------------------------------------
def _dmn_call(cx2, qx2, h0, cidx, w_slab, b_slab, *,
              B, I, H, A, O, L, Tc, Tq, wl, bl):
    used = O + MEM_COUNT * L
    out_w = _round_up(max(used, 128), 128)      # lane-dense packed output slab
    kernel = functools.partial(
        dmn_kernel, B=B, I=I, H=H, A=A, O=O, L=L, Tc=Tc, Tq=Tq,
        wl=wl, bl=bl, out_w=out_w)

    T = max(Tc, Tq)
    flops = 2 * ((Tc + Tq) * B * I * 6 * H
                 + T * B * 2 * H * 6 * H
                 + B * L * H * H
                 + B * L * 4 * H * A
                 + MEM_COUNT * (B * L * 3 * H * A + 2 * B * H * 3 * H)
                 + B * H * 3 * H
                 + (ANS_COUNT + 1) * B * H * (O + 3 * H)
                 + ANS_COUNT * B * O * 3 * H)
    transcendentals = (T * B * 6 * H
                       + MEM_COUNT * (B * L * A + 2 * B * L + B * 3 * H)
                       + (ANS_COUNT + 1) * B * O + ANS_COUNT * B * 3 * H)
    bytes_accessed = (4 * (cx2.size + qx2.size + h0.size + cidx.size + B * out_w)
                      + w_slab.size * w_slab.dtype.itemsize + 4 * b_slab.size)

    vmem = pl.BlockSpec(memory_space=pltpu.MemorySpace.VMEM)
    out = pl.pallas_call(
        kernel,
        out_shape=jax.ShapeDtypeStruct((B, out_w), jnp.float32),
        in_specs=[vmem] * 6,
        out_specs=vmem,
        compiler_params=pltpu.CompilerParams(vmem_limit_bytes=32 * 1024 * 1024),
        cost_estimate=pl.CostEstimate(flops=int(flops),
                                      transcendentals=int(transcendentals),
                                      bytes_accessed=int(bytes_accessed)),
    )(cx2, qx2, h0, cidx, w_slab, b_slab)
    y = out[:, 0:O]
    att = jnp.stack([out[:, O + i * L:O + (i + 1) * L] for i in range(MEM_COUNT)])
    return y, att


# ----------------------------------------------------------------------------
# Parameter construction (deterministic, synthetic), per-gate leading packing.
# ----------------------------------------------------------------------------
def _unif(key, shape):
    return jax.random.uniform(key, shape, jnp.float32, -0.05, 0.05)


def init_gru(key, in_dim, hid):
    ks = jax.random.split(key, 3)
    return dict(
        wi=_unif(ks[0], (3, in_dim, hid)),   # gates r, z, n
        wh=_unif(ks[1], (3, hid, hid)),
        b=_unif(ks[2], (4, 1, hid)),         # b_r, b_z, b_in, b_hn
    )


def init_emm(key, H, A):
    ks = jax.random.split(key, 7)
    return dict(
        att_w=_unif(ks[0], (H, H)),
        w1=_unif(ks[1], (7, H, A)),          # c, m, q, c*q, c*m, |c-q|, |c-m|
        w1b=_unif(ks[2], (4, 1, A)),         # w_d1, w_d2, b1, w2
        b2=_unif(ks[3], (1, 1)),
        g_wi=_unif(ks[4], (3, H, H)),
        g_wh=_unif(ks[5], (3, H, H)),
        g_b=_unif(ks[6], (4, 1, H)),
    )


def init_ans(key, H, O):
    ks = jax.random.split(key, 6)
    return dict(
        w_o=_unif(ks[0], (H, O)),
        b_o=_unif(ks[1], (1, O)),
        a_wy=_unif(ks[2], (3, O, H)),
        a_wq=_unif(ks[3], (3, H, H)),
        a_wh=_unif(ks[4], (3, H, H)),
        a_b=_unif(ks[5], (4, 1, H)),
    )


# ----------------------------------------------------------------------------
# Full DMN forward (minimal glue: pad, time-major flatten, slab packing).
# ----------------------------------------------------------------------------
def _pad_stack(seqs):
    max_len = max(s.shape[0] for s in seqs)
    return jnp.stack([jnp.pad(s, ((0, max_len - s.shape[0]), (0, 0))) for s in seqs])


def dmn_forward(c_list, q_list, c_index, i_state, q_state, params):
    # TODO(synk): dropout(0.3) skipped (eval-mode identity).
    B = len(c_list)
    I = c_list[0].shape[1]
    H = i_state.shape[2]
    A = params["emm"]["w1"].shape[2]
    O = params["ans"]["w_o"].shape[1]

    c_pad = _pad_stack(c_list)                                   # [B, Tc, I]
    q_pad = _pad_stack(q_list)                                   # [B, Tq, I]
    Tc, Tq = c_pad.shape[1], q_pad.shape[1]
    cx2 = jnp.transpose(c_pad, (1, 0, 2)).reshape(Tc * B, I)     # time-major flat
    qx2 = jnp.transpose(q_pad, (1, 0, 2)).reshape(Tq * B, I)
    L = max(len(ix) for ix in c_index)
    cidx = jnp.asarray([list(ix) + [-1] * (L - len(ix)) for ix in c_index],
                       jnp.int32)                                # -1 never matches
    h0 = jnp.concatenate([i_state[0], q_state[0]], axis=1)       # [B, 2H]

    w_slab, wl = _pack_weights(params, I, H, A, O, MATMUL_DTYPE)
    b_slab, bl = _pack_biases(params, H, A, O)

    y, att = _dmn_call(cx2, qx2, h0, cidx, w_slab, b_slab,
                       B=B, I=I, H=H, A=A, O=O, L=L, Tc=Tc, Tq=Tq, wl=wl, bl=bl)
    att_list = [att[t][..., None] for t in range(MEM_COUNT)]     # list of [B, L, 1]
    return y, att_list


if __name__ == "__main__":
    key = jax.random.PRNGKey(0)
    I, H, O, A, B = 8, 16, 4, 32, 2   # input, hidden, out, att_hidden, batch

    k = jax.random.split(key, 8)
    params = dict(
        input_gru=init_gru(k[0], I, H),
        question_gru=init_gru(k[1], I, H),
        emm=init_emm(k[2], H, A),
        ans=init_ans(k[3], H, O),
    )

    c_lens, q_lens = [10, 7], [5, 4]
    kc = jax.random.split(k[4], B)
    kq = jax.random.split(k[5], B)
    c_list = [jax.random.normal(kc[i], (c_lens[i], I), jnp.float32) for i in range(B)]
    q_list = [jax.random.normal(kq[i], (q_lens[i], I), jnp.float32) for i in range(B)]
    c_index = [[2, 5, 9], [3, 6]]     # sentence-end indices per sample
    i_state = 0.1 * jax.random.normal(k[6], (1, B, H), jnp.float32)
    q_state = 0.1 * jax.random.normal(k[7], (1, B, H), jnp.float32)

    y, att_list = dmn_forward(c_list, q_list, c_index, i_state, q_state, params)
    jax.block_until_ready(y)
    jax.block_until_ready(att_list)
    assert y.shape == (B, O)
    assert len(att_list) == MEM_COUNT
    assert att_list[0].shape == (B, 3, 1)
    print("KERNEL_OK")
</pallas_src>

<mosaic_0001>
module attributes {stable_mosaic.version = 11 : i64} {
  func.func @dmn_kernel(%arg0: memref<20x8xf32, #tpu.memory_space<vmem>>, %arg1: memref<10x8xf32, #tpu.memory_space<vmem>>, %arg2: memref<2x32xf32, #tpu.memory_space<vmem>>, %arg3: memref<2x3xi32, #tpu.memory_space<vmem>>, %arg4: memref<272x96xbf16, #tpu.memory_space<vmem>>, %arg5: memref<96x96xf32, #tpu.memory_space<vmem>>, %arg6: memref<2x128xf32, #tpu.memory_space<vmem>>) attributes {dimension_semantics = [], scalar_prefetch = 0 : i64, scratch_operands = 0 : i64, tpu.core_type = #tpu.core_type<tc>} {
    %c0 = arith.constant 0 : index
    %c0_0 = arith.constant 0 : index
    %0 = vector.load %arg4[%c0, %c0_0] : memref<272x96xbf16, #tpu.memory_space<vmem>>, vector<8x96xbf16>
    %c16 = arith.constant 16 : index
    %c0_1 = arith.constant 0 : index
    %1 = vector.load %arg4[%c16, %c0_1] : memref<272x96xbf16, #tpu.memory_space<vmem>>, vector<8x96xbf16>
    %c32 = arith.constant 32 : index
    %c0_2 = arith.constant 0 : index
    %2 = vector.load %arg4[%c32, %c0_2] : memref<272x96xbf16, #tpu.memory_space<vmem>>, vector<32x96xbf16>
    %c0_3 = arith.constant 0 : index
    %c0_4 = arith.constant 0 : index
    %3 = vector.load %arg5[%c0_3, %c0_4] : memref<96x96xf32, #tpu.memory_space<vmem>>, vector<1x96xf32>
    %c8 = arith.constant 8 : index
    %c0_5 = arith.constant 0 : index
    %4 = vector.load %arg5[%c8, %c0_5] : memref<96x96xf32, #tpu.memory_space<vmem>>, vector<1x32xf32>
    %c0_6 = arith.constant 0 : index
    %c0_7 = arith.constant 0 : index
    %5 = vector.load %arg0[%c0_6, %c0_7] : memref<20x8xf32, #tpu.memory_space<vmem>>, vector<20x8xf32>
    %6 = arith.truncf %5 : vector<20x8xf32> to vector<20x8xbf16>
    %cst = arith.constant dense<0.000000e+00> : vector<20x96xf32>
    %7 = tpu.matmul %6, %0, %cst {dimension_numbers = #tpu.dot_dimension_numbers<[1], [0], [0], [1], [0, 0, 1, 1], [], []>} : vector<20x8xbf16>, vector<8x96xbf16>, vector<20x96xf32> -> vector<20x96xf32>
    %c0_8 = arith.constant 0 : index
    %c0_9 = arith.constant 0 : index
    %8 = vector.load %arg1[%c0_8, %c0_9] : memref<10x8xf32, #tpu.memory_space<vmem>>, vector<10x8xf32>
    %9 = arith.truncf %8 : vector<10x8xf32> to vector<10x8xbf16>
    %cst_10 = arith.constant dense<0.000000e+00> : vector<10x96xf32>
    %10 = tpu.matmul %9, %1, %cst_10 {dimension_numbers = #tpu.dot_dimension_numbers<[1], [0], [0], [1], [0, 0, 1, 1], [], []>} : vector<10x8xbf16>, vector<8x96xbf16>, vector<10x96xf32> -> vector<10x96xf32>
    %c0_11 = arith.constant 0 : index
    %c0_12 = arith.constant 0 : index
    %11 = vector.load %arg3[%c0_11, %c0_12] : memref<2x3xi32, #tpu.memory_space<vmem>>, vector<2x3xi32>
    %c0_13 = arith.constant 0 : index
    %c0_14 = arith.constant 0 : index
    %12 = vector.load %arg2[%c0_13, %c0_14] : memref<2x32xf32, #tpu.memory_space<vmem>>, vector<2x32xf32>
    %cst_15 = arith.constant 0.000000e+00 : f32
    %13 = vector.broadcast %cst_15 : f32 to vector<2x3x32xf32>
    %14 = tpu.iota {dimensions = array<i32: 1>} : vector<2x32xi32>
    %c16_i32 = arith.constant 16 : i32
    %15 = vector.broadcast %c16_i32 : i32 to vector<2x32xi32>
    %16 = arith.cmpi sge, %14, %15 : vector<2x32xi32>
    %17 = vector.extract_strided_slice %7 {offsets = [0, 0], sizes = [2, 96], strides = [1, 1]} : vector<20x96xf32> to vector<2x96xf32>
    %18 = vector.broadcast %3 : vector<1x96xf32> to vector<2x96xf32>
    %19 = arith.addf %18, %17 : vector<2x96xf32>
    %20 = vector.extract_strided_slice %10 {offsets = [0, 0], sizes = [2, 96], strides = [1, 1]} : vector<10x96xf32> to vector<2x96xf32>
    %21 = arith.addf %19, %20 : vector<2x96xf32>
    %22 = arith.truncf %12 : vector<2x32xf32> to vector<2x32xbf16>
    %cst_16 = arith.constant dense<0.000000e+00> : vector<2x96xf32>
    %23 = tpu.matmul %22, %2, %cst_16 {dimension_numbers = #tpu.dot_dimension_numbers<[1], [0], [0], [1], [0, 0, 1, 1], [], []>} : vector<2x32xbf16>, vector<32x96xbf16>, vector<2x96xf32> -> vector<2x96xf32>
    %24 = arith.addf %21, %23 : vector<2x96xf32>
    %25 = vector.extract_strided_slice %24 {offsets = [0, 0], sizes = [2, 32], strides = [1, 1]} : vector<2x96xf32> to vector<2x32xf32>
    %26 = arith.negf %25 : vector<2x32xf32>
    %27 = math.exp %26 : vector<2x32xf32>
    %cst_17 = arith.constant 1.000000e+00 : f32
    %28 = vector.broadcast %cst_17 : f32 to vector<2x32xf32>
    %29 = arith.addf %28, %27 : vector<2x32xf32>
    %30 = arith.divf %28, %29 : vector<2x32xf32>
    %31 = vector.extract_strided_slice %24 {offsets = [0, 32], sizes = [2, 32], strides = [1, 1]} : vector<2x96xf32> to vector<2x32xf32>
    %32 = arith.negf %31 : vector<2x32xf32>
    %33 = math.exp %32 : vector<2x32xf32>
    %cst_18 = arith.constant 1.000000e+00 : f32
    %34 = vector.broadcast %cst_18 : f32 to vector<2x32xf32>
    %35 = arith.addf %34, %33 : vector<2x32xf32>
    %36 = arith.divf %34, %35 : vector<2x32xf32>
    %37 = vector.extract_strided_slice %21 {offsets = [0, 64], sizes = [2, 32], strides = [1, 1]} : vector<2x96xf32> to vector<2x32xf32>
    %38 = vector.extract_strided_slice %23 {offsets = [0, 64], sizes = [2, 32], strides = [1, 1]} : vector<2x96xf32> to vector<2x32xf32>
    %39 = vector.broadcast %4 : vector<1x32xf32> to vector<2x32xf32>
    %40 = arith.addf %38, %39 : vector<2x32xf32>
    %41 = arith.mulf %30, %40 : vector<2x32xf32>
    %42 = arith.addf %37, %41 : vector<2x32xf32>
    %43 = math.tanh %42 : vector<2x32xf32>
    %cst_19 = arith.constant 1.000000e+00 : f32
    %44 = vector.broadcast %cst_19 : f32 to vector<2x32xf32>
    %45 = arith.subf %44, %36 : vector<2x32xf32>
    %46 = arith.mulf %45, %43 : vector<2x32xf32>
    %47 = arith.mulf %36, %12 : vector<2x32xf32>
    %48 = arith.addf %46, %47 : vector<2x32xf32>
    %c0_i32 = arith.constant 0 : i32
    %49 = vector.broadcast %c0_i32 : i32 to vector<2x3xi32>
    %50 = arith.cmpi eq, %11, %49 : vector<2x3xi32>
    %51 = arith.extui %50 : vector<2x3xi1> to vector<2x3xi32>
    %52 = arith.sitofp %51 : vector<2x3xi32> to vector<2x3xf32>
    %53 = vector.shape_cast %52 : vector<2x3xf32> to vector<2x3x1xf32>
    %54 = vector.shape_cast %48 : vector<2x32xf32> to vector<2x1x32xf32>
    %55 = vector.broadcast %53 : vector<2x3x1xf32> to vector<2x3x32xf32>
    %56 = vector.broadcast %54 : vector<2x1x32xf32> to vector<2x3x32xf32>
    %57 = arith.mulf %55, %56 : vector<2x3x32xf32>
    %58 = arith.addf %13, %57 : vector<2x3x32xf32>
    %59 = vector.extract_strided_slice %7 {offsets = [2, 0], sizes = [2, 96], strides = [1, 1]} : vector<20x96xf32> to vector<2x96xf32>
    %60 = vector.broadcast %3 : vector<1x96xf32> to vector<2x96xf32>
    %61 = arith.addf %60, %59 : vector<2x96xf32>
    %62 = vector.extract_strided_slice %10 {offsets = [2, 0], sizes = [2, 96], strides = [1, 1]} : vector<10x96xf32> to vector<2x96xf32>
    %63 = arith.addf %61, %62 : vector<2x96xf32>
    %64 = arith.truncf %48 : vector<2x32xf32> to vector<2x32xbf16>
    %cst_20 = arith.constant dense<0.000000e+00> : vector<2x96xf32>
    %65 = tpu.matmul %64, %2, %cst_20 {dimension_numbers = #tpu.dot_dimension_numbers<[1], [0], [0], [1], [0, 0, 1, 1], [], []>} : vector<2x32xbf16>, vector<32x96xbf16>, vector<2x96xf32> -> vector<2x96xf32>
    %66 = arith.addf %63, %65 : vector<2x96xf32>
    %67 = vector.extract_strided_slice %66 {offsets = [0, 0], sizes = [2, 32], strides = [1, 1]} : vector<2x96xf32> to vector<2x32xf32>
    %68 = arith.negf %67 : vector<2x32xf32>
    %69 = math.exp %68 : vector<2x32xf32>
    %cst_21 = arith.constant 1.000000e+00 : f32
    %70 = vector.broadcast %cst_21 : f32 to vector<2x32xf32>
    %71 = arith.addf %70, %69 : vector<2x32xf32>
    %72 = arith.divf %70, %71 : vector<2x32xf32>
    %73 = vector.extract_strided_slice %66 {offsets = [0, 32], sizes = [2, 32], strides = [1, 1]} : vector<2x96xf32> to vector<2x32xf32>
    %74 = arith.negf %73 : vector<2x32xf32>
    %75 = math.exp %74 : vector<2x32xf32>
    %cst_22 = arith.constant 1.000000e+00 : f32
    %76 = vector.broadcast %cst_22 : f32 to vector<2x32xf32>
    %77 = arith.addf %76, %75 : vector<2x32xf32>
    %78 = arith.divf %76, %77 : vector<2x32xf32>
    %79 = vector.extract_strided_slice %63 {offsets = [0, 64], sizes = [2, 32], strides = [1, 1]} : vector<2x96xf32> to vector<2x32xf32>
    %80 = vector.extract_strided_slice %65 {offsets = [0, 64], sizes = [2, 32], strides = [1, 1]} : vector<2x96xf32> to vector<2x32xf32>
    %81 = vector.broadcast %4 : vector<1x32xf32> to vector<2x32xf32>
    %82 = arith.addf %80, %81 : vector<2x32xf32>
    %83 = arith.mulf %72, %82 : vector<2x32xf32>
    %84 = arith.addf %79, %83 : vector<2x32xf32>
    %85 = math.tanh %84 : vector<2x32xf32>
    %cst_23 = arith.constant 1.000000e+00 : f32
    %86 = vector.broadcast %cst_23 : f32 to vector<2x32xf32>
    %87 = arith.subf %86, %78 : vector<2x32xf32>
    %88 = arith.mulf %87, %85 : vector<2x32xf32>
    %89 = arith.mulf %78, %48 : vector<2x32xf32>
    %90 = arith.addf %88, %89 : vector<2x32xf32>
    %c1_i32 = arith.constant 1 : i32
    %91 = vector.broadcast %c1_i32 : i32 to vector<2x3xi32>
    %92 = arith.cmpi eq, %11, %91 : vector<2x3xi32>
    %93 = arith.extui %92 : vector<2x3xi1> to vector<2x3xi32>
    %94 = arith.sitofp %93 : vector<2x3xi32> to vector<2x3xf32>
    %95 = vector.shape_cast %94 : vector<2x3xf32> to vector<2x3x1xf32>
    %96 = vector.shape_cast %90 : vector<2x32xf32> to vector<2x1x32xf32>
    %97 = vector.broadcast %95 : vector<2x3x1xf32> to vector<2x3x32xf32>
    %98 = vector.broadcast %96 : vector<2x1x32xf32> to vector<2x3x32xf32>
    %99 = arith.mulf %97, %98 : vector<2x3x32xf32>
    %100 = arith.addf %58, %99 : vector<2x3x32xf32>
    %101 = vector.extract_strided_slice %7 {offsets = [4, 0], sizes = [2, 96], strides = [1, 1]} : vector<20x96xf32> to vector<2x96xf32>
    %102 = vector.broadcast %3 : vector<1x96xf32> to vector<2x96xf32>
    %103 = arith.addf %102, %101 : vector<2x96xf32>
    %104 = vector.extract_strided_slice %10 {offsets = [4, 0], sizes = [2, 96], strides = [1, 1]} : vector<10x96xf32> to vector<2x96xf32>
    %105 = arith.addf %103, %104 : vector<2x96xf32>
    %106 = arith.truncf %90 : vector<2x32xf32> to vector<2x32xbf16>
    %cst_24 = arith.constant dense<0.000000e+00> : vector<2x96xf32>
    %107 = tpu.matmul %106, %2, %cst_24 {dimension_numbers = #tpu.dot_dimension_numbers<[1], [0], [0], [1], [0, 0, 1, 1], [], []>} : vector<2x32xbf16>, vector<32x96xbf16>, vector<2x96xf32> -> vector<2x96xf32>
    %108 = arith.addf %105, %107 : vector<2x96xf32>
    %109 = vector.extract_strided_slice %108 {offsets = [0, 0], sizes = [2, 32], strides = [1, 1]} : vector<2x96xf32> to vector<2x32xf32>
    %110 = arith.negf %109 : vector<2x32xf32>
    %111 = math.exp %110 : vector<2x32xf32>
    %cst_25 = arith.constant 1.000000e+00 : f32
    %112 = vector.broadcast %cst_25 : f32 to vector<2x32xf32>
    %113 = arith.addf %112, %111 : vector<2x32xf32>
    %114 = arith.divf %112, %113 : vector<2x32xf32>
    %115 = vector.extract_strided_slice %108 {offsets = [0, 32], sizes = [2, 32], strides = [1, 1]} : vector<2x96xf32> to vector<2x32xf32>
    %116 = arith.negf %115 : vector<2x32xf32>
    %117 = math.exp %116 : vector<2x32xf32>
    %cst_26 = arith.constant 1.000000e+00 : f32
    %118 = vector.broadcast %cst_26 : f32 to vector<2x32xf32>
    %119 = arith.addf %118, %117 : vector<2x32xf32>
    %120 = arith.divf %118, %119 : vector<2x32xf32>
    %121 = vector.extract_strided_slice %105 {offsets = [0, 64], sizes = [2, 32], strides = [1, 1]} : vector<2x96xf32> to vector<2x32xf32>
    %122 = vector.extract_strided_slice %107 {offsets = [0, 64], sizes = [2, 32], strides = [1, 1]} : vector<2x96xf32> to vector<2x32xf32>
    %123 = vector.broadcast %4 : vector<1x32xf32> to vector<2x32xf32>
    %124 = arith.addf %122, %123 : vector<2x32xf32>
    %125 = arith.mulf %114, %124 : vector<2x32xf32>
    %126 = arith.addf %121, %125 : vector<2x32xf32>
    %127 = math.tanh %126 : vector<2x32xf32>
    %cst_27 = arith.constant 1.000000e+00 : f32
    %128 = vector.broadcast %cst_27 : f32 to vector<2x32xf32>
    %129 = arith.subf %128, %120 : vector<2x32xf32>
    %130 = arith.mulf %129, %127 : vector<2x32xf32>
    %131 = arith.mulf %120, %90 : vector<2x32xf32>
    %132 = arith.addf %130, %131 : vector<2x32xf32>
    %c2_i32 = arith.constant 2 : i32
    %133 = vector.broadcast %c2_i32 : i32 to vector<2x3xi32>
    %134 = arith.cmpi eq, %11, %133 : vector<2x3xi32>
    %135 = arith.extui %134 : vector<2x3xi1> to vector<2x3xi32>
    %136 = arith.sitofp %135 : vector<2x3xi32> to vector<2x3xf32>
    %137 = vector.shape_cast %136 : vector<2x3xf32> to vector<2x3x1xf32>
    %138 = vector.shape_cast %132 : vector<2x32xf32> to vector<2x1x32xf32>
    %139 = vector.broadcast %137 : vector<2x3x1xf32> to vector<2x3x32xf32>
    %140 = vector.broadcast %138 : vector<2x1x32xf32> to vector<2x3x32xf32>
    %141 = arith.mulf %139, %140 : vector<2x3x32xf32>
    %142 = arith.addf %100, %141 : vector<2x3x32xf32>
    %143 = vector.extract_strided_slice %7 {offsets = [6, 0], sizes = [2, 96], strides = [1, 1]} : vector<20x96xf32> to vector<2x96xf32>
    %144 = vector.broadcast %3 : vector<1x96xf32> to vector<2x96xf32>
    %145 = arith.addf %144, %143 : vector<2x96xf32>
    %146 = vector.extract_strided_slice %10 {offsets = [6, 0], sizes = [2, 96], strides = [1, 1]} : vector<10x96xf32> to vector<2x96xf32>
    %147 = arith.addf %145, %146 : vector<2x96xf32>
    %148 = arith.truncf %132 : vector<2x32xf32> to vector<2x32xbf16>
    %cst_28 = arith.constant dense<0.000000e+00> : vector<2x96xf32>
    %149 = tpu.matmul %148, %2, %cst_28 {dimension_numbers = #tpu.dot_dimension_numbers<[1], [0], [0], [1], [0, 0, 1, 1], [], []>} : vector<2x32xbf16>, vector<32x96xbf16>, vector<2x96xf32> -> vector<2x96xf32>
    %150 = arith.addf %147, %149 : vector<2x96xf32>
    %151 = vector.extract_strided_slice %150 {offsets = [0, 0], sizes = [2, 32], strides = [1, 1]} : vector<2x96xf32> to vector<2x32xf32>
    %152 = arith.negf %151 : vector<2x32xf32>
    %153 = math.exp %152 : vector<2x32xf32>
    %cst_29 = arith.constant 1.000000e+00 : f32
    %154 = vector.broadcast %cst_29 : f32 to vector<2x32xf32>
    %155 = arith.addf %154, %153 : vector<2x32xf32>
    %156 = arith.divf %154, %155 : vector<2x32xf32>
    %157 = vector.extract_strided_slice %150 {offsets = [0, 32], sizes = [2, 32], strides = [1, 1]} : vector<2x96xf32> to vector<2x32xf32>
    %158 = arith.negf %157 : vector<2x32xf32>
    %159 = math.exp %158 : vector<2x32xf32>
    %cst_30 = arith.constant 1.000000e+00 : f32
    %160 = vector.broadcast %cst_30 : f32 to vector<2x32xf32>
    %161 = arith.addf %160, %159 : vector<2x32xf32>
    %162 = arith.divf %160, %161 : vector<2x32xf32>
    %163 = vector.extract_strided_slice %147 {offsets = [0, 64], sizes = [2, 32], strides = [1, 1]} : vector<2x96xf32> to vector<2x32xf32>
    %164 = vector.extract_strided_slice %149 {offsets = [0, 64], sizes = [2, 32], strides = [1, 1]} : vector<2x96xf32> to vector<2x32xf32>
    %165 = vector.broadcast %4 : vector<1x32xf32> to vector<2x32xf32>
    %166 = arith.addf %164, %165 : vector<2x32xf32>
    %167 = arith.mulf %156, %166 : vector<2x32xf32>
    %168 = arith.addf %163, %167 : vector<2x32xf32>
    %169 = math.tanh %168 : vector<2x32xf32>
    %cst_31 = arith.constant 1.000000e+00 : f32
    %170 = vector.broadcast %cst_31 : f32 to vector<2x32xf32>
    %171 = arith.subf %170, %162 : vector<2x32xf32>
    %172 = arith.mulf %171, %169 : vector<2x32xf32>
    %173 = arith.mulf %162, %132 : vector<2x32xf32>
    %174 = arith.addf %172, %173 : vector<2x32xf32>
    %c3_i32 = arith.constant 3 : i32
    %175 = vector.broadcast %c3_i32 : i32 to vector<2x3xi32>
    %176 = arith.cmpi eq, %11, %175 : vector<2x3xi32>
    %177 = arith.extui %176 : vector<2x3xi1> to vector<2x3xi32>
    %178 = arith.sitofp %177 : vector<2x3xi32> to vector<2x3xf32>
    %179 = vector.shape_cast %178 : vector<2x3xf32> to vector<2x3x1xf32>
    %180 = vector.shape_cast %174 : vector<2x32xf32> to vector<2x1x32xf32>
    %181 = vector.broadcast %179 : vector<2x3x1xf32> to vector<2x3x32xf32>
    %182 = vector.broadcast %180 : vector<2x1x32xf32> to vector<2x3x32xf32>
    %183 = arith.mulf %181, %182 : vector<2x3x32xf32>
    %184 = arith.addf %142, %183 : vector<2x3x32xf32>
    %185 = vector.extract_strided_slice %7 {offsets = [8, 0], sizes = [2, 96], strides = [1, 1]} : vector<20x96xf32> to vector<2x96xf32>
    %186 = vector.broadcast %3 : vector<1x96xf32> to vector<2x96xf32>
    %187 = arith.addf %186, %185 : vector<2x96xf32>
    %188 = vector.extract_strided_slice %10 {offsets = [8, 0], sizes = [2, 96], strides = [1, 1]} : vector<10x96xf32> to vector<2x96xf32>
    %189 = arith.addf %187, %188 : vector<2x96xf32>
    %190 = arith.truncf %174 : vector<2x32xf32> to vector<2x32xbf16>
    %cst_32 = arith.constant dense<0.000000e+00> : vector<2x96xf32>
    %191 = tpu.matmul %190, %2, %cst_32 {dimension_numbers = #tpu.dot_dimension_numbers<[1], [0], [0], [1], [0, 0, 1, 1], [], []>} : vector<2x32xbf16>, vector<32x96xbf16>, vector<2x96xf32> -> vector<2x96xf32>
    %192 = arith.addf %189, %191 : vector<2x96xf32>
    %193 = vector.extract_strided_slice %192 {offsets = [0, 0], sizes = [2, 32], strides = [1, 1]} : vector<2x96xf32> to vector<2x32xf32>
    %194 = arith.negf %193 : vector<2x32xf32>
    %195 = math.exp %194 : vector<2x32xf32>
    %cst_33 = arith.constant 1.000000e+00 : f32
    %196 = vector.broadcast %cst_33 : f32 to vector<2x32xf32>
    %197 = arith.addf %196, %195 : vector<2x32xf32>
    %198 = arith.divf %196, %197 : vector<2x32xf32>
    %199 = vector.extract_strided_slice %192 {offsets = [0, 32], sizes = [2, 32], strides = [1, 1]} : vector<2x96xf32> to vector<2x32xf32>
    %200 = arith.negf %199 : vector<2x32xf32>
    %201 = math.exp %200 : vector<2x32xf32>
    %cst_34 = arith.constant 1.000000e+00 : f32
    %202 = vector.broadcast %cst_34 : f32 to vector<2x32xf32>
    %203 = arith.addf %202, %201 : vector<2x32xf32>
    %204 = arith.divf %202, %203 : vector<2x32xf32>
    %205 = vector.extract_strided_slice %189 {offsets = [0, 64], sizes = [2, 32], strides = [1, 1]} : vector<2x96xf32> to vector<2x32xf32>
    %206 = vector.extract_strided_slice %191 {offsets = [0, 64], sizes = [2, 32], strides = [1, 1]} : vector<2x96xf32> to vector<2x32xf32>
    %207 = vector.broadcast %4 : vector<1x32xf32> to vector<2x32xf32>
    %208 = arith.addf %206, %207 : vector<2x32xf32>
    %209 = arith.mulf %198, %208 : vector<2x32xf32>
    %210 = arith.addf %205, %209 : vector<2x32xf32>
    %211 = math.tanh %210 : vector<2x32xf32>
    %cst_35 = arith.constant 1.000000e+00 : f32
    %212 = vector.broadcast %cst_35 : f32 to vector<2x32xf32>
    %213 = arith.subf %212, %204 : vector<2x32xf32>
    %214 = arith.mulf %213, %211 : vector<2x32xf32>
    %215 = arith.mulf %204, %174 : vector<2x32xf32>
    %216 = arith.addf %214, %215 : vector<2x32xf32>
    %c4_i32 = arith.constant 4 : i32
    %217 = vector.broadcast %c4_i32 : i32 to vector<2x3xi32>
    %218 = arith.cmpi eq, %11, %217 : vector<2x3xi32>
    %219 = arith.extui %218 : vector<2x3xi1> to vector<2x3xi32>
    %220 = arith.sitofp %219 : vector<2x3xi32> to vector<2x3xf32>
    %221 = vector.shape_cast %220 : vector<2x3xf32> to vector<2x3x1xf32>
    %222 = vector.shape_cast %216 : vector<2x32xf32> to vector<2x1x32xf32>
    %223 = vector.broadcast %221 : vector<2x3x1xf32> to vector<2x3x32xf32>
    %224 = vector.broadcast %222 : vector<2x1x32xf32> to vector<2x3x32xf32>
    %225 = arith.mulf %223, %224 : vector<2x3x32xf32>
    %226 = arith.addf %184, %225 : vector<2x3x32xf32>
    %227 = vector.extract_strided_slice %7 {offsets = [10, 0], sizes = [2, 96], strides = [1, 1]} : vector<20x96xf32> to vector<2x96xf32>
    %228 = vector.broadcast %3 : vector<1x96xf32> to vector<2x96xf32>
    %229 = arith.addf %228, %227 : vector<2x96xf32>
    %230 = arith.truncf %216 : vector<2x32xf32> to vector<2x32xbf16>
    %cst_36 = arith.constant dense<0.000000e+00> : vector<2x96xf32>
    %231 = tpu.matmul %230, %2, %cst_36 {dimension_numbers = #tpu.dot_dimension_numbers<[1], [0], [0], [1], [0, 0, 1, 1], [], []>} : vector<2x32xbf16>, vector<32x96xbf16>, vector<2x96xf32> -> vector<2x96xf32>
    %232 = arith.addf %229, %231 : vector<2x96xf32>
    %233 = vector.extract_strided_slice %232 {offsets = [0, 0], sizes = [2, 32], strides = [1, 1]} : vector<2x96xf32> to vector<2x32xf32>
    %234 = arith.negf %233 : vector<2x32xf32>
    %235 = math.exp %234 : vector<2x32xf32>
    %cst_37 = arith.constant 1.000000e+00 : f32
    %236 = vector.broadcast %cst_37 : f32 to vector<2x32xf32>
    %237 = arith.addf %236, %235 : vector<2x32xf32>
    %238 = arith.divf %236, %237 : vector<2x32xf32>
    %239 = vector.extract_strided_slice %232 {offsets = [0, 32], sizes = [2, 32], strides = [1, 1]} : vector<2x96xf32> to vector<2x32xf32>
    %240 = arith.negf %239 : vector<2x32xf32>
    %241 = math.exp %240 : vector<2x32xf32>
    %cst_38 = arith.constant 1.000000e+00 : f32
    %242 = vector.broadcast %cst_38 : f32 to vector<2x32xf32>
    %243 = arith.addf %242, %241 : vector<2x32xf32>
    %244 = arith.divf %242, %243 : vector<2x32xf32>
    %245 = vector.extract_strided_slice %229 {offsets = [0, 64], sizes = [2, 32], strides = [1, 1]} : vector<2x96xf32> to vector<2x32xf32>
    %246 = vector.extract_strided_slice %231 {offsets = [0, 64], sizes = [2, 32], strides = [1, 1]} : vector<2x96xf32> to vector<2x32xf32>
    %247 = vector.broadcast %4 : vector<1x32xf32> to vector<2x32xf32>
    %248 = arith.addf %246, %247 : vector<2x32xf32>
    %249 = arith.mulf %238, %248 : vector<2x32xf32>
    %250 = arith.addf %245, %249 : vector<2x32xf32>
    %251 = math.tanh %250 : vector<2x32xf32>
    %cst_39 = arith.constant 1.000000e+00 : f32
    %252 = vector.broadcast %cst_39 : f32 to vector<2x32xf32>
    %253 = arith.subf %252, %244 : vector<2x32xf32>
    %254 = arith.mulf %253, %251 : vector<2x32xf32>
    %255 = arith.mulf %244, %216 : vector<2x32xf32>
    %256 = arith.addf %254, %255 : vector<2x32xf32>
    %257 = arith.select %16, %216, %256 : vector<2x32xi1>, vector<2x32xf32>
    %c5_i32 = arith.constant 5 : i32
    %258 = vector.broadcast %c5_i32 : i32 to vector<2x3xi32>
    %259 = arith.cmpi eq, %11, %258 : vector<2x3xi32>
    %260 = arith.extui %259 : vector<2x3xi1> to vector<2x3xi32>
    %261 = arith.sitofp %260 : vector<2x3xi32> to vector<2x3xf32>
    %262 = vector.shape_cast %261 : vector<2x3xf32> to vector<2x3x1xf32>
    %263 = vector.shape_cast %257 : vector<2x32xf32> to vector<2x1x32xf32>
    %264 = vector.broadcast %262 : vector<2x3x1xf32> to vector<2x3x32xf32>
    %265 = vector.broadcast %263 : vector<2x1x32xf32> to vector<2x3x32xf32>
    %266 = arith.mulf %264, %265 : vector<2x3x32xf32>
    %267 = arith.addf %226, %266 : vector<2x3x32xf32>
    %268 = vector.extract_strided_slice %7 {offsets = [12, 0], sizes = [2, 96], strides = [1, 1]} : vector<20x96xf32> to vector<2x96xf32>
    %269 = vector.broadcast %3 : vector<1x96xf32> to vector<2x96xf32>
    %270 = arith.addf %269, %268 : vector<2x96xf32>
    %271 = arith.truncf %257 : vector<2x32xf32> to vector<2x32xbf16>
    %cst_40 = arith.constant dense<0.000000e+00> : vector<2x96xf32>
    %272 = tpu.matmul %271, %2, %cst_40 {dimension_numbers = #tpu.dot_dimension_numbers<[1], [0], [0], [1], [0, 0, 1, 1], [], []>} : vector<2x32xbf16>, vector<32x96xbf16>, vector<2x96xf32> -> vector<2x96xf32>
    %273 = arith.addf %270, %272 : vector<2x96xf32>
    %274 = vector.extract_strided_slice %273 {offsets = [0, 0], sizes = [2, 32], strides = [1, 1]} : vector<2x96xf32> to vector<2x32xf32>
    %275 = arith.negf %274 : vector<2x32xf32>
    %276 = math.exp %275 : vector<2x32xf32>
    %cst_41 = arith.constant 1.000000e+00 : f32
    %277 = vector.broadcast %cst_41 : f32 to vector<2x32xf32>
    %278 = arith.addf %277, %276 : vector<2x32xf32>
    %279 = arith.divf %277, %278 : vector<2x32xf32>
    %280 = vector.extract_strided_slice %273 {offsets = [0, 32], sizes = [2, 32], strides = [1, 1]} : vector<2x96xf32> to vector<2x32xf32>
    %281 = arith.negf %280 : vector<2x32xf32>
    %282 = math.exp %281 : vector<2x32xf32>
    %cst_42 = arith.constant 1.000000e+00 : f32
    %283 = vector.broadcast %cst_42 : f32 to vector<2x32xf32>
    %284 = arith.addf %283, %282 : vector<2x32xf32>
    %285 = arith.divf %283, %284 : vector<2x32xf32>
    %286 = vector.extract_strided_slice %270 {offsets = [0, 64], sizes = [2, 32], strides = [1, 1]} : vector<2x96xf32> to vector<2x32xf32>
    %287 = vector.extract_strided_slice %272 {offsets = [0, 64], sizes = [2, 32], strides = [1, 1]} : vector<2x96xf32> to vector<2x32xf32>
    %288 = vector.broadcast %4 : vector<1x32xf32> to vector<2x32xf32>
    %289 = arith.addf %287, %288 : vector<2x32xf32>
    %290 = arith.mulf %279, %289 : vector<2x32xf32>
    %291 = arith.addf %286, %290 : vector<2x32xf32>
    %292 = math.tanh %291 : vector<2x32xf32>
    %cst_43 = arith.constant 1.000000e+00 : f32
    %293 = vector.broadcast %cst_43 : f32 to vector<2x32xf32>
    %294 = arith.subf %293, %285 : vector<2x32xf32>
    %295 = arith.mulf %294, %292 : vector<2x32xf32>
    %296 = arith.mulf %285, %257 : vector<2x32xf32>
    %297 = arith.addf %295, %296 : vector<2x32xf32>
    %298 = arith.select %16, %257, %297 : vector<2x32xi1>, vector<2x32xf32>
    %c6_i32 = arith.constant 6 : i32
    %299 = vector.broadcast %c6_i32 : i32 to vector<2x3xi32>
    %300 = arith.cmpi eq, %11, %299 : vector<2x3xi32>
    %301 = arith.extui %300 : vector<2x3xi1> to vector<2x3xi32>
    %302 = arith.sitofp %301 : vector<2x3xi32> to vector<2x3xf32>
    %303 = vector.shape_cast %302 : vector<2x3xf32> to vector<2x3x1xf32>
    %304 = vector.shape_cast %298 : vector<2x32xf32> to vector<2x1x32xf32>
    %305 = vector.broadcast %303 : vector<2x3x1xf32> to vector<2x3x32xf32>
    %306 = vector.broadcast %304 : vector<2x1x32xf32> to vector<2x3x32xf32>
    %307 = arith.mulf %305, %306 : vector<2x3x32xf32>
    %308 = arith.addf %267, %307 : vector<2x3x32xf32>
    %309 = vector.extract_strided_slice %7 {offsets = [14, 0], sizes = [2, 96], strides = [1, 1]} : vector<20x96xf32> to vector<2x96xf32>
    %310 = vector.broadcast %3 : vector<1x96xf32> to vector<2x96xf32>
    %311 = arith.addf %310, %309 : vector<2x96xf32>
    %312 = arith.truncf %298 : vector<2x32xf32> to vector<2x32xbf16>
    %cst_44 = arith.constant dense<0.000000e+00> : vector<2x96xf32>
    %313 = tpu.matmul %312, %2, %cst_44 {dimension_numbers = #tpu.dot_dimension_numbers<[1], [0], [0], [1], [0, 0, 1, 1], [], []>} : vector<2x32xbf16>, vector<32x96xbf16>, vector<2x96xf32> -> vector<2x96xf32>
    %314 = arith.addf %311, %313 : vector<2x96xf32>
    %315 = vector.extract_strided_slice %314 {offsets = [0, 0], sizes = [2, 32], strides = [1, 1]} : vector<2x96xf32> to vector<2x32xf32>
    %316 = arith.negf %315 : vector<2x32xf32>
    %317 = math.exp %316 : vector<2x32xf32>
    %cst_45 = arith.constant 1.000000e+00 : f32
    %318 = vector.broadcast %cst_45 : f32 to vector<2x32xf32>
    %319 = arith.addf %318, %317 : vector<2x32xf32>
    %320 = arith.divf %318, %319 : vector<2x32xf32>
    %321 = vector.extract_strided_slice %314 {offsets = [0, 32], sizes = [2, 32], strides = [1, 1]} : vector<2x96xf32> to vector<2x32xf32>
    %322 = arith.negf %321 : vector<2x32xf32>
    %323 = math.exp %322 : vector<2x32xf32>
    %cst_46 = arith.constant 1.000000e+00 : f32
    %324 = vector.broadcast %cst_46 : f32 to vector<2x32xf32>
    %325 = arith.addf %324, %323 : vector<2x32xf32>
    %326 = arith.divf %324, %325 : vector<2x32xf32>
    %327 = vector.extract_strided_slice %311 {offsets = [0, 64], sizes = [2, 32], strides = [1, 1]} : vector<2x96xf32> to vector<2x32xf32>
    %328 = vector.extract_strided_slice %313 {offsets = [0, 64], sizes = [2, 32], strides = [1, 1]} : vector<2x96xf32> to vector<2x32xf32>
    %329 = vector.broadcast %4 : vector<1x32xf32> to vector<2x32xf32>
    %330 = arith.addf %328, %329 : vector<2x32xf32>
    %331 = arith.mulf %320, %330 : vector<2x32xf32>
    %332 = arith.addf %327, %331 : vector<2x32xf32>
    %333 = math.tanh %332 : vector<2x32xf32>
    %cst_47 = arith.constant 1.000000e+00 : f32
    %334 = vector.broadcast %cst_47 : f32 to vector<2x32xf32>
    %335 = arith.subf %334, %326 : vector<2x32xf32>
    %336 = arith.mulf %335, %333 : vector<2x32xf32>
    %337 = arith.mulf %326, %298 : vector<2x32xf32>
    %338 = arith.addf %336, %337 : vector<2x32xf32>
    %339 = arith.select %16, %298, %338 : vector<2x32xi1>, vector<2x32xf32>
    %c7_i32 = arith.constant 7 : i32
    %340 = vector.broadcast %c7_i32 : i32 to vector<2x3xi32>
    %341 = arith.cmpi eq, %11, %340 : vector<2x3xi32>
    %342 = arith.extui %341 : vector<2x3xi1> to vector<2x3xi32>
    %343 = arith.sitofp %342 : vector<2x3xi32> to vector<2x3xf32>
    %344 = vector.shape_cast %343 : vector<2x3xf32> to vector<2x3x1xf32>
    %345 = vector.shape_cast %339 : vector<2x32xf32> to vector<2x1x32xf32>
    %346 = vector.broadcast %344 : vector<2x3x1xf32> to vector<2x3x32xf32>
    %347 = vector.broadcast %345 : vector<2x1x32xf32> to vector<2x3x32xf32>
    %348 = arith.mulf %346, %347 : vector<2x3x32xf32>
    %349 = arith.addf %308, %348 : vector<2x3x32xf32>
    %350 = vector.extract_strided_slice %7 {offsets = [16, 0], sizes = [2, 96], strides = [1, 1]} : vector<20x96xf32> to vector<2x96xf32>
    %351 = vector.broadcast %3 : vector<1x96xf32> to vector<2x96xf32>
    %352 = arith.addf %351, %350 : vector<2x96xf32>
    %353 = arith.truncf %339 : vector<2x32xf32> to vector<2x32xbf16>
    %cst_48 = arith.constant dense<0.000000e+00> : vector<2x96xf32>
    %354 = tpu.matmul %353, %2, %cst_48 {dimension_numbers = #tpu.dot_dimension_numbers<[1], [0], [0], [1], [0, 0, 1, 1], [], []>} : vector<2x32xbf16>, vector<32x96xbf16>, vector<2x96xf32> -> vector<2x96xf32>
    %355 = arith.addf %352, %354 : vector<2x96xf32>
    %356 = vector.extract_strided_slice %355 {offsets = [0, 0], sizes = [2, 32], strides = [1, 1]} : vector<2x96xf32> to vector<2x32xf32>
    %357 = arith.negf %356 : vector<2x32xf32>
    %358 = math.exp %357 : vector<2x32xf32>
    %cst_49 = arith.constant 1.000000e+00 : f32
    %359 = vector.broadcast %cst_49 : f32 to vector<2x32xf32>
    %360 = arith.addf %359, %358 : vector<2x32xf32>
    %361 = arith.divf %359, %360 : vector<2x32xf32>
    %362 = vector.extract_strided_slice %355 {offsets = [0, 32], sizes = [2, 32], strides = [1, 1]} : vector<2x96xf32> to vector<2x32xf32>
    %363 = arith.negf %362 : vector<2x32xf32>
    %364 = math.exp %363 : vector<2x32xf32>
    %cst_50 = arith.constant 1.000000e+00 : f32
    %365 = vector.broadcast %cst_50 : f32 to vector<2x32xf32>
    %366 = arith.addf %365, %364 : vector<2x32xf32>
    %367 = arith.divf %365, %366 : vector<2x32xf32>
    %368 = vector.extract_strided_slice %352 {offsets = [0, 64], sizes = [2, 32], strides = [1, 1]} : vector<2x96xf32> to vector<2x32xf32>
    %369 = vector.extract_strided_slice %354 {offsets = [0, 64], sizes = [2, 32], strides = [1, 1]} : vector<2x96xf32> to vector<2x32xf32>
    %370 = vector.broadcast %4 : vector<1x32xf32> to vector<2x32xf32>
    %371 = arith.addf %369, %370 : vector<2x32xf32>
    %372 = arith.mulf %361, %371 : vector<2x32xf32>
    %373 = arith.addf %368, %372 : vector<2x32xf32>
    %374 = math.tanh %373 : vector<2x32xf32>
    %cst_51 = arith.constant 1.000000e+00 : f32
    %375 = vector.broadcast %cst_51 : f32 to vector<2x32xf32>
    %376 = arith.subf %375, %367 : vector<2x32xf32>
    %377 = arith.mulf %376, %374 : vector<2x32xf32>
    %378 = arith.mulf %367, %339 : vector<2x32xf32>
    %379 = arith.addf %377, %378 : vector<2x32xf32>
    %380 = arith.select %16, %339, %379 : vector<2x32xi1>, vector<2x32xf32>
    %c8_i32 = arith.constant 8 : i32
    %381 = vector.broadcast %c8_i32 : i32 to vector<2x3xi32>
    %382 = arith.cmpi eq, %11, %381 : vector<2x3xi32>
    %383 = arith.extui %382 : vector<2x3xi1> to vector<2x3xi32>
    %384 = arith.sitofp %383 : vector<2x3xi32> to vector<2x3xf32>
    %385 = vector.shape_cast %384 : vector<2x3xf32> to vector<2x3x1xf32>
    %386 = vector.shape_cast %380 : vector<2x32xf32> to vector<2x1x32xf32>
    %387 = vector.broadcast %385 : vector<2x3x1xf32> to vector<2x3x32xf32>
    %388 = vector.broadcast %386 : vector<2x1x32xf32> to vector<2x3x32xf32>
    %389 = arith.mulf %387, %388 : vector<2x3x32xf32>
    %390 = arith.addf %349, %389 : vector<2x3x32xf32>
    %391 = vector.extract_strided_slice %7 {offsets = [18, 0], sizes = [2, 96], strides = [1, 1]} : vector<20x96xf32> to vector<2x96xf32>
    %392 = vector.broadcast %3 : vector<1x96xf32> to vector<2x96xf32>
    %393 = arith.addf %392, %391 : vector<2x96xf32>
    %394 = arith.truncf %380 : vector<2x32xf32> to vector<2x32xbf16>
    %cst_52 = arith.constant dense<0.000000e+00> : vector<2x96xf32>
    %395 = tpu.matmul %394, %2, %cst_52 {dimension_numbers = #tpu.dot_dimension_numbers<[1], [0], [0], [1], [0, 0, 1, 1], [], []>} : vector<2x32xbf16>, vector<32x96xbf16>, vector<2x96xf32> -> vector<2x96xf32>
    %396 = arith.addf %393, %395 : vector<2x96xf32>
    %397 = vector.extract_strided_slice %396 {offsets = [0, 0], sizes = [2, 32], strides = [1, 1]} : vector<2x96xf32> to vector<2x32xf32>
    %398 = arith.negf %397 : vector<2x32xf32>
    %399 = math.exp %398 : vector<2x32xf32>
    %cst_53 = arith.constant 1.000000e+00 : f32
    %400 = vector.broadcast %cst_53 : f32 to vector<2x32xf32>
    %401 = arith.addf %400, %399 : vector<2x32xf32>
    %402 = arith.divf %400, %401 : vector<2x32xf32>
    %403 = vector.extract_strided_slice %396 {offsets = [0, 32], sizes = [2, 32], strides = [1, 1]} : vector<2x96xf32> to vector<2x32xf32>
    %404 = arith.negf %403 : vector<2x32xf32>
    %405 = math.exp %404 : vector<2x32xf32>
    %cst_54 = arith.constant 1.000000e+00 : f32
    %406 = vector.broadcast %cst_54 : f32 to vector<2x32xf32>
    %407 = arith.addf %406, %405 : vector<2x32xf32>
    %408 = arith.divf %406, %407 : vector<2x32xf32>
    %409 = vector.extract_strided_slice %393 {offsets = [0, 64], sizes = [2, 32], strides = [1, 1]} : vector<2x96xf32> to vector<2x32xf32>
    %410 = vector.extract_strided_slice %395 {offsets = [0, 64], sizes = [2, 32], strides = [1, 1]} : vector<2x96xf32> to vector<2x32xf32>
    %411 = vector.broadcast %4 : vector<1x32xf32> to vector<2x32xf32>
    %412 = arith.addf %410, %411 : vector<2x32xf32>
    %413 = arith.mulf %402, %412 : vector<2x32xf32>
    %414 = arith.addf %409, %413 : vector<2x32xf32>
    %415 = math.tanh %414 : vector<2x32xf32>
    %cst_55 = arith.constant 1.000000e+00 : f32
    %416 = vector.broadcast %cst_55 : f32 to vector<2x32xf32>
    %417 = arith.subf %416, %408 : vector<2x32xf32>
    %418 = arith.mulf %417, %415 : vector<2x32xf32>
    %419 = arith.mulf %408, %380 : vector<2x32xf32>
    %420 = arith.addf %418, %419 : vector<2x32xf32>
    %421 = arith.select %16, %380, %420 : vector<2x32xi1>, vector<2x32xf32>
    %c9_i32 = arith.constant 9 : i32
    %422 = vector.broadcast %c9_i32 : i32 to vector<2x3xi32>
    %423 = arith.cmpi eq, %11, %422 : vector<2x3xi32>
    %424 = arith.extui %423 : vector<2x3xi1> to vector<2x3xi32>
    %425 = arith.sitofp %424 : vector<2x3xi32> to vector<2x3xf32>
    %426 = vector.shape_cast %425 : vector<2x3xf32> to vector<2x3x1xf32>
    %427 = vector.shape_cast %421 : vector<2x32xf32> to vector<2x1x32xf32>
    %428 = vector.broadcast %426 : vector<2x3x1xf32> to vector<2x3x32xf32>
    %429 = vector.broadcast %427 : vector<2x1x32xf32> to vector<2x3x32xf32>
    %430 = arith.mulf %428, %429 : vector<2x3x32xf32>
    %431 = arith.addf %390, %430 : vector<2x3x32xf32>
    %432 = vector.extract_strided_slice %431 {offsets = [0, 0, 0], sizes = [2, 3, 16], strides = [1, 1, 1]} : vector<2x3x32xf32> to vector<2x3x16xf32>
    %433 = vector.extract_strided_slice %421 {offsets = [0, 16], sizes = [2, 16], strides = [1, 1]} : vector<2x32xf32> to vector<2x16xf32>
    %c64 = arith.constant 64 : index
    %c0_56 = arith.constant 0 : index
    %434 = vector.load %arg4[%c64, %c0_56] : memref<272x96xbf16, #tpu.memory_space<vmem>>, vector<16x16xbf16>
    %c80 = arith.constant 80 : index
    %c0_57 = arith.constant 0 : index
    %435 = vector.load %arg4[%c80, %c0_57] : memref<272x96xbf16, #tpu.memory_space<vmem>>, vector<64x32xbf16>
    %c144 = arith.constant 144 : index
    %c0_58 = arith.constant 0 : index
    %436 = vector.load %arg4[%c144, %c0_58] : memref<272x96xbf16, #tpu.memory_space<vmem>>, vector<48x32xbf16>
    %c192 = arith.constant 192 : index
    %c0_59 = arith.constant 0 : index
    %437 = vector.load %arg4[%c192, %c0_59] : memref<272x96xbf16, #tpu.memory_space<vmem>>, vector<16x48xbf16>
    %c208 = arith.constant 208 : index
    %c0_60 = arith.constant 0 : index
    %438 = vector.load %arg4[%c208, %c0_60] : memref<272x96xbf16, #tpu.memory_space<vmem>>, vector<16x48xbf16>
    %c16_61 = arith.constant 16 : index
    %c0_62 = arith.constant 0 : index
    %439 = vector.load %arg5[%c16_61, %c0_62] : memref<96x96xf32, #tpu.memory_space<vmem>>, vector<1x32xf32>
    %c24 = arith.constant 24 : index
    %c0_63 = arith.constant 0 : index
    %440 = vector.load %arg5[%c24, %c0_63] : memref<96x96xf32, #tpu.memory_space<vmem>>, vector<1x32xf32>
    %c32_64 = arith.constant 32 : index
    %c0_65 = arith.constant 0 : index
    %441 = vector.load %arg5[%c32_64, %c0_65] : memref<96x96xf32, #tpu.memory_space<vmem>>, vector<1x32xf32>
    %c40 = arith.constant 40 : index
    %c0_66 = arith.constant 0 : index
    %442 = vector.load %arg5[%c40, %c0_66] : memref<96x96xf32, #tpu.memory_space<vmem>>, vector<1x32xf32>
    %c48 = arith.constant 48 : index
    %c0_67 = arith.constant 0 : index
    %443 = vector.load %arg5[%c48, %c0_67] : memref<96x96xf32, #tpu.memory_space<vmem>>, vector<1x1xf32>
    %c56 = arith.constant 56 : index
    %c0_68 = arith.constant 0 : index
    %444 = vector.load %arg5[%c56, %c0_68] : memref<96x96xf32, #tpu.memory_space<vmem>>, vector<1x48xf32>
    %c64_69 = arith.constant 64 : index
    %c0_70 = arith.constant 0 : index
    %445 = vector.load %arg5[%c64_69, %c0_70] : memref<96x96xf32, #tpu.memory_space<vmem>>, vector<1x16xf32>
    %446 = vector.shape_cast %432 : vector<2x3x16xf32> to vector<6x16xf32>
    %447 = arith.truncf %446 : vector<6x16xf32> to vector<6x16xbf16>
    %cst_71 = arith.constant dense<0.000000e+00> : vector<6x16xf32>
    %448 = tpu.matmul %447, %434, %cst_71 {dimension_numbers = #tpu.dot_dimension_numbers<[1], [0], [0], [1], [0, 0, 1, 1], [], []>} : vector<6x16xbf16>, vector<16x16xbf16>, vector<6x16xf32> -> vector<6x16xf32>
    %449 = vector.shape_cast %448 : vector<6x16xf32> to vector<2x3x16xf32>
    %450 = vector.shape_cast %433 : vector<2x16xf32> to vector<2x1x16xf32>
    %451 = vector.shape_cast %450 : vector<2x1x16xf32> to vector<2x1x16xf32>
    %452 = vector.broadcast %451 : vector<2x1x16xf32> to vector<2x3x16xf32>
    %453 = arith.mulf %449, %452 : vector<2x3x16xf32>
    %cst_72 = arith.constant dense<0.000000e+00> : vector<2x3xf32>
    %454 = vector.multi_reduction <add>, %453, %cst_72 [2] : vector<2x3x16xf32> to vector<2x3xf32>
    %455 = arith.mulf %432, %452 : vector<2x3x16xf32>
    %456 = arith.subf %432, %452 : vector<2x3x16xf32>
    %457 = math.absf %456 : vector<2x3x16xf32>
    %458 = tpu.concatenate %432, %455, %457, %452 in 2 : vector<2x3x16xf32>, vector<2x3x16xf32>, vector<2x3x16xf32>, vector<2x3x16xf32> -> vector<2x3x64xf32>
    %459 = vector.shape_cast %458 : vector<2x3x64xf32> to vector<6x64xf32>
    %460 = arith.truncf %459 : vector<6x64xf32> to vector<6x64xbf16>
    %cst_73 = arith.constant dense<0.000000e+00> : vector<6x32xf32>
    %461 = tpu.matmul %460, %435, %cst_73 {dimension_numbers = #tpu.dot_dimension_numbers<[1], [0], [0], [1], [0, 0, 1, 1], [], []>} : vector<6x64xbf16>, vector<64x32xbf16>, vector<6x32xf32> -> vector<6x32xf32>
    %462 = vector.shape_cast %461 : vector<6x32xf32> to vector<2x3x32xf32>
    %463 = vector.shape_cast %454 : vector<2x3xf32> to vector<2x3x1xf32>
    %464 = vector.shape_cast %439 : vector<1x32xf32> to vector<1x1x32xf32>
    %465 = vector.broadcast %463 : vector<2x3x1xf32> to vector<2x3x32xf32>
    %466 = vector.broadcast %464 : vector<1x1x32xf32> to vector<2x3x32xf32>
    %467 = arith.mulf %465, %466 : vector<2x3x32xf32>
    %468 = arith.addf %462, %467 : vector<2x3x32xf32>
    %469 = vector.shape_cast %441 : vector<1x32xf32> to vector<1x1x32xf32>
    %470 = vector.broadcast %469 : vector<1x1x32xf32> to vector<2x3x32xf32>
    %471 = arith.addf %468, %470 : vector<2x3x32xf32>
    %c0_i32_74 = arith.constant 0 : i32
    %472 = vector.broadcast %c0_i32_74 : i32 to vector<2x3xi32>
    %473 = arith.cmpi sge, %11, %472 : vector<2x3xi32>
    %474 = arith.extui %473 : vector<2x3xi1> to vector<2x3xi32>
    %475 = arith.sitofp %474 : vector<2x3xi32> to vector<2x3xf32>
    %476 = vector.shape_cast %433 : vector<2x16xf32> to vector<2x1x16xf32>
    %477 = vector.shape_cast %476 : vector<2x1x16xf32> to vector<2x1x16xf32>
    %478 = vector.broadcast %477 : vector<2x1x16xf32> to vector<2x3x16xf32>
    %479 = arith.mulf %449, %478 : vector<2x3x16xf32>
    %cst_75 = arith.constant dense<0.000000e+00> : vector<2x3xf32>
    %480 = vector.multi_reduction <add>, %479, %cst_75 [2] : vector<2x3x16xf32> to vector<2x3xf32>
    %481 = arith.mulf %432, %478 : vector<2x3x16xf32>
    %482 = arith.subf %432, %478 : vector<2x3x16xf32>
    %483 = math.absf %482 : vector<2x3x16xf32>
    %484 = tpu.concatenate %481, %483, %478 in 2 : vector<2x3x16xf32>, vector<2x3x16xf32>, vector<2x3x16xf32> -> vector<2x3x48xf32>
    %485 = vector.shape_cast %484 : vector<2x3x48xf32> to vector<6x48xf32>
    %486 = arith.truncf %485 : vector<6x48xf32> to vector<6x48xbf16>
    %cst_76 = arith.constant dense<0.000000e+00> : vector<6x32xf32>
    %487 = tpu.matmul %486, %436, %cst_76 {dimension_numbers = #tpu.dot_dimension_numbers<[1], [0], [0], [1], [0, 0, 1, 1], [], []>} : vector<6x48xbf16>, vector<48x32xbf16>, vector<6x32xf32> -> vector<6x32xf32>
    %488 = vector.shape_cast %487 : vector<6x32xf32> to vector<2x3x32xf32>
    %489 = arith.addf %471, %488 : vector<2x3x32xf32>
    %490 = vector.shape_cast %480 : vector<2x3xf32> to vector<2x3x1xf32>
    %491 = vector.shape_cast %440 : vector<1x32xf32> to vector<1x1x32xf32>
    %492 = vector.broadcast %490 : vector<2x3x1xf32> to vector<2x3x32xf32>
    %493 = vector.broadcast %491 : vector<1x1x32xf32> to vector<2x3x32xf32>
    %494 = arith.mulf %492, %493 : vector<2x3x32xf32>
    %495 = arith.addf %489, %494 : vector<2x3x32xf32>
    %496 = math.tanh %495 : vector<2x3x32xf32>
    %497 = vector.shape_cast %442 : vector<1x32xf32> to vector<1x1x32xf32>
    %498 = vector.broadcast %497 : vector<1x1x32xf32> to vector<2x3x32xf32>
    %499 = arith.mulf %496, %498 : vector<2x3x32xf32>
    %cst_77 = arith.constant dense<0.000000e+00> : vector<2x3xf32>
    %500 = vector.multi_reduction <add>, %499, %cst_77 [2] : vector<2x3x32xf32> to vector<2x3xf32>
    %501 = vector.broadcast %443 : vector<1x1xf32> to vector<2x3xf32>
    %502 = arith.addf %500, %501 : vector<2x3xf32>
    %cst_78 = arith.constant -1.000000e+30 : f32
    %503 = vector.broadcast %cst_78 : f32 to vector<2x3xf32>
    %504 = arith.select %473, %502, %503 : vector<2x3xi1>, vector<2x3xf32>
    %cst_79 = arith.constant dense<0xFF800000> : vector<2xf32>
    %505 = vector.multi_reduction <maximumf>, %504, %cst_79 [1] : vector<2x3xf32> to vector<2xf32>
    %506 = vector.shape_cast %505 : vector<2xf32> to vector<2x1xf32>
    %507 = vector.broadcast %506 : vector<2x1xf32> to vector<2x3xf32>
    %508 = arith.subf %504, %507 : vector<2x3xf32>
    %509 = math.exp %508 : vector<2x3xf32>
    %510 = arith.mulf %509, %475 : vector<2x3xf32>
    %cst_80 = arith.constant dense<0.000000e+00> : vector<2xf32>
    %511 = vector.multi_reduction <add>, %510, %cst_80 [1] : vector<2x3xf32> to vector<2xf32>
    %512 = vector.shape_cast %511 : vector<2xf32> to vector<2x1xf32>
    %cst_81 = arith.constant 1.000000e-30 : f32
    %513 = vector.broadcast %cst_81 : f32 to vector<2x1xf32>
    %514 = arith.maximumf %512, %513 : vector<2x1xf32>
    %515 = tpu.reciprocal %514 {approx = true} : vector<2x1xf32> -> vector<2x1xf32>
    %516 = vector.broadcast %515 : vector<2x1xf32> to vector<2x3xf32>
    %517 = arith.mulf %510, %516 : vector<2x3xf32>
    %518 = vector.shape_cast %517 : vector<2x3xf32> to vector<2x3x1xf32>
    %519 = vector.broadcast %518 : vector<2x3x1xf32> to vector<2x3x16xf32>
    %520 = arith.mulf %432, %519 : vector<2x3x16xf32>
    %cst_82 = arith.constant dense<0.000000e+00> : vector<2x16xf32>
    %521 = vector.multi_reduction <add>, %520, %cst_82 [1] : vector<2x3x16xf32> to vector<2x16xf32>
    %522 = arith.truncf %521 : vector<2x16xf32> to vector<2x16xbf16>
    %cst_83 = arith.constant dense<0.000000e+00> : vector<2x48xf32>
    %523 = tpu.matmul %522, %437, %cst_83 {dimension_numbers = #tpu.dot_dimension_numbers<[1], [0], [0], [1], [0, 0, 1, 1], [], []>} : vector<2x16xbf16>, vector<16x48xbf16>, vector<2x48xf32> -> vector<2x48xf32>
    %524 = vector.broadcast %444 : vector<1x48xf32> to vector<2x48xf32>
    %525 = arith.addf %523, %524 : vector<2x48xf32>
    %526 = arith.truncf %433 : vector<2x16xf32> to vector<2x16xbf16>
    %cst_84 = arith.constant dense<0.000000e+00> : vector<2x48xf32>
    %527 = tpu.matmul %526, %438, %cst_84 {dimension_numbers = #tpu.dot_dimension_numbers<[1], [0], [0], [1], [0, 0, 1, 1], [], []>} : vector<2x16xbf16>, vector<16x48xbf16>, vector<2x48xf32> -> vector<2x48xf32>
    %528 = vector.extract_strided_slice %525 {offsets = [0, 0], sizes = [2, 16], strides = [1, 1]} : vector<2x48xf32> to vector<2x16xf32>
    %529 = vector.extract_strided_slice %527 {offsets = [0, 0], sizes = [2, 16], strides = [1, 1]} : vector<2x48xf32> to vector<2x16xf32>
    %530 = arith.addf %528, %529 : vector<2x16xf32>
    %531 = arith.negf %530 : vector<2x16xf32>
    %532 = math.exp %531 : vector<2x16xf32>
    %cst_85 = arith.constant 1.000000e+00 : f32
    %533 = vector.broadcast %cst_85 : f32 to vector<2x16xf32>
    %534 = arith.addf %533, %532 : vector<2x16xf32>
    %535 = arith.divf %533, %534 : vector<2x16xf32>
    %536 = vector.extract_strided_slice %525 {offsets = [0, 16], sizes = [2, 16], strides = [1, 1]} : vector<2x48xf32> to vector<2x16xf32>
    %537 = vector.extract_strided_slice %527 {offsets = [0, 16], sizes = [2, 16], strides = [1, 1]} : vector<2x48xf32> to vector<2x16xf32>
    %538 = arith.addf %536, %537 : vector<2x16xf32>
    %539 = arith.negf %538 : vector<2x16xf32>
    %540 = math.exp %539 : vector<2x16xf32>
    %cst_86 = arith.constant 1.000000e+00 : f32
    %541 = vector.broadcast %cst_86 : f32 to vector<2x16xf32>
    %542 = arith.addf %541, %540 : vector<2x16xf32>
    %543 = arith.divf %541, %542 : vector<2x16xf32>
    %544 = vector.extract_strided_slice %525 {offsets = [0, 32], sizes = [2, 16], strides = [1, 1]} : vector<2x48xf32> to vector<2x16xf32>
    %545 = vector.extract_strided_slice %527 {offsets = [0, 32], sizes = [2, 16], strides = [1, 1]} : vector<2x48xf32> to vector<2x16xf32>
    %546 = vector.broadcast %445 : vector<1x16xf32> to vector<2x16xf32>
    %547 = arith.addf %545, %546 : vector<2x16xf32>
    %548 = arith.mulf %535, %547 : vector<2x16xf32>
    %549 = arith.addf %544, %548 : vector<2x16xf32>
    %550 = math.tanh %549 : vector<2x16xf32>
    %cst_87 = arith.constant 1.000000e+00 : f32
    %551 = vector.broadcast %cst_87 : f32 to vector<2x16xf32>
    %552 = arith.subf %551, %543 : vector<2x16xf32>
    %553 = arith.mulf %552, %550 : vector<2x16xf32>
    %554 = arith.mulf %543, %433 : vector<2x16xf32>
    %555 = arith.addf %553, %554 : vector<2x16xf32>
    %556 = vector.shape_cast %555 : vector<2x16xf32> to vector<2x1x16xf32>
    %557 = vector.shape_cast %556 : vector<2x1x16xf32> to vector<2x1x16xf32>
    %558 = vector.broadcast %557 : vector<2x1x16xf32> to vector<2x3x16xf32>
    %559 = arith.mulf %449, %558 : vector<2x3x16xf32>
    %cst_88 = arith.constant dense<0.000000e+00> : vector<2x3xf32>
    %560 = vector.multi_reduction <add>, %559, %cst_88 [2] : vector<2x3x16xf32> to vector<2x3xf32>
    %561 = arith.mulf %432, %558 : vector<2x3x16xf32>
    %562 = arith.subf %432, %558 : vector<2x3x16xf32>
    %563 = math.absf %562 : vector<2x3x16xf32>
    %564 = tpu.concatenate %561, %563, %558 in 2 : vector<2x3x16xf32>, vector<2x3x16xf32>, vector<2x3x16xf32> -> vector<2x3x48xf32>
    %565 = vector.shape_cast %564 : vector<2x3x48xf32> to vector<6x48xf32>
    %566 = arith.truncf %565 : vector<6x48xf32> to vector<6x48xbf16>
    %cst_89 = arith.constant dense<0.000000e+00> : vector<6x32xf32>
    %567 = tpu.matmul %566, %436, %cst_89 {dimension_numbers = #tpu.dot_dimension_numbers<[1], [0], [0], [1], [0, 0, 1, 1], [], []>} : vector<6x48xbf16>, vector<48x32xbf16>, vector<6x32xf32> -> vector<6x32xf32>
    %568 = vector.shape_cast %567 : vector<6x32xf32> to vector<2x3x32xf32>
    %569 = arith.addf %471, %568 : vector<2x3x32xf32>
    %570 = vector.shape_cast %560 : vector<2x3xf32> to vector<2x3x1xf32>
    %571 = vector.shape_cast %440 : vector<1x32xf32> to vector<1x1x32xf32>
    %572 = vector.broadcast %570 : vector<2x3x1xf32> to vector<2x3x32xf32>
    %573 = vector.broadcast %571 : vector<1x1x32xf32> to vector<2x3x32xf32>
    %574 = arith.mulf %572, %573 : vector<2x3x32xf32>
    %575 = arith.addf %569, %574 : vector<2x3x32xf32>
    %576 = math.tanh %575 : vector<2x3x32xf32>
    %577 = vector.shape_cast %442 : vector<1x32xf32> to vector<1x1x32xf32>
    %578 = vector.broadcast %577 : vector<1x1x32xf32> to vector<2x3x32xf32>
    %579 = arith.mulf %576, %578 : vector<2x3x32xf32>
    %cst_90 = arith.constant dense<0.000000e+00> : vector<2x3xf32>
    %580 = vector.multi_reduction <add>, %579, %cst_90 [2] : vector<2x3x32xf32> to vector<2x3xf32>
    %581 = vector.broadcast %443 : vector<1x1xf32> to vector<2x3xf32>
    %582 = arith.addf %580, %581 : vector<2x3xf32>
    %cst_91 = arith.constant -1.000000e+30 : f32
    %583 = vector.broadcast %cst_91 : f32 to vector<2x3xf32>
    %584 = arith.select %473, %582, %583 : vector<2x3xi1>, vector<2x3xf32>
    %cst_92 = arith.constant dense<0xFF800000> : vector<2xf32>
    %585 = vector.multi_reduction <maximumf>, %584, %cst_92 [1] : vector<2x3xf32> to vector<2xf32>
    %586 = vector.shape_cast %585 : vector<2xf32> to vector<2x1xf32>
    %587 = vector.broadcast %586 : vector<2x1xf32> to vector<2x3xf32>
    %588 = arith.subf %584, %587 : vector<2x3xf32>
    %589 = math.exp %588 : vector<2x3xf32>
    %590 = arith.mulf %589, %475 : vector<2x3xf32>
    %cst_93 = arith.constant dense<0.000000e+00> : vector<2xf32>
    %591 = vector.multi_reduction <add>, %590, %cst_93 [1] : vector<2x3xf32> to vector<2xf32>
    %592 = vector.shape_cast %591 : vector<2xf32> to vector<2x1xf32>
    %cst_94 = arith.constant 1.000000e-30 : f32
    %593 = vector.broadcast %cst_94 : f32 to vector<2x1xf32>
    %594 = arith.maximumf %592, %593 : vector<2x1xf32>
    %595 = tpu.reciprocal %594 {approx = true} : vector<2x1xf32> -> vector<2x1xf32>
    %596 = vector.broadcast %595 : vector<2x1xf32> to vector<2x3xf32>
    %597 = arith.mulf %590, %596 : vector<2x3xf32>
    %598 = vector.shape_cast %597 : vector<2x3xf32> to vector<2x3x1xf32>
    %599 = vector.broadcast %598 : vector<2x3x1xf32> to vector<2x3x16xf32>
    %600 = arith.mulf %432, %599 : vector<2x3x16xf32>
    %cst_95 = arith.constant dense<0.000000e+00> : vector<2x16xf32>
    %601 = vector.multi_reduction <add>, %600, %cst_95 [1] : vector<2x3x16xf32> to vector<2x16xf32>
    %602 = arith.truncf %601 : vector<2x16xf32> to vector<2x16xbf16>
    %cst_96 = arith.constant dense<0.000000e+00> : vector<2x48xf32>
    %603 = tpu.matmul %602, %437, %cst_96 {dimension_numbers = #tpu.dot_dimension_numbers<[1], [0], [0], [1], [0, 0, 1, 1], [], []>} : vector<2x16xbf16>, vector<16x48xbf16>, vector<2x48xf32> -> vector<2x48xf32>
    %604 = vector.broadcast %444 : vector<1x48xf32> to vector<2x48xf32>
    %605 = arith.addf %603, %604 : vector<2x48xf32>
    %606 = arith.truncf %555 : vector<2x16xf32> to vector<2x16xbf16>
    %cst_97 = arith.constant dense<0.000000e+00> : vector<2x48xf32>
    %607 = tpu.matmul %606, %438, %cst_97 {dimension_numbers = #tpu.dot_dimension_numbers<[1], [0], [0], [1], [0, 0, 1, 1], [], []>} : vector<2x16xbf16>, vector<16x48xbf16>, vector<2x48xf32> -> vector<2x48xf32>
    %608 = vector.extract_strided_slice %605 {offsets = [0, 0], sizes = [2, 16], strides = [1, 1]} : vector<2x48xf32> to vector<2x16xf32>
    %609 = vector.extract_strided_slice %607 {offsets = [0, 0], sizes = [2, 16], strides = [1, 1]} : vector<2x48xf32> to vector<2x16xf32>
    %610 = arith.addf %608, %609 : vector<2x16xf32>
    %611 = arith.negf %610 : vector<2x16xf32>
    %612 = math.exp %611 : vector<2x16xf32>
    %cst_98 = arith.constant 1.000000e+00 : f32
    %613 = vector.broadcast %cst_98 : f32 to vector<2x16xf32>
    %614 = arith.addf %613, %612 : vector<2x16xf32>
    %615 = arith.divf %613, %614 : vector<2x16xf32>
    %616 = vector.extract_strided_slice %605 {offsets = [0, 16], sizes = [2, 16], strides = [1, 1]} : vector<2x48xf32> to vector<2x16xf32>
    %617 = vector.extract_strided_slice %607 {offsets = [0, 16], sizes = [2, 16], strides = [1, 1]} : vector<2x48xf32> to vector<2x16xf32>
    %618 = arith.addf %616, %617 : vector<2x16xf32>
    %619 = arith.negf %618 : vector<2x16xf32>
    %620 = math.exp %619 : vector<2x16xf32>
    %cst_99 = arith.constant 1.000000e+00 : f32
    %621 = vector.broadcast %cst_99 : f32 to vector<2x16xf32>
    %622 = arith.addf %621, %620 : vector<2x16xf32>
    %623 = arith.divf %621, %622 : vector<2x16xf32>
    %624 = vector.extract_strided_slice %605 {offsets = [0, 32], sizes = [2, 16], strides = [1, 1]} : vector<2x48xf32> to vector<2x16xf32>
    %625 = vector.extract_strided_slice %607 {offsets = [0, 32], sizes = [2, 16], strides = [1, 1]} : vector<2x48xf32> to vector<2x16xf32>
    %626 = vector.broadcast %445 : vector<1x16xf32> to vector<2x16xf32>
    %627 = arith.addf %625, %626 : vector<2x16xf32>
    %628 = arith.mulf %615, %627 : vector<2x16xf32>
    %629 = arith.addf %624, %628 : vector<2x16xf32>
    %630 = math.tanh %629 : vector<2x16xf32>
    %cst_100 = arith.constant 1.000000e+00 : f32
    %631 = vector.broadcast %cst_100 : f32 to vector<2x16xf32>
    %632 = arith.subf %631, %623 : vector<2x16xf32>
    %633 = arith.mulf %632, %630 : vector<2x16xf32>
    %634 = arith.mulf %623, %555 : vector<2x16xf32>
    %635 = arith.addf %633, %634 : vector<2x16xf32>
    %636 = vector.shape_cast %635 : vector<2x16xf32> to vector<2x1x16xf32>
    %637 = vector.shape_cast %636 : vector<2x1x16xf32> to vector<2x1x16xf32>
    %638 = vector.broadcast %637 : vector<2x1x16xf32> to vector<2x3x16xf32>
    %639 = arith.mulf %449, %638 : vector<2x3x16xf32>
    %cst_101 = arith.constant dense<0.000000e+00> : vector<2x3xf32>
    %640 = vector.multi_reduction <add>, %639, %cst_101 [2] : vector<2x3x16xf32> to vector<2x3xf32>
    %641 = arith.mulf %432, %638 : vector<2x3x16xf32>
    %642 = arith.subf %432, %638 : vector<2x3x16xf32>
    %643 = math.absf %642 : vector<2x3x16xf32>
    %644 = tpu.concatenate %641, %643, %638 in 2 : vector<2x3x16xf32>, vector<2x3x16xf32>, vector<2x3x16xf32> -> vector<2x3x48xf32>
    %645 = vector.shape_cast %644 : vector<2x3x48xf32> to vector<6x48xf32>
    %646 = arith.truncf %645 : vector<6x48xf32> to vector<6x48xbf16>
    %cst_102 = arith.constant dense<0.000000e+00> : vector<6x32xf32>
    %647 = tpu.matmul %646, %436, %cst_102 {dimension_numbers = #tpu.dot_dimension_numbers<[1], [0], [0], [1], [0, 0, 1, 1], [], []>} : vector<6x48xbf16>, vector<48x32xbf16>, vector<6x32xf32> -> vector<6x32xf32>
    %648 = vector.shape_cast %647 : vector<6x32xf32> to vector<2x3x32xf32>
    %649 = arith.addf %471, %648 : vector<2x3x32xf32>
    %650 = vector.shape_cast %640 : vector<2x3xf32> to vector<2x3x1xf32>
    %651 = vector.shape_cast %440 : vector<1x32xf32> to vector<1x1x32xf32>
    %652 = vector.broadcast %650 : vector<2x3x1xf32> to vector<2x3x32xf32>
    %653 = vector.broadcast %651 : vector<1x1x32xf32> to vector<2x3x32xf32>
    %654 = arith.mulf %652, %653 : vector<2x3x32xf32>
    %655 = arith.addf %649, %654 : vector<2x3x32xf32>
    %656 = math.tanh %655 : vector<2x3x32xf32>
    %657 = vector.shape_cast %442 : vector<1x32xf32> to vector<1x1x32xf32>
    %658 = vector.broadcast %657 : vector<1x1x32xf32> to vector<2x3x32xf32>
    %659 = arith.mulf %656, %658 : vector<2x3x32xf32>
    %cst_103 = arith.constant dense<0.000000e+00> : vector<2x3xf32>
    %660 = vector.multi_reduction <add>, %659, %cst_103 [2] : vector<2x3x32xf32> to vector<2x3xf32>
    %661 = vector.broadcast %443 : vector<1x1xf32> to vector<2x3xf32>
    %662 = arith.addf %660, %661 : vector<2x3xf32>
    %cst_104 = arith.constant -1.000000e+30 : f32
    %663 = vector.broadcast %cst_104 : f32 to vector<2x3xf32>
    %664 = arith.select %473, %662, %663 : vector<2x3xi1>, vector<2x3xf32>
    %cst_105 = arith.constant dense<0xFF800000> : vector<2xf32>
    %665 = vector.multi_reduction <maximumf>, %664, %cst_105 [1] : vector<2x3xf32> to vector<2xf32>
    %666 = vector.shape_cast %665 : vector<2xf32> to vector<2x1xf32>
    %667 = vector.broadcast %666 : vector<2x1xf32> to vector<2x3xf32>
    %668 = arith.subf %664, %667 : vector<2x3xf32>
    %669 = math.exp %668 : vector<2x3xf32>
    %670 = arith.mulf %669, %475 : vector<2x3xf32>
    %cst_106 = arith.constant dense<0.000000e+00> : vector<2xf32>
    %671 = vector.multi_reduction <add>, %670, %cst_106 [1] : vector<2x3xf32> to vector<2xf32>
    %672 = vector.shape_cast %671 : vector<2xf32> to vector<2x1xf32>
    %cst_107 = arith.constant 1.000000e-30 : f32
    %673 = vector.broadcast %cst_107 : f32 to vector<2x1xf32>
    %674 = arith.maximumf %672, %673 : vector<2x1xf32>
    %675 = tpu.reciprocal %674 {approx = true} : vector<2x1xf32> -> vector<2x1xf32>
    %676 = vector.broadcast %675 : vector<2x1xf32> to vector<2x3xf32>
    %677 = arith.mulf %670, %676 : vector<2x3xf32>
    %678 = vector.shape_cast %677 : vector<2x3xf32> to vector<2x3x1xf32>
    %679 = vector.broadcast %678 : vector<2x3x1xf32> to vector<2x3x16xf32>
    %680 = arith.mulf %432, %679 : vector<2x3x16xf32>
    %cst_108 = arith.constant dense<0.000000e+00> : vector<2x16xf32>
    %681 = vector.multi_reduction <add>, %680, %cst_108 [1] : vector<2x3x16xf32> to vector<2x16xf32>
    %682 = arith.truncf %681 : vector<2x16xf32> to vector<2x16xbf16>
    %cst_109 = arith.constant dense<0.000000e+00> : vector<2x48xf32>
    %683 = tpu.matmul %682, %437, %cst_109 {dimension_numbers = #tpu.dot_dimension_numbers<[1], [0], [0], [1], [0, 0, 1, 1], [], []>} : vector<2x16xbf16>, vector<16x48xbf16>, vector<2x48xf32> -> vector<2x48xf32>
    %684 = vector.broadcast %444 : vector<1x48xf32> to vector<2x48xf32>
    %685 = arith.addf %683, %684 : vector<2x48xf32>
    %686 = arith.truncf %635 : vector<2x16xf32> to vector<2x16xbf16>
    %cst_110 = arith.constant dense<0.000000e+00> : vector<2x48xf32>
    %687 = tpu.matmul %686, %438, %cst_110 {dimension_numbers = #tpu.dot_dimension_numbers<[1], [0], [0], [1], [0, 0, 1, 1], [], []>} : vector<2x16xbf16>, vector<16x48xbf16>, vector<2x48xf32> -> vector<2x48xf32>
    %688 = vector.extract_strided_slice %685 {offsets = [0, 0], sizes = [2, 16], strides = [1, 1]} : vector<2x48xf32> to vector<2x16xf32>
    %689 = vector.extract_strided_slice %687 {offsets = [0, 0], sizes = [2, 16], strides = [1, 1]} : vector<2x48xf32> to vector<2x16xf32>
    %690 = arith.addf %688, %689 : vector<2x16xf32>
    %691 = arith.negf %690 : vector<2x16xf32>
    %692 = math.exp %691 : vector<2x16xf32>
    %cst_111 = arith.constant 1.000000e+00 : f32
    %693 = vector.broadcast %cst_111 : f32 to vector<2x16xf32>
    %694 = arith.addf %693, %692 : vector<2x16xf32>
    %695 = arith.divf %693, %694 : vector<2x16xf32>
    %696 = vector.extract_strided_slice %685 {offsets = [0, 16], sizes = [2, 16], strides = [1, 1]} : vector<2x48xf32> to vector<2x16xf32>
    %697 = vector.extract_strided_slice %687 {offsets = [0, 16], sizes = [2, 16], strides = [1, 1]} : vector<2x48xf32> to vector<2x16xf32>
    %698 = arith.addf %696, %697 : vector<2x16xf32>
    %699 = arith.negf %698 : vector<2x16xf32>
    %700 = math.exp %699 : vector<2x16xf32>
    %cst_112 = arith.constant 1.000000e+00 : f32
    %701 = vector.broadcast %cst_112 : f32 to vector<2x16xf32>
    %702 = arith.addf %701, %700 : vector<2x16xf32>
    %703 = arith.divf %701, %702 : vector<2x16xf32>
    %704 = vector.extract_strided_slice %685 {offsets = [0, 32], sizes = [2, 16], strides = [1, 1]} : vector<2x48xf32> to vector<2x16xf32>
    %705 = vector.extract_strided_slice %687 {offsets = [0, 32], sizes = [2, 16], strides = [1, 1]} : vector<2x48xf32> to vector<2x16xf32>
    %706 = vector.broadcast %445 : vector<1x16xf32> to vector<2x16xf32>
    %707 = arith.addf %705, %706 : vector<2x16xf32>
    %708 = arith.mulf %695, %707 : vector<2x16xf32>
    %709 = arith.addf %704, %708 : vector<2x16xf32>
    %710 = math.tanh %709 : vector<2x16xf32>
    %cst_113 = arith.constant 1.000000e+00 : f32
    %711 = vector.broadcast %cst_113 : f32 to vector<2x16xf32>
    %712 = arith.subf %711, %703 : vector<2x16xf32>
    %713 = arith.mulf %712, %710 : vector<2x16xf32>
    %714 = arith.mulf %703, %635 : vector<2x16xf32>
    %715 = arith.addf %713, %714 : vector<2x16xf32>
    %c224 = arith.constant 224 : index
    %c0_114 = arith.constant 0 : index
    %716 = vector.load %arg4[%c224, %c0_114] : memref<272x96xbf16, #tpu.memory_space<vmem>>, vector<16x52xbf16>
    %c240 = arith.constant 240 : index
    %c0_115 = arith.constant 0 : index
    %717 = vector.load %arg4[%c240, %c0_115] : memref<272x96xbf16, #tpu.memory_space<vmem>>, vector<4x48xbf16>
    %c256 = arith.constant 256 : index
    %c0_116 = arith.constant 0 : index
    %718 = vector.load %arg4[%c256, %c0_116] : memref<272x96xbf16, #tpu.memory_space<vmem>>, vector<16x48xbf16>
    %c72 = arith.constant 72 : index
    %c0_117 = arith.constant 0 : index
    %719 = vector.load %arg5[%c72, %c0_117] : memref<96x96xf32, #tpu.memory_space<vmem>>, vector<1x4xf32>
    %c80_118 = arith.constant 80 : index
    %c0_119 = arith.constant 0 : index
    %720 = vector.load %arg5[%c80_118, %c0_119] : memref<96x96xf32, #tpu.memory_space<vmem>>, vector<1x48xf32>
    %c88 = arith.constant 88 : index
    %c0_120 = arith.constant 0 : index
    %721 = vector.load %arg5[%c88, %c0_120] : memref<96x96xf32, #tpu.memory_space<vmem>>, vector<1x16xf32>
    %722 = arith.truncf %433 : vector<2x16xf32> to vector<2x16xbf16>
    %cst_121 = arith.constant dense<0.000000e+00> : vector<2x48xf32>
    %723 = tpu.matmul %722, %718, %cst_121 {dimension_numbers = #tpu.dot_dimension_numbers<[1], [0], [0], [1], [0, 0, 1, 1], [], []>} : vector<2x16xbf16>, vector<16x48xbf16>, vector<2x48xf32> -> vector<2x48xf32>
    %724 = arith.truncf %715 : vector<2x16xf32> to vector<2x16xbf16>
    %cst_122 = arith.constant dense<0.000000e+00> : vector<2x52xf32>
    %725 = tpu.matmul %724, %716, %cst_122 {dimension_numbers = #tpu.dot_dimension_numbers<[1], [0], [0], [1], [0, 0, 1, 1], [], []>} : vector<2x16xbf16>, vector<16x52xbf16>, vector<2x52xf32> -> vector<2x52xf32>
    %726 = vector.extract_strided_slice %725 {offsets = [0, 0], sizes = [2, 4], strides = [1, 1]} : vector<2x52xf32> to vector<2x4xf32>
    %727 = vector.broadcast %719 : vector<1x4xf32> to vector<2x4xf32>
    %728 = arith.addf %726, %727 : vector<2x4xf32>
    %cst_123 = arith.constant dense<0xFF800000> : vector<2xf32>
    %729 = vector.multi_reduction <maximumf>, %728, %cst_123 [1] : vector<2x4xf32> to vector<2xf32>
    %730 = vector.shape_cast %729 : vector<2xf32> to vector<2x1xf32>
    %731 = vector.broadcast %730 : vector<2x1xf32> to vector<2x4xf32>
    %732 = arith.subf %728, %731 : vector<2x4xf32>
    %733 = math.exp %732 : vector<2x4xf32>
    %cst_124 = arith.constant dense<0.000000e+00> : vector<2xf32>
    %734 = vector.multi_reduction <add>, %733, %cst_124 [1] : vector<2x4xf32> to vector<2xf32>
    %735 = vector.shape_cast %734 : vector<2xf32> to vector<2x1xf32>
    %736 = vector.broadcast %735 : vector<2x1xf32> to vector<2x4xf32>
    %737 = arith.divf %733, %736 : vector<2x4xf32>
    %738 = vector.extract_strided_slice %725 {offsets = [0, 4], sizes = [2, 48], strides = [1, 1]} : vector<2x52xf32> to vector<2x48xf32>
    %739 = arith.truncf %737 : vector<2x4xf32> to vector<2x4xbf16>
    %cst_125 = arith.constant dense<0.000000e+00> : vector<2x48xf32>
    %740 = tpu.matmul %739, %717, %cst_125 {dimension_numbers = #tpu.dot_dimension_numbers<[1], [0], [0], [1], [0, 0, 1, 1], [], []>} : vector<2x4xbf16>, vector<4x48xbf16>, vector<2x48xf32> -> vector<2x48xf32>
    %741 = arith.addf %740, %723 : vector<2x48xf32>
    %742 = vector.broadcast %720 : vector<1x48xf32> to vector<2x48xf32>
    %743 = arith.addf %741, %742 : vector<2x48xf32>
    %744 = vector.extract_strided_slice %743 {offsets = [0, 0], sizes = [2, 16], strides = [1, 1]} : vector<2x48xf32> to vector<2x16xf32>
    %745 = vector.extract_strided_slice %738 {offsets = [0, 0], sizes = [2, 16], strides = [1, 1]} : vector<2x48xf32> to vector<2x16xf32>
    %746 = arith.addf %744, %745 : vector<2x16xf32>
    %747 = arith.negf %746 : vector<2x16xf32>
    %748 = math.exp %747 : vector<2x16xf32>
    %cst_126 = arith.constant 1.000000e+00 : f32
    %749 = vector.broadcast %cst_126 : f32 to vector<2x16xf32>
    %750 = arith.addf %749, %748 : vector<2x16xf32>
    %751 = arith.divf %749, %750 : vector<2x16xf32>
    %752 = vector.extract_strided_slice %743 {offsets = [0, 16], sizes = [2, 16], strides = [1, 1]} : vector<2x48xf32> to vector<2x16xf32>
    %753 = vector.extract_strided_slice %738 {offsets = [0, 16], sizes = [2, 16], strides = [1, 1]} : vector<2x48xf32> to vector<2x16xf32>
    %754 = arith.addf %752, %753 : vector<2x16xf32>
    %755 = arith.negf %754 : vector<2x16xf32>
    %756 = math.exp %755 : vector<2x16xf32>
    %cst_127 = arith.constant 1.000000e+00 : f32
    %757 = vector.broadcast %cst_127 : f32 to vector<2x16xf32>
    %758 = arith.addf %757, %756 : vector<2x16xf32>
    %759 = arith.divf %757, %758 : vector<2x16xf32>
    %760 = vector.extract_strided_slice %743 {offsets = [0, 32], sizes = [2, 16], strides = [1, 1]} : vector<2x48xf32> to vector<2x16xf32>
    %761 = vector.extract_strided_slice %738 {offsets = [0, 32], sizes = [2, 16], strides = [1, 1]} : vector<2x48xf32> to vector<2x16xf32>
    %762 = vector.broadcast %721 : vector<1x16xf32> to vector<2x16xf32>
    %763 = arith.addf %761, %762 : vector<2x16xf32>
    %764 = arith.mulf %751, %763 : vector<2x16xf32>
    %765 = arith.addf %760, %764 : vector<2x16xf32>
    %766 = math.tanh %765 : vector<2x16xf32>
    %cst_128 = arith.constant 1.000000e+00 : f32
    %767 = vector.broadcast %cst_128 : f32 to vector<2x16xf32>
    %768 = arith.subf %767, %759 : vector<2x16xf32>
    %769 = arith.mulf %768, %766 : vector<2x16xf32>
    %770 = arith.mulf %759, %715 : vector<2x16xf32>
    %771 = arith.addf %769, %770 : vector<2x16xf32>
    %772 = arith.truncf %771 : vector<2x16xf32> to vector<2x16xbf16>
    %cst_129 = arith.constant dense<0.000000e+00> : vector<2x52xf32>
    %773 = tpu.matmul %772, %716, %cst_129 {dimension_numbers = #tpu.dot_dimension_numbers<[1], [0], [0], [1], [0, 0, 1, 1], [], []>} : vector<2x16xbf16>, vector<16x52xbf16>, vector<2x52xf32> -> vector<2x52xf32>
    %774 = vector.extract_strided_slice %773 {offsets = [0, 0], sizes = [2, 4], strides = [1, 1]} : vector<2x52xf32> to vector<2x4xf32>
    %775 = vector.broadcast %719 : vector<1x4xf32> to vector<2x4xf32>
    %776 = arith.addf %774, %775 : vector<2x4xf32>
    %cst_130 = arith.constant dense<0xFF800000> : vector<2xf32>
    %777 = vector.multi_reduction <maximumf>, %776, %cst_130 [1] : vector<2x4xf32> to vector<2xf32>
    %778 = vector.shape_cast %777 : vector<2xf32> to vector<2x1xf32>
    %779 = vector.broadcast %778 : vector<2x1xf32> to vector<2x4xf32>
    %780 = arith.subf %776, %779 : vector<2x4xf32>
    %781 = math.exp %780 : vector<2x4xf32>
    %cst_131 = arith.constant dense<0.000000e+00> : vector<2xf32>
    %782 = vector.multi_reduction <add>, %781, %cst_131 [1] : vector<2x4xf32> to vector<2xf32>
    %783 = vector.shape_cast %782 : vector<2xf32> to vector<2x1xf32>
    %784 = vector.broadcast %783 : vector<2x1xf32> to vector<2x4xf32>
    %785 = arith.divf %781, %784 : vector<2x4xf32>
    %786 = vector.extract_strided_slice %773 {offsets = [0, 4], sizes = [2, 48], strides = [1, 1]} : vector<2x52xf32> to vector<2x48xf32>
    %787 = arith.truncf %785 : vector<2x4xf32> to vector<2x4xbf16>
    %cst_132 = arith.constant dense<0.000000e+00> : vector<2x48xf32>
    %788 = tpu.matmul %787, %717, %cst_132 {dimension_numbers = #tpu.dot_dimension_numbers<[1], [0], [0], [1], [0, 0, 1, 1], [], []>} : vector<2x4xbf16>, vector<4x48xbf16>, vector<2x48xf32> -> vector<2x48xf32>
    %789 = arith.addf %788, %723 : vector<2x48xf32>
    %790 = vector.broadcast %720 : vector<1x48xf32> to vector<2x48xf32>
    %791 = arith.addf %789, %790 : vector<2x48xf32>
    %792 = vector.extract_strided_slice %791 {offsets = [0, 0], sizes = [2, 16], strides = [1, 1]} : vector<2x48xf32> to vector<2x16xf32>
    %793 = vector.extract_strided_slice %786 {offsets = [0, 0], sizes = [2, 16], strides = [1, 1]} : vector<2x48xf32> to vector<2x16xf32>
    %794 = arith.addf %792, %793 : vector<2x16xf32>
    %795 = arith.negf %794 : vector<2x16xf32>
    %796 = math.exp %795 : vector<2x16xf32>
    %cst_133 = arith.constant 1.000000e+00 : f32
    %797 = vector.broadcast %cst_133 : f32 to vector<2x16xf32>
    %798 = arith.addf %797, %796 : vector<2x16xf32>
    %799 = arith.divf %797, %798 : vector<2x16xf32>
    %800 = vector.extract_strided_slice %791 {offsets = [0, 16], sizes = [2, 16], strides = [1, 1]} : vector<2x48xf32> to vector<2x16xf32>
    %801 = vector.extract_strided_slice %786 {offsets = [0, 16], sizes = [2, 16], strides = [1, 1]} : vector<2x48xf32> to vector<2x16xf32>
    %802 = arith.addf %800, %801 : vector<2x16xf32>
    %803 = arith.negf %802 : vector<2x16xf32>
    %804 = math.exp %803 : vector<2x16xf32>
    %cst_134 = arith.constant 1.000000e+00 : f32
    %805 = vector.broadcast %cst_134 : f32 to vector<2x16xf32>
    %806 = arith.addf %805, %804 : vector<2x16xf32>
    %807 = arith.divf %805, %806 : vector<2x16xf32>
    %808 = vector.extract_strided_slice %791 {offsets = [0, 32], sizes = [2, 16], strides = [1, 1]} : vector<2x48xf32> to vector<2x16xf32>
    %809 = vector.extract_strided_slice %786 {offsets = [0, 32], sizes = [2, 16], strides = [1, 1]} : vector<2x48xf32> to vector<2x16xf32>
    %810 = vector.broadcast %721 : vector<1x16xf32> to vector<2x16xf32>
    %811 = arith.addf %809, %810 : vector<2x16xf32>
    %812 = arith.mulf %799, %811 : vector<2x16xf32>
    %813 = arith.addf %808, %812 : vector<2x16xf32>
    %814 = math.tanh %813 : vector<2x16xf32>
    %cst_135 = arith.constant 1.000000e+00 : f32
    %815 = vector.broadcast %cst_135 : f32 to vector<2x16xf32>
    %816 = arith.subf %815, %807 : vector<2x16xf32>
    %817 = arith.mulf %816, %814 : vector<2x16xf32>
    %818 = arith.mulf %807, %771 : vector<2x16xf32>
    %819 = arith.addf %817, %818 : vector<2x16xf32>
    %820 = arith.truncf %819 : vector<2x16xf32> to vector<2x16xbf16>
    %cst_136 = arith.constant dense<0.000000e+00> : vector<2x52xf32>
    %821 = tpu.matmul %820, %716, %cst_136 {dimension_numbers = #tpu.dot_dimension_numbers<[1], [0], [0], [1], [0, 0, 1, 1], [], []>} : vector<2x16xbf16>, vector<16x52xbf16>, vector<2x52xf32> -> vector<2x52xf32>
    %822 = vector.extract_strided_slice %821 {offsets = [0, 0], sizes = [2, 4], strides = [1, 1]} : vector<2x52xf32> to vector<2x4xf32>
    %823 = vector.broadcast %719 : vector<1x4xf32> to vector<2x4xf32>
    %824 = arith.addf %822, %823 : vector<2x4xf32>
    %cst_137 = arith.constant dense<0xFF800000> : vector<2xf32>
    %825 = vector.multi_reduction <maximumf>, %824, %cst_137 [1] : vector<2x4xf32> to vector<2xf32>
    %826 = vector.shape_cast %825 : vector<2xf32> to vector<2x1xf32>
    %827 = vector.broadcast %826 : vector<2x1xf32> to vector<2x4xf32>
    %828 = arith.subf %824, %827 : vector<2x4xf32>
    %829 = math.exp %828 : vector<2x4xf32>
    %cst_138 = arith.constant dense<0.000000e+00> : vector<2xf32>
    %830 = vector.multi_reduction <add>, %829, %cst_138 [1] : vector<2x4xf32> to vector<2xf32>
    %831 = vector.shape_cast %830 : vector<2xf32> to vector<2x1xf32>
    %832 = vector.broadcast %831 : vector<2x1xf32> to vector<2x4xf32>
    %833 = arith.divf %829, %832 : vector<2x4xf32>
    %cst_139 = arith.constant 0.000000e+00 : f32
    %834 = vector.broadcast %cst_139 : f32 to vector<2x115xf32>
    %835 = tpu.concatenate %833, %517, %597, %677, %834 in 1 : vector<2x4xf32>, vector<2x3xf32>, vector<2x3xf32>, vector<2x3xf32>, vector<2x115xf32> -> vector<2x128xf32>
    %c0_140 = arith.constant 0 : index
    %c0_141 = arith.constant 0 : index
    %836 = vector.load %arg6[%c0_140, %c0_141] : memref<2x128xf32, #tpu.memory_space<vmem>>, vector<2x128xf32>
    tpu.vector_store %arg6[%c0_140, %c0_141], %835 {strides = array<i32>} : memref<2x128xf32, #tpu.memory_space<vmem>>, vector<2x128xf32>,
    return
  }
}

</mosaic_0001>

<bundles_post_ra>
// kernel: tpu_custom_call.1
= control target key start
LH: loop header
LB: loop body
LE: loop exit
PB: predicated region body
PF: predicated region fallthrough
CT: control target
= control target key end

     0   :  { %11 = vsyncpa [#allocation3], 0  ;;  %s6588_s0 = inlined_call_operand.vmem [shape: f32[20,8], index: 0, kind: input, shape index: {}]   ;;  %s6589_s1 = inlined_call_operand.vmem [shape: f32[10,8], index: 1, kind: input, shape index: {}]   ;;  %s6590_s2 = inlined_call_operand.vmem [shape: f32[2,32], index: 2, kind: input, shape index: {}]   ;;  %s6591_s3 = inlined_call_operand.vmem [shape: s32[2,3], index: 3, kind: input, shape index: {}]   ;;  %s6592_s4 = inlined_call_operand.hbm [shape: bf16[272,96], index: 4, kind: input, shape index: {}]   ;;  %s6593_s5 = inlined_call_operand.hbm [shape: f32[96,96], index: 5, kind: input, shape index: {}]   ;;  %s6594_s6 = inlined_call_operand.hbm [shape: f32[2,128], index: 6, kind: output, shape index: {}]  }
   0x1   :  { %12 = vsyncpa [#allocation6], 0 }
   0x2   :  { %13 = vsyncpa [#allocation4], 0  ;;  %s5429_s21 = smov [#allocation2]   ;;  %s5357_s25 = scalar_lea.hbm %s6592_s4, 2176 }
   0x3   :  { %s27_s22 = sshll.u32 %s5429_s21, 4  ;;  %p5358_p0 = scmp.ne.s32.totalorder %s6592_s4, %s5357_s25  ;;  %s28_s22 = int_to_ptr.vmem [resolvable:$true] %s27_s22 }
   0x4   :  { %p5361_p1 = scmp.lt.u32.totalorder %s5357_s25, %s6592_s4 }
   0x6   :  { %p5363_p2 = pnand %p5361_p1, %p5358_p0 }
   0x8   :  { %5366 = shalt.err (!%p5363_p2)
}
   0x9   :  { %s5367_s30 = scalar_lea.vmem %s28_s22, 2176  ;;  %p5372_p4 = scmp.lt.s32.totalorder %s28_s22, %s28_s22 }
   0xa   :  { %p5368_p3 = scmp.ne.s32.totalorder %s28_s22, %s5367_s30  ;;  %p5373_p5 = scmp.lt.s32.totalorder %s5367_s30, %s5367_s30 }
   0xc   :  { %p5374_p6 = por %p5373_p5, %p5372_p4 }
   0xe   :  { %p5375_p7 = pnand %p5374_p6, %p5368_p3 }
  0x10   :  { %5378 = shalt.err (!%p5375_p7)
}
  0x11   :  { %s5430_s7 = smov 64   ;;  %s5431_s8 = smov 4  }
  0x12   :  { %33 = dma.hbm_to_vmem [thread:$0]  %s6592_s4, 2176, %s28_s22, [#allocation3], %s5430_s7, %s5430_s7, %s5431_s8  }
  0x13   :  { %s5432_s11 = smov [#allocation5]   ;;  %s5379_s15 = scalar_lea.hbm %s6593_s5, 1536 }
  0x14   :  { %s39_s12 = sshll.u32 %s5432_s11, 4  ;;  %p5380_p8 = scmp.ne.s32.totalorder %s6593_s5, %s5379_s15  ;;  %s40_s12 = int_to_ptr.vmem [resolvable:$true] %s39_s12 }
  0x15   :  { %p5383_p9 = scmp.lt.u32.totalorder %s5379_s15, %s6593_s5 }
  0x17   :  { %p5385_p10 = pnand %p5383_p9, %p5380_p8 }
  0x19   :  { %5388 = shalt.err (!%p5385_p10)
}
  0x1a   :  { %s5389_s20 = scalar_lea.vmem %s40_s12, 1536  ;;  %p5394_p12 = scmp.lt.s32.totalorder %s40_s12, %s40_s12 }
  0x1b   :  { %p5390_p11 = scmp.ne.s32.totalorder %s40_s12, %s5389_s20  ;;  %p5395_p13 = scmp.lt.s32.totalorder %s5389_s20, %s5389_s20 }
  0x1d   :  { %p5396_p0 = por %p5395_p13, %p5394_p12 }
  0x1f   :  { %p5397_p1 = pnand %p5396_p0, %p5390_p11 }
  0x21   :  { %5400 = shalt.err (!%p5397_p1)
}
  0x22   :  { %s5433_s4 = smov 128   ;;  %s5434_s21 = smov 8  }
  0x23   :  { %45 = dma.hbm_to_vmem [thread:$0]  %s6593_s5, 1536, %s40_s12, [#allocation6], %s5433_s4, %s5433_s4, %s5434_s21  }
  0x24   :  { %5423 = dma.done.wait [#allocation3], 2176  }
  0x25   :  { %5424 = vsyncadd [#allocation3], 4294965120 }
  0x26   :  { %5425 = dma.done.wait [#allocation6], 1536  }
  0x27   :  { %5426 = vsyncadd [#allocation6], 4294965760  ;;  %v5435_v0 = vmov 0.0   ;;  %vm5436_vm0 = vmmov 0   ;;  %vm73_vm1 = vcmask 1043456   ;;  %v61_v2 = vld [vmem:[%s6588_s0] sm:$0xff] }
  0x28   :  { %4962 = vmatprep.subr.bf16.mxu1 %v5435_v0  ;;  %4964 = vmatprep.mubr.msk.bf16.mxu1 %vm5436_vm0, %v5435_v0  ;;  %v53_v1 = vld [vmem:[#allocation2] sm:$0xf]  ;;  %v62_v3 = vld [vmem:[%s6588_s0 + $0x8] sm:$0xff]  ;;  %vm66_vm2 = vcmask 64512   ;;  %v63_v6 = vld [vmem:[%s6588_s0 + $0x10] sm:$0xf] }
  0x29   :  { %5168 = vmatprep.subr.msk.bf16.mxu0 %vm73_vm1, %v53_v1  ;;  %v75_v4 = vsel %vm73_vm1, %v53_v1, 0  ;;  %v64_v5 = vpack.c.bf16 %v62_v3, %v61_v2  ;;  %v54_v7 = vld [vmem:[#allocation2 + $0x8] sm:$0xf]  ;;  %v5522_v8 = vld [vmem:[#allocation2 + $0x10] sm:$0xff]   ;;  %v65_v9 = vpack.c.bf16 %v63_v6, %v63_v6  ;;  %v125_v11 = vld [vmem:[%s6589_s1] sm:$0xff]  ;;  %vm199_vm3 = vcmask 261120  }
  0x2a   :  { %4957 = vmatpush3.bf16.msra.mxu0 %v75_v4  ;;  %v132_v10 = vsel %vm73_vm1, %v54_v7, 0  ;;  %v126_v12 = vld [vmem:[%s6589_s1 + $0x8] sm:$0x3]  ;;  %v5532_v14 = vld [vmem:[#allocation2 + $0x18] sm:$0xff]   ;;  %v4805_v15 = vld [vmem:[#allocation5 + $0x8] ss:$0 sm:$0xff] }
  0x2b   :  { %4958 = vmatprep.mubr.msk.bf16.mxu0 %vm66_vm2, %v64_v5  ;;  %4963 = vmatpush3.bf16.msra.mxu1 %v132_v10  ;;  %v127_v13 = vpack.c.bf16 %v126_v12, %v125_v11  ;;  %v176_v16 = vld [vmem:[%s6590_s2] sm:$0x3]  ;;  %v4800_v18 = vld [vmem:[#allocation5] ss:$0 sm:$0xff]  ;;  %s5437_s1 = smov 32   ;;  %s5438_s2 = smov 96  }
  0x2c   :  { %4968 = vmatprep.subr.bf16.mxu0 %v5435_v0  ;;  %4976 = vmatprep.subr.bf16.mxu1 %v5435_v0  ;;  %v186_v17 = vpack.c.bf16 %v176_v16, %v176_v16  ;;  %s5441_s14 = smov 112   ;;  %vm1739_vm15 = vcmask 130048   ;;  %vm2004_vm1 = vcmask 392192   ;;  %s5443_s18 = smov 36  }
  0x2d   :  { %4959 = vmatmul.mubr.msk.bf16.vlgmr.msra.gmra.mrb[0].mxu0 %vm66_vm2, %v65_v9  ;;  %255 = vrot.lane.b32.xlu0 %v4805_v15, %s5430_s7  ;;  %s5444_s19 = smov 92   ;;  %s5445_s20 = smov 10  }
  0x2e   :  { %4969 = vmatpush3.bf16.msra.mxu0 %v5522_v8  ;;  %4965 = vmatmul.mubr.msk.bf16.vlgmr.msra.gmra.mrb[0].mxu1 %vm66_vm2, %v127_v13  ;;  %vm2121_vm2 = vcmask 523264   ;;  %s5446_s4 = smov 7  }
  0x2f   :  { %4970 = vmatprep.subr.bf16.mxu0 %v5435_v0  ;;  %4972 = vmatprep.mubr.msk.bf16.mxu0 %vm5436_vm0, %v5435_v0 }
  0x30   :  { %4977 = vmatpush3.bf16.msra.mxu1 %v5522_v8  ;;  %4980 = vmatprep.mubr.msk.bf16.mxu1 %vm5436_vm0, %v5435_v0 }
  0x31   :  { %4978 = vmatprep.subr.bf16.mxu1 %v5435_v0 }
  0x32   :  { %4971 = vmatpush3.bf16.msra.mxu0 %v5532_v14 }
  0x33   :  { %4984 = vmatprep.subr.bf16.mxu0 %v5435_v0 }
  0x34   :  { %4979 = vmatpush3.bf16.msra.mxu1 %v5532_v14 }
  0x35   :  { %4973 = vmatmul.mubr.msk.bf16.vlgmr.msra.gmra.mrb[4].mxu0 %vm199_vm3, %v186_v17  ;;  %4992 = vmatprep.subr.bf16.mxu1 %v5435_v0 }
  0x36   :  { %4985 = vmatpush3.bf16.msra.mxu0 %v5522_v8  ;;  %4988 = vmatprep.mubr.msk.bf16.mxu0 %vm5436_vm0, %v5435_v0 }
  0x37   :  { %4986 = vmatprep.subr.bf16.mxu0 %v5435_v0 }
  0x3a   :  { %4987 = vmatpush3.bf16.msra.mxu0 %v5532_v14 }
  0x3b   :  { %5000 = vmatprep.subr.bf16.mxu0 %v5435_v0 }
  0x9f   :  { %v5568_v31 = vpop.permute.xlu0 %255 }
 0x100   :  { %v4960_v19 = vpop.f32.mrb[0].mxu0 }
 0x101   :  { %v5560_v20 = vadd.f32 %v4960_v19, %v4800_v18  ;;  %v111_v21 = vpop.f32.mrb[1].mxu0  ;;  %v168_v22 = vpop.f32.mrb[0].mxu1 }
 0x102   :  { %v184_v23 = vadd.f32 %v4800_v18, %v111_v21  ;;  %v4961_v24 = vpop.f32.mrb[2].mxu0  ;;  %v4966_v25 = vpop.f32.mrb[1].mxu1 }
 0x103   :  { %v114_v26 = vpop.f32.mrb[3].mxu0  ;;  %v5562_v27 = vpop.f32.mrb[2].mxu1 }
 0x104   :  { %v5564_v28 = vadd.f32 %v4800_v18, %v114_v26  ;;  %v5566_v29 = vadd.f32 %v184_v23, %v168_v22  ;;  %v4967_v30 = vpop.f32.mrb[3].mxu1 }
 0x108   :  { %v237_v32 = vpop.f32.mrb[4].mxu0 }
 0x109   :  { %v4974_v33 = vpop.f32.mrb[5].mxu0  ;;  %v258_v34 = vadd.f32 %v5568_v31, %v237_v32  ;;  %v243_v37 = vadd.f32 %v237_v32, %v5566_v29 }
 0x10a   :  { %v240_v35 = vpop.f32.mrb[6].mxu0 }
 0x10b   :  { %260 = vrot.lane.b32.xlu0 %v258_v34, %s5430_s7  ;;  %v4975_v36 = vpop.f32.mrb[7].mxu0  ;;  %v4804_v38 = vmul.f32 -1.442695, %v243_v37 }
 0x10d   :  { %5204 = vpow2.f32 %v4804_v38 }
 0x10f   :  { %277 = vrot.lane.b32.xlu0 %v176_v16, %s5437_s1 }
 0x117   :  { %v5205_v39 = vpop.eup %5204 }
 0x118   :  { %v247_v40 = vadd.f32 1.0, %v5205_v39 }
 0x11a   :  { %5206 = vrcp.f32 %v247_v40 }
 0x124   :  { %v5207_v41 = vpop.eup %5206 }
 0x125   :  { %v270_v48 = vsub.f32 1.0, %v5207_v41 }
 0x17d   :  { %v261_v42 = vpop.permute.xlu0 %260 }
 0x17e   :  { %v263_v43 = vmul.f32 %v5207_v41, %v261_v42 }
 0x180   :  { %265 = vrot.lane.b32.xlu1 %v263_v43, %s5430_s7 }
 0x181   :  { %v278_v47 = vpop.permute.xlu0 %277 }
 0x182   :  { %v280_v50 = vmul.f32 %v5207_v41, %v278_v47 }
 0x1f2   :  { %v266_v44 = vpop.permute.xlu1 %265 }
 0x1f3   :  { %v268_v45 = vadd.f32 %v266_v44, %v5566_v29 }
 0x1f5   :  { %5208 = vtanh.f32 %v268_v45 }
 0x1ff   :  { %v5209_v46 = vpop.eup %5208 }
 0x200   :  { %272 = vrot.lane.b32.xlu1 %v5209_v46, %s5438_s2 }
 0x272   :  { %v273_v49 = vpop.permute.xlu1 %272 }
 0x273   :  { %v275_v51 = vmul.f32 %v273_v49, %v270_v48 }
 0x275   :  { %v5577_v52 = vadd.f32 %v280_v50, %v275_v51 }
 0x277   :  { %v336_v53 = vpack.c.bf16 %v5577_v52, %v5577_v52  ;;  %v412_v11 = vrot.slane %v5577_v52, 6 }
 0x279   :  { %338 = vrot.lane.b32.xlu1 %v336_v53, %s5438_s2 }
 0x2eb   :  { %v339_v54 = vpop.permute.xlu1 %338 }
 0x2ec   :  { %4981 = vmatmul.mubr.msk.bf16.vlgmr.msra.gmra.mrb[4].mxu1 %vm199_vm3, %v339_v54 }
 0x2ed   :  { %4993 = vmatpush3.bf16.msra.mxu1 %v5522_v8  ;;  %4996 = vmatprep.mubr.msk.bf16.mxu1 %vm5436_vm0, %v5435_v0 }
 0x2ee   :  { %4994 = vmatprep.subr.bf16.mxu1 %v5435_v0 }
 0x2f1   :  { %4995 = vmatpush3.bf16.msra.mxu1 %v5532_v14 }
 0x2f2   :  { %5008 = vmatprep.subr.bf16.mxu1 %v5435_v0 }
 0x3bf   :  { %v377_v55 = vpop.f32.mrb[4].mxu1 }
 0x3c0   :  { %v393_v56 = vadd.f32 %v377_v55, %v5568_v31  ;;  %v4982_v57 = vpop.f32.mrb[5].mxu1  ;;  %v384_v61 = vrot.slane %v377_v55, 6 }
 0x3c1   :  { %v380_v58 = vpop.f32.mrb[6].mxu1 }
 0x3c2   :  { %v4983_v59 = vpop.f32.mrb[7].mxu1  ;;  %v395_v60 = vrot.slane %v393_v56, 6  ;;  %v386_v62 = vadd.f32 %v384_v61, %v5566_v29 }
 0x3c4   :  { %396 = vrot.lane.b32.xlu0 %v395_v60, %s5430_s7  ;;  %v4808_v63 = vmul.f32 -1.442695, %v386_v62 }
 0x3c6   :  { %5210 = vpow2.f32 %v4808_v63 }
 0x3d0   :  { %v5211_v1 = vpop.eup %5210 }
 0x3d1   :  { %v390_v2 = vadd.f32 1.0, %v5211_v1 }
 0x3d3   :  { %5212 = vrcp.f32 %v390_v2 }
 0x3dd   :  { %v5213_v3 = vpop.eup %5212 }
 0x3de   :  { %v406_v10 = vsub.f32 1.0, %v5213_v3  ;;  %v414_v13 = vmul.f32 %v5213_v3, %v412_v11 }
 0x436   :  { %v397_v4 = vpop.permute.xlu0 %396 }
 0x437   :  { %v399_v5 = vmul.f32 %v5213_v3, %v397_v4 }
 0x439   :  { %401 = vrot.lane.b32.xlu1 %v399_v5, %s5430_s7 }
 0x4ab   :  { %v402_v6 = vpop.permute.xlu1 %401 }
 0x4ac   :  { %v404_v7 = vadd.f32 %v402_v6, %v5566_v29 }
 0x4ae   :  { %5214 = vtanh.f32 %v404_v7 }
 0x4b8   :  { %v5215_v9 = vpop.eup %5214 }
 0x4b9   :  { %408 = vrot.lane.b32.xlu0 %v5215_v9, %s5438_s2 }
 0x52b   :  { %v409_v12 = vpop.permute.xlu0 %408 }
 0x52c   :  { %v411_v15 = vmul.f32 %v409_v12, %v406_v10 }
 0x52e   :  { %v5596_v16 = vadd.f32 %v414_v13, %v411_v15 }
 0x530   :  { %v472_v17 = vpack.c.bf16 %v5596_v16, %v5596_v16  ;;  %v549_v43 = vrot.slane %v5596_v16, 6 }
 0x532   :  { %v474_v18 = vrot.slane %v472_v17, 1 }
 0x534   :  { %475 = vrot.lane.b32.xlu1 %v474_v18, %s5438_s2 }
 0x5a6   :  { %v476_v19 = vpop.permute.xlu1 %475 }
 0x5a7   :  { %4989 = vmatmul.mubr.msk.bf16.vlgmr.msra.gmra.mrb[8].mxu0 %vm199_vm3, %v476_v19 }
 0x5a8   :  { %5001 = vmatpush3.bf16.msra.mxu0 %v5522_v8  ;;  %5004 = vmatprep.mubr.msk.bf16.mxu0 %vm5436_vm0, %v5435_v0 }
 0x5a9   :  { %5002 = vmatprep.subr.bf16.mxu0 %v5435_v0 }
 0x5ac   :  { %5003 = vmatpush3.bf16.msra.mxu0 %v5532_v14 }
 0x5ad   :  { %5016 = vmatprep.subr.bf16.mxu0 %v5435_v0 }
 0x67a   :  { %v514_v21 = vpop.f32.mrb[8].mxu0 }
 0x67b   :  { %v530_v22 = vadd.f32 %v514_v21, %v5568_v31  ;;  %v4990_v23 = vpop.f32.mrb[9].mxu0  ;;  %v521_v30 = vrot.slane %v514_v21, 4 }
 0x67c   :  { %v517_v24 = vpop.f32.mrb[10].mxu0  ;;  %v747_v23 = vadd.f32 %v5564_v28, %v5562_v27 }
 0x67d   :  { %v4991_v25 = vpop.f32.mrb[11].mxu0  ;;  %v532_v26 = vrot.slane %v530_v22, 4  ;;  %v523_v32 = vadd.f32 %v521_v30, %v5566_v29 }
 0x67f   :  { %533 = vrot.lane.b32.xlu0 %v532_v26, %s5430_s7  ;;  %v4811_v33 = vmul.f32 -1.442695, %v523_v32 }
 0x681   :  { %5216 = vpow2.f32 %v4811_v33 }
 0x68b   :  { %v5217_v34 = vpop.eup %5216 }
 0x68c   :  { %v527_v35 = vadd.f32 1.0, %v5217_v34 }
 0x68e   :  { %5218 = vrcp.f32 %v527_v35 }
 0x698   :  { %v5219_v36 = vpop.eup %5218 }
 0x699   :  { %v543_v42 = vsub.f32 1.0, %v5219_v36  ;;  %v551_v45 = vmul.f32 %v5219_v36, %v549_v43 }
 0x6f1   :  { %v534_v37 = vpop.permute.xlu0 %533 }
 0x6f2   :  { %v536_v38 = vmul.f32 %v5219_v36, %v534_v37 }
 0x6f4   :  { %538 = vrot.lane.b32.xlu1 %v536_v38, %s5430_s7 }
 0x766   :  { %v539_v39 = vpop.permute.xlu1 %538 }
 0x767   :  { %v541_v40 = vadd.f32 %v539_v39, %v5566_v29 }
 0x769   :  { %5220 = vtanh.f32 %v541_v40 }
 0x773   :  { %v5221_v41 = vpop.eup %5220 }
 0x774   :  { %545 = vrot.lane.b32.xlu0 %v5221_v41, %s5438_s2 }
 0x7e6   :  { %v546_v44 = vpop.permute.xlu0 %545 }
 0x7e7   :  { %v548_v46 = vmul.f32 %v546_v44, %v543_v42 }
 0x7e9   :  { %v5615_v47 = vadd.f32 %v551_v45, %v548_v46 }
 0x7eb   :  { %v608_v48 = vpack.c.bf16 %v5615_v47, %v5615_v47  ;;  %v685_v7 = vrot.slane %v5615_v47, 6 }
 0x7ed   :  { %v610_v49 = vrot.slane %v608_v48, 2 }
 0x7ef   :  { %611 = vrot.lane.b32.xlu1 %v610_v49, %s5438_s2 }
 0x861   :  { %v612_v50 = vpop.permute.xlu1 %611 }
 0x862   :  { %4997 = vmatmul.mubr.msk.bf16.vlgmr.msra.gmra.mrb[8].mxu1 %vm199_vm3, %v612_v50 }
 0x863   :  { %5009 = vmatpush3.bf16.msra.mxu1 %v5522_v8  ;;  %5012 = vmatprep.mubr.msk.bf16.mxu1 %vm5436_vm0, %v5435_v0 }
 0x864   :  { %5010 = vmatprep.subr.bf16.mxu1 %v5435_v0 }
 0x867   :  { %5011 = vmatpush3.bf16.msra.mxu1 %v5532_v14 }
 0x868   :  { %5024 = vmatprep.subr.bf16.mxu1 %v5435_v0 }
 0x935   :  { %v650_v51 = vpop.f32.mrb[8].mxu1 }
 0x936   :  { %v666_v53 = vadd.f32 %v650_v51, %v5568_v31  ;;  %v4998_v54 = vpop.f32.mrb[9].mxu1  ;;  %v657_v58 = vrot.slane %v650_v51, 2 }
 0x937   :  { %v653_v55 = vpop.f32.mrb[10].mxu1 }
 0x938   :  { %v4999_v56 = vpop.f32.mrb[11].mxu1  ;;  %v668_v57 = vrot.slane %v666_v53, 2  ;;  %v659_v59 = vadd.f32 %v657_v58, %v5566_v29 }
 0x93a   :  { %669 = vrot.lane.b32.xlu0 %v668_v57, %s5430_s7  ;;  %v4814_v60 = vmul.f32 -1.442695, %v659_v59 }
 0x93c   :  { %5222 = vpow2.f32 %v4814_v60 }
 0x946   :  { %v5223_v61 = vpop.eup %5222 }
 0x947   :  { %v663_v62 = vadd.f32 1.0, %v5223_v61 }
 0x949   :  { %5224 = vrcp.f32 %v663_v62 }
 0x953   :  { %v5225_v63 = vpop.eup %5224 }
 0x954   :  { %v679_v6 = vsub.f32 1.0, %v5225_v63  ;;  %v687_v10 = vmul.f32 %v5225_v63, %v685_v7 }
 0x9ac   :  { %v670_v1 = vpop.permute.xlu0 %669 }
 0x9ad   :  { %v672_v2 = vmul.f32 %v5225_v63, %v670_v1 }
 0x9af   :  { %674 = vrot.lane.b32.xlu1 %v672_v2, %s5430_s7 }
 0xa21   :  { %v675_v3 = vpop.permute.xlu1 %674 }
 0xa22   :  { %v677_v4 = vadd.f32 %v675_v3, %v5566_v29 }
 0xa24   :  { %5226 = vtanh.f32 %v677_v4 }
 0xa2e   :  { %v5227_v5 = vpop.eup %5226 }
 0xa2f   :  { %681 = vrot.lane.b32.xlu0 %v5227_v5, %s5438_s2 }
 0xaa1   :  { %v682_v9 = vpop.permute.xlu0 %681 }
 0xaa2   :  { %v684_v11 = vmul.f32 %v682_v9, %v679_v6  ;;  %v177_v9 = vlaneseq }
 0xaa4   :  { %v5634_v12 = vadd.f32 %v687_v10, %v684_v11  ;;  %v5676_v10 = vand.u32 127, %v177_v9 }
 0xaa6   :  { %v748_v13 = vpack.c.bf16 %v5634_v12, %v5634_v12  ;;  %v821_v27 = vrot.slane %v5634_v12, 6  ;;  %vm179_vm4 = vcmp.ge.s32.totalorder %v5676_v10, 16 }
 0xaa8   :  { %v750_v15 = vrot.slane %v748_v13, 3 }
 0xaaa   :  { %751 = vrot.lane.b32.xlu1 %v750_v15, %s5438_s2 }
 0xb1c   :  { %v752_v17 = vpop.permute.xlu1 %751 }
 0xb1d   :  { %5005 = vmatmul.mubr.msk.bf16.vlgmr.msra.gmra.mrb[12].mxu0 %vm199_vm3, %v752_v17 }
 0xb1e   :  { %5017 = vmatpush3.bf16.msra.mxu0 %v5522_v8  ;;  %5020 = vmatprep.mubr.msk.bf16.mxu0 %vm5436_vm0, %v5435_v0 }
 0xb1f   :  { %5018 = vmatprep.subr.bf16.mxu0 %v5435_v0 }
 0xb22   :  { %5019 = vmatpush3.bf16.msra.mxu0 %v5532_v14 }
 0xb23   :  { %5032 = vmatprep.subr.bf16.mxu0 %v5435_v0 }
 0xbf0   :  { %v790_v29 = vpop.f32.mrb[12].mxu0 }
 0xbf1   :  { %v5006_v18 = vpop.f32.mrb[13].mxu0  ;;  %v803_v19 = vadd.f32 %v790_v29, %v5568_v31  ;;  %v796_v24 = vadd.f32 %v790_v29, %v747_v23 }
 0xbf2   :  { %v793_v21 = vpop.f32.mrb[14].mxu0 }
 0xbf3   :  { %805 = vrot.lane.b32.xlu0 %v803_v19, %s5430_s7  ;;  %v5007_v22 = vpop.f32.mrb[15].mxu0  ;;  %v4817_v25 = vmul.f32 -1.442695, %v796_v24 }
 0xbf5   :  { %5228 = vpow2.f32 %v4817_v25 }
 0xbff   :  { %v5229_v26 = vpop.eup %5228 }
 0xc00   :  { %v800_v30 = vadd.f32 1.0, %v5229_v26 }
 0xc02   :  { %5230 = vrcp.f32 %v800_v30 }
 0xc0c   :  { %v5231_v32 = vpop.eup %5230 }
 0xc0d   :  { %v815_v38 = vsub.f32 1.0, %v5231_v32  ;;  %v823_v40 = vmul.f32 %v5231_v32, %v821_v27 }
 0xc65   :  { %v806_v33 = vpop.permute.xlu0 %805 }
 0xc66   :  { %v808_v34 = vmul.f32 %v5231_v32, %v806_v33 }
 0xc68   :  { %810 = vrot.lane.b32.xlu1 %v808_v34, %s5430_s7 }
 0xcda   :  { %v811_v35 = vpop.permute.xlu1 %810 }
 0xcdb   :  { %v813_v36 = vadd.f32 %v811_v35, %v747_v23 }
 0xcdd   :  { %5232 = vtanh.f32 %v813_v36 }
 0xce7   :  { %v5233_v37 = vpop.eup %5232 }
 0xce8   :  { %817 = vrot.lane.b32.xlu0 %v5233_v37, %s5438_s2 }
 0xd5a   :  { %v818_v39 = vpop.permute.xlu0 %817 }
 0xd5b   :  { %v820_v41 = vmul.f32 %v818_v39, %v815_v38 }
 0xd5d   :  { %v5653_v42 = vadd.f32 %v823_v40, %v820_v41 }
 0xd5f   :  { %v879_v43 = vpack.c.bf16 %v5653_v42, %v5653_v42  ;;  %v955_v2 = vrot.slane %v5653_v42, 6 }
 0xd61   :  { %881 = vrot.lane.b32.xlu1 %v879_v43, %s5438_s2 }
 0xdd3   :  { %v882_v44 = vpop.permute.xlu1 %881 }
 0xdd4   :  { %5013 = vmatmul.mubr.msk.bf16.vlgmr.msra.gmra.mrb[12].mxu1 %vm199_vm3, %v882_v44 }
 0xdd5   :  { %5025 = vmatpush3.bf16.msra.mxu1 %v5522_v8  ;;  %5028 = vmatprep.mubr.msk.bf16.mxu1 %vm5436_vm0, %v5435_v0 }
 0xdd6   :  { %5026 = vmatprep.subr.bf16.mxu1 %v5435_v0 }
 0xdd9   :  { %5027 = vmatpush3.bf16.msra.mxu1 %v5532_v14 }
 0xdda   :  { %5040 = vmatprep.subr.bf16.mxu1 %v5435_v0 }
 0xea7   :  { %v920_v45 = vpop.f32.mrb[12].mxu1 }
 0xea8   :  { %v936_v46 = vadd.f32 %v920_v45, %v5568_v31  ;;  %v5014_v48 = vpop.f32.mrb[13].mxu1  ;;  %v927_v53 = vrot.slane %v920_v45, 6 }
 0xea9   :  { %v923_v49 = vpop.f32.mrb[14].mxu1 }
 0xeaa   :  { %v5015_v50 = vpop.f32.mrb[15].mxu1  ;;  %v938_v51 = vrot.slane %v936_v46, 6  ;;  %v929_v54 = vadd.f32 %v927_v53, %v5564_v28 }
 0xeac   :  { %939 = vrot.lane.b32.xlu0 %v938_v51, %s5430_s7  ;;  %v4820_v55 = vmul.f32 -1.442695, %v929_v54 }
 0xeae   :  { %5234 = vpow2.f32 %v4820_v55 }
 0xeb8   :  { %v5235_v56 = vpop.eup %5234 }
 0xeb9   :  { %v933_v57 = vadd.f32 1.0, %v5235_v56 }
 0xebb   :  { %5236 = vrcp.f32 %v933_v57 }
 0xec5   :  { %v5237_v58 = vpop.eup %5236 }
 0xec6   :  { %v949_v1 = vsub.f32 1.0, %v5237_v58  ;;  %v957_v4 = vmul.f32 %v5237_v58, %v955_v2 }
 0xf1e   :  { %v940_v59 = vpop.permute.xlu0 %939 }
 0xf1f   :  { %v942_v60 = vmul.f32 %v5237_v58, %v940_v59 }
 0xf21   :  { %944 = vrot.lane.b32.xlu1 %v942_v60, %s5430_s7 }
 0xf25   :  { %959 = vrot.lane.b32.xlu1 %v5653_v42, %s5438_s2 }
 0xf93   :  { %v945_v61 = vpop.permute.xlu1 %944 }
 0xf94   :  { %v947_v62 = vadd.f32 %v945_v61, %v5564_v28 }
 0xf96   :  { %5238 = vtanh.f32 %v947_v62 }
 0xf97   :  { %v5679_v11 = vpop.permute.xlu1 %959 }
 0xfa0   :  { %v5239_v63 = vpop.eup %5238 }
 0xfa1   :  { %951 = vrot.lane.b32.xlu0 %v5239_v63, %s5438_s2 }
0x1013   :  { %v952_v3 = vpop.permute.xlu0 %951 }
0x1014   :  { %v954_v5 = vmul.f32 %v952_v3, %v949_v1 }
0x1016   :  { %v958_v6 = vadd.f32 %v957_v4, %v954_v5 }
0x1018   :  { %v963_v7 = vrot.slane %v958_v6, 2 }
0x101a   :  { %964 = vrot.lane.b32.xlu0 %v963_v7, %s5438_s2 }
0x108c   :  { %v965_v13 = vpop.permute.xlu0 %964 }
0x108d   :  { %v5684_v15 = vsel %vm179_vm4, %v5679_v11, %v965_v13 }
0x108e   :  { %v1030_v17 = vpack.c.bf16 %v5684_v15, %v5684_v15  ;;  %v1103_v36 = vrot.slane %v5684_v15, 4 }
0x1090   :  { %5021 = vmatmul.mubr.msk.bf16.vlgmr.msra.gmra.mrb[16].mxu0 %vm199_vm3, %v1030_v17 }
0x1091   :  { %5033 = vmatpush3.bf16.msra.mxu0 %v5522_v8  ;;  %5036 = vmatprep.mubr.msk.bf16.mxu0 %vm5436_vm0, %v5435_v0 }
0x1092   :  { %5034 = vmatprep.subr.bf16.mxu0 %v5435_v0 }
0x1095   :  { %5035 = vmatpush3.bf16.msra.mxu0 %v5532_v14 }
0x1096   :  { %5048 = vmatprep.subr.bf16.mxu0 %v5435_v0 }
0x1163   :  { %v1068_v29 = vpop.f32.mrb[16].mxu0 }
0x1164   :  { %v1084_v18 = vadd.f32 %v1068_v29, %v5568_v31  ;;  %v5022_v19 = vpop.f32.mrb[17].mxu0  ;;  %v1075_v24 = vrot.slane %v1068_v29, 4 }
0x1165   :  { %v1071_v21 = vpop.f32.mrb[18].mxu0 }
0x1166   :  { %v5023_v22 = vpop.f32.mrb[19].mxu0  ;;  %v1086_v23 = vrot.slane %v1084_v18, 4  ;;  %v1077_v25 = vadd.f32 %v1075_v24, %v5564_v28 }
0x1168   :  { %1087 = vrot.lane.b32.xlu1 %v1086_v23, %s5430_s7  ;;  %v4823_v26 = vmul.f32 -1.442695, %v1077_v25 }
0x116a   :  { %5240 = vpow2.f32 %v4823_v26 }
0x1174   :  { %v5241_v30 = vpop.eup %5240 }
0x1175   :  { %v1081_v32 = vadd.f32 1.0, %v5241_v30 }
0x1177   :  { %5242 = vrcp.f32 %v1081_v32 }
0x1181   :  { %v5243_v33 = vpop.eup %5242 }
0x1182   :  { %v1097_v40 = vsub.f32 1.0, %v5243_v33 }
0x11da   :  { %v1088_v34 = vpop.permute.xlu1 %1087 }
0x11db   :  { %v1090_v35 = vmul.f32 %v5243_v33, %v1088_v34 }
0x11dd   :  { %1092 = vrot.lane.b32.xlu0 %v1090_v35, %s5430_s7 }
0x11e1   :  { %1104 = vrot.lane.b32.xlu0 %v1103_v36, %s5437_s1 }
0x124f   :  { %v1093_v37 = vpop.permute.xlu0 %1092 }
0x1250   :  { %v1095_v38 = vadd.f32 %v1093_v37, %v5564_v28 }
0x1252   :  { %5244 = vtanh.f32 %v1095_v38 }
0x1253   :  { %v1105_v39 = vpop.permute.xlu0 %1104 }
0x1254   :  { %v1107_v43 = vmul.f32 %v5243_v33, %v1105_v39 }
0x125c   :  { %v5245_v27 = vpop.eup %5244 }
0x125d   :  { %1099 = vrot.lane.b32.xlu1 %v5245_v27, %s5438_s2 }
0x12cf   :  { %v1100_v41 = vpop.permute.xlu1 %1099 }
0x12d0   :  { %v1102_v44 = vmul.f32 %v1100_v41, %v1097_v40 }
0x12d2   :  { %v1108_v45 = vadd.f32 %v1107_v43, %v1102_v44 }
0x12d4   :  { %v1110_v46 = vrot.slane %v1108_v45, 4 }
0x12d6   :  { %1111 = vrot.lane.b32.xlu1 %v1110_v46, %s5438_s2 }
0x1348   :  { %v1112_v48 = vpop.permute.xlu1 %1111 }
0x1349   :  { %v5707_v49 = vsel %vm179_vm4, %v5679_v11, %v1112_v48 }
0x134a   :  { %v1177_v50 = vpack.c.bf16 %v5707_v49, %v5707_v49  ;;  %v1250_v1 = vrot.slane %v5707_v49, 2 }
0x134c   :  { %5029 = vmatmul.mubr.msk.bf16.vlgmr.msra.gmra.mrb[16].mxu1 %vm199_vm3, %v1177_v50 }
0x134d   :  { %5041 = vmatpush3.bf16.msra.mxu1 %v5522_v8  ;;  %5044 = vmatprep.mubr.msk.bf16.mxu1 %vm5436_vm0, %v5435_v0 }
0x134e   :  { %5042 = vmatprep.subr.bf16.mxu1 %v5435_v0 }
0x1351   :  { %5043 = vmatpush3.bf16.msra.mxu1 %v5532_v14 }
0x1352   :  { %5054 = vmatprep.subr.bf16.mxu1 %v5435_v0 }
0x141f   :  { %v1215_v51 = vpop.f32.mrb[16].mxu1 }
0x1420   :  { %v1231_v53 = vadd.f32 %v1215_v51, %v5568_v31  ;;  %v5030_v54 = vpop.f32.mrb[17].mxu1  ;;  %v1222_v58 = vrot.slane %v1215_v51, 2 }
0x1421   :  { %v1218_v55 = vpop.f32.mrb[18].mxu1 }
0x1422   :  { %v5031_v56 = vpop.f32.mrb[19].mxu1  ;;  %v1233_v57 = vrot.slane %v1231_v53, 2  ;;  %v1224_v8 = vadd.f32 %v1222_v58, %v5564_v28 }
0x1424   :  { %1234 = vrot.lane.b32.xlu0 %v1233_v57, %s5430_s7  ;;  %v4826_v59 = vmul.f32 -1.442695, %v1224_v8 }
0x1426   :  { %5246 = vpow2.f32 %v4826_v59 }
0x1430   :  { %v5247_v60 = vpop.eup %5246 }
0x1431   :  { %v1228_v61 = vadd.f32 1.0, %v5247_v60 }
0x1433   :  { %5248 = vrcp.f32 %v1228_v61 }
0x143d   :  { %v5249_v14 = vpop.eup %5248 }
0x143e   :  { %v1244_v6 = vsub.f32 1.0, %v5249_v14 }
0x1496   :  { %v1235_v62 = vpop.permute.xlu0 %1234 }
0x1497   :  { %v1237_v63 = vmul.f32 %v5249_v14, %v1235_v62  ;;  %v5762_v62 = vld [vmem:[%s6591_s3] sm:$0x3] }
0x1498   :  { %vm1115_vm5 = vcmp.eq.s32.totalorder %v5762_v62, 6  ;;  %vm1262_vm6 = vcmp.eq.s32.totalorder %v5762_v62, 7  ;;  %vm968_vm7 = vcmp.eq.s32.totalorder %v5762_v62, 5  ;;  %vm1404_vm8 = vcmp.eq.s32.totalorder %v5762_v62, 8 }
0x1499   :  { %1239 = vrot.lane.b32.xlu1 %v1237_v63, %s5430_s7  ;;  %vm1551_vm9 = vcmp.eq.s32.totalorder %v5762_v62, 9  ;;  %vm416_vm10 = vcmp.eq.s32.totalorder %v5762_v62, 1  ;;  %vm553_vm11 = vcmp.eq.s32.totalorder %v5762_v62, 2  ;;  %vm689_vm12 = vcmp.eq.s32.totalorder %v5762_v62, 3 }
0x149a   :  { %vm825_vm13 = vcmp.eq.s32.totalorder %v5762_v62, 4  ;;  %vm282_vm14 = vcmp.eq.s32.totalorder %v5762_v62, 0 }
0x149d   :  { %1251 = vrot.lane.b32.xlu1 %v1250_v1, %s5437_s1 }
0x150b   :  { %v1240_v2 = vpop.permute.xlu1 %1239 }
0x150c   :  { %v1242_v3 = vadd.f32 %v1240_v2, %v5564_v28  ;;  %v5769_v2 = vshrl.u32 %v177_v9, 7 }
0x150e   :  { %5250 = vtanh.f32 %v1242_v3  ;;  %v4824_v3 = vsel %vm1115_vm5, 1.0, %v5435_v0  ;;  %vm2717_vm5 = vcmask 256000  }
0x150f   :  { %v1252_v5 = vpop.permute.xlu1 %1251 }
0x1510   :  { %v1254_v13 = vmul.f32 %v5249_v14, %v1252_v5 }
0x1518   :  { %v5251_v4 = vpop.eup %5250 }
0x1519   :  { %1246 = vrot.lane.b32.xlu0 %v5251_v4, %s5438_s2  ;;  %v5774_v4 = vsub.s32 0, %v5769_v2 }
0x158b   :  { %v1247_v7 = vpop.permute.xlu0 %1246 }
0x158c   :  { %v1249_v17 = vmul.f32 %v1247_v7, %v1244_v6  ;;  %v1121_v6 = vrot.slane %v4824_v3, %v5774_v4  ;;  %v4827_v7 = vsel %vm1262_vm6, 1.0, %v5435_v0  ;;  %vm2740_vm6 = vcmask 1041409  }
0x158d   :  { %v1268_v9 = vrot.slane %v4827_v7, %v5774_v4 }
0x158e   :  { %v1255_v29 = vadd.f32 %v1254_v13, %v1249_v17 }
0x1590   :  { %v1257_v18 = vrot.slane %v1255_v29, 6  ;;  %v4821_v29 = vsel %vm968_vm7, 1.0, %v5435_v0 }
0x1592   :  { %1258 = vrot.lane.b32.xlu0 %v1257_v18, %s5438_s2 }
0x1604   :  { %v1259_v19 = vpop.permute.xlu0 %1258 }
0x1605   :  { %v5730_v21 = vsel %vm179_vm4, %v5679_v11, %v1259_v19  ;;  %v5786_v19 = vsub.s32 1, %v5769_v2 }
0x1606   :  { %v1325_v28 = vpack.c.bf16 %v5730_v21, %v5730_v21 }
0x1608   :  { %5037 = vmatmul.mubr.msk.bf16.vlgmr.msra.gmra.mrb[20].mxu0 %vm199_vm3, %v1325_v28  ;;  %v974_v28 = vrot.slane %v4821_v29, %v5774_v4 }
0x1609   :  { %5050 = vmatprep.mubr.msk.bf16.mxu0 %vm5436_vm0, %v5435_v0 }
0x16db   :  { %v1363_v22 = vpop.f32.mrb[20].mxu0 }
0x16dc   :  { %v5038_v23 = vpop.f32.mrb[21].mxu0  ;;  %v1376_v24 = vadd.f32 %v1363_v22, %v5568_v31  ;;  %v1369_v30 = vadd.f32 %v1363_v22, %v5560_v20  ;;  %v981_v22 = vrot.slane %v4821_v29, %v5786_v19 }
0x16dd   :  { %v1366_v25 = vpop.f32.mrb[22].mxu0  ;;  %v1128_v23 = vrot.slane %v4824_v3, %v5786_v19 }
0x16de   :  { %1378 = vrot.lane.b32.xlu1 %v1376_v24, %s5430_s7  ;;  %v5039_v26 = vpop.f32.mrb[23].mxu0  ;;  %v4829_v32 = vmul.f32 -1.442695, %v1369_v30  ;;  %v4830_v24 = vsel %vm1404_vm8, 1.0, %v5435_v0  ;;  %vm2744_vm8 = vcmask 17408  }
0x16df   :  { %v1417_v25 = vrot.slane %v4830_v24, %v5786_v19  ;;  %v4833_v26 = vsel %vm1551_vm9, 1.0, %v5435_v0  ;;  %vm2774_vm9 = vcmask 387328  }
0x16e0   :  { %5252 = vpow2.f32 %v4829_v32  ;;  %v1564_v30 = vrot.slane %v4833_v26, %v5786_v19  ;;  %v4809_v32 = vsel %vm416_vm10, 1.0, %v5435_v0  ;;  %vm4479_vm10 = vcmask 1041408  }
0x16ea   :  { %v5253_v33 = vpop.eup %5252 }
0x16eb   :  { %v1373_v34 = vadd.f32 1.0, %v5253_v33  ;;  %v422_v33 = vrot.slane %v4809_v32, %v5774_v4 }
0x16ed   :  { %5254 = vrcp.f32 %v1373_v34  ;;  %v429_v34 = vrot.slane %v4809_v32, %v5786_v19 }
0x16f7   :  { %v5255_v35 = vpop.eup %5254 }
0x16f8   :  { %v1388_v41 = vsub.f32 1.0, %v5255_v35 }
0x1750   :  { %v1379_v36 = vpop.permute.xlu1 %1378 }
0x1751   :  { %v1381_v37 = vmul.f32 %v5255_v35, %v1379_v36 }
0x1753   :  { %1383 = vrot.lane.b32.xlu0 %v1381_v37, %s5430_s7  ;;  %v5811_v37 = vsel %vm689_vm12, 1.0, %v5435_v0  ;;  %vm4776_vm12 = vcmask 80896  }
0x1757   :  { %1394 = vrot.lane.b32.xlu0 %v5730_v21, %s5437_s1 }
0x17c5   :  { %v1384_v38 = vpop.permute.xlu0 %1383 }
0x17c6   :  { %v1386_v27 = vadd.f32 %v1384_v38, %v5560_v20  ;;  %v702_v38 = vrot.slane %v5811_v37, %v5786_v19 }
0x17c8   :  { %5256 = vtanh.f32 %v1386_v27  ;;  %v5817_v27 = vsel %vm825_vm13, 1.0, %v5435_v0  ;;  %vm4778_vm13 = vcmask 105472  }
0x17c9   :  { %v1395_v40 = vpop.permute.xlu0 %1394  ;;  %v831_v32 = vrot.slane %v5817_v27, %v5774_v4 }
0x17ca   :  { %v1397_v44 = vmul.f32 %v5255_v35, %v1395_v40  ;;  %v5805_v35 = vsel %vm553_vm11, 1.0, %v5435_v0  ;;  %v5439_v40 = vmov 1966171168   ;;  %vm4475_vm11 = vcmask 31744  }
0x17cb   :  { %v566_v36 = vrot.slane %v5805_v35, %v5786_v19 }
0x17d2   :  { %v5257_v39 = vpop.eup %5256 }
0x17d3   :  { %1390 = vrot.lane.b32.xlu1 %v5257_v39, %s5438_s2  ;;  %v838_v39 = vrot.slane %v5817_v27, %v5786_v19 }
0x1845   :  { %v1391_v43 = vpop.permute.xlu1 %1390 }
0x1846   :  { %v1393_v45 = vmul.f32 %v1391_v43, %v1388_v41  ;;  %v301_v41 = vunpack.c.l.s4 %v5439_v40 }
0x1848   :  { %v1398_v46 = vadd.f32 %v1397_v44, %v1393_v45  ;;  %v302_v43 = vunpack.c.0.s8 %v301_v41 }
0x184a   :  { %1400 = vrot.lane.b32.xlu1 %v1398_v46, %s5438_s2  ;;  %v5822_v44 = vsub.s32 %v302_v43, %v5769_v2 }
0x184c   :  { %v992_v45 = vrot.slane %v5684_v15, %v5822_v44  ;;  %v1139_v46 = vrot.slane %v5707_v49, %v5822_v44 }
0x18bc   :  { %v1401_v48 = vpop.permute.xlu1 %1400 }
0x18bd   :  { %v5749_v50 = vsel %vm179_vm4, %v5679_v11, %v1401_v48 }
0x18be   :  { %v1466_v51 = vpack.c.bf16 %v5749_v50, %v5749_v50  ;;  %v1539_v5 = vrot.slane %v5749_v50, 6 }
0x18c0   :  { %5045 = vmatmul.mubr.msk.bf16.vlgmr.msra.gmra.mrb[20].mxu1 %vm199_vm3, %v1466_v51  ;;  %v993_v51 = vcombine.high %v992_v45, %v992_v45 }
0x18c1   :  { %5062 = vmatprep.mubr.msk.bf16.mxu1 %vm5436_vm0, %v5435_v0 }
0x1993   :  { %v1504_v53 = vpop.f32.mrb[20].mxu1 }
0x1994   :  { %v1520_v54 = vadd.f32 %v1504_v53, %v5568_v31  ;;  %v5046_v55 = vpop.f32.mrb[21].mxu1  ;;  %v1511_v8 = vrot.slane %v1504_v53, 6 }
0x1995   :  { %v1507_v56 = vpop.f32.mrb[22].mxu1 }
0x1996   :  { %v5047_v57 = vpop.f32.mrb[23].mxu1  ;;  %v1522_v58 = vrot.slane %v1520_v54, 6  ;;  %v1513_v59 = vadd.f32 %v1511_v8, %v5560_v20 }
0x1997   :  { %v1140_v57 = vcombine.high %v1139_v46, %v1139_v46 }
0x1998   :  { %1523 = vrot.lane.b32.xlu0 %v1522_v58, %s5430_s7  ;;  %v4832_v60 = vmul.f32 -1.442695, %v1513_v59  ;;  %v1286_v58 = vrot.slane %v5730_v21, %v5822_v44  ;;  %v1007_v59 = vrot.slane %v993_v51, %v5822_v44 }
0x199a   :  { %5258 = vpow2.f32 %v4832_v60  ;;  %v1287_v49 = vcombine.high %v1286_v58, %v1286_v58 }
0x19a4   :  { %v5259_v61 = vpop.eup %5258 }
0x19a5   :  { %v1517_v14 = vadd.f32 1.0, %v5259_v61  ;;  %v1154_v61 = vrot.slane %v1140_v57, %v5822_v44 }
0x19a7   :  { %5260 = vrcp.f32 %v1517_v14  ;;  %v5836_v14 = vrot.slane %v5749_v50, %v5822_v44  ;;  %v1162_v3 = vrot.slane %v1154_v61, %v5774_v4  ;;  %v1557_v50 = vrot.slane %v4833_v26, %v5774_v4 }
0x19a8   :  { %v695_v26 = vrot.slane %v5811_v37, %v5774_v4 }
0x19b1   :  { %v5764_v31 = vpop.eup %5260 }
0x19b2   :  { %v1533_v53 = vsub.f32 1.0, %v5764_v31 }
0x1a0a   :  { %v1524_v63 = vpop.permute.xlu0 %1523 }
0x1a0b   :  { %v1526_v1 = vmul.f32 %v5764_v31, %v1524_v63  ;;  %v1410_v63 = vrot.slane %v4830_v24, %v5774_v4 }
0x1a0d   :  { %1528 = vrot.lane.b32.xlu1 %v1526_v1, %s5430_s7  ;;  %s5440_s7 = smov 16  }
0x1a11   :  { %1540 = vrot.lane.b32.xlu1 %v1539_v5, %s5437_s1  ;;  %v1429_v5 = vcombine.high %v5836_v14, %v5836_v14 }
0x1a13   :  { %v1443_v29 = vrot.slane %v1429_v5, %v5822_v44 }
0x1a15   :  { %1123 = vbcast.lane.b32.xlu1 %v1121_v6, 256  ;;  %v1301_v6 = vrot.slane %v1287_v49, %v5822_v44 }
0x1a17   :  { %v1309_v62 = vrot.slane %v1301_v6, %v5774_v4 }
0x1a19   :  { %1270 = vbcast.lane.b32.xlu1 %v1268_v9, 256  ;;  %v4806_v9 = vsel %vm282_vm14, 1.0, %v5435_v0 }
0x1a7f   :  { %v1529_v13 = vpop.permute.xlu1 %1528 }
0x1a80   :  { %v1531_v17 = vadd.f32 %v1529_v13, %v5560_v20  ;;  %v1275_v20 = vrot.slane %v4827_v7, %v5786_v19 }
0x1a82   :  { %5262 = vtanh.f32 %v1531_v17  ;;  %v288_v17 = vrot.slane %v4806_v9, %v5774_v4 }
0x1a83   :  { %v1541_v48 = vpop.permute.xlu1 %1540 }
0x1a84   :  { %v1543_v55 = vmul.f32 %v5764_v31, %v1541_v48  ;;  %v1015_v31 = vrot.slane %v1007_v59, %v5774_v4  ;;  %v1436_v48 = vrot.slane %v5836_v14, %v5822_v44 }
0x1a8c   :  { %v5263_v18 = vpop.eup %5262 }
0x1a8d   :  { %1535 = vrot.lane.b32.xlu0 %v5263_v18, %s5438_s2 }
0x1a91   :  { %976 = vbcast.lane.b32.xlu0 %v974_v28, 256 }
0x1a95   :  { %983 = vbcast.lane.b32.xlu0 %v981_v22, 256  ;;  %v1451_v22 = vrot.slane %v1443_v29, %v5774_v4 }
0x1a99   :  { %1130 = vbcast.lane.b32.xlu0 %v1128_v23, 256  ;;  %v295_v23 = vrot.slane %v4806_v9, %v5786_v19 }
0x1a9d   :  { %1277 = vbcast.lane.b32.xlu0 %v1275_v20, 256 }
0x1aa1   :  { %1419 = vbcast.lane.b32.xlu0 %v1417_v25, 256  ;;  %v559_v25 = vrot.slane %v5805_v35, %v5774_v4  ;;  %v1294_v35 = vrot.slane %v1286_v58, %v5822_v44 }
0x1aa3   :  { %v1305_v41 = vrot.slane %v1294_v35, %v5774_v4 }
0x1aa5   :  { %1566 = vbcast.lane.b32.xlu0 %v1564_v30, 256  ;;  %v1000_v30 = vrot.slane %v992_v45, %v5822_v44  ;;  %v707_v45 = vcombine.high %v5634_v12, %v5634_v12  ;;  %v306_v12 = vrot.slane %v5577_v52, %v5822_v44 }
0x1aa7   :  { %v714_v58 = vrot.slane %v707_v45, %v5822_v44  ;;  %v307_v52 = vcombine.high %v306_v12, %v306_v12 }
0x1aa9   :  { %424 = vbcast.lane.b32.xlu0 %v422_v33, 256  ;;  %v1147_v33 = vrot.slane %v1139_v46, %v5822_v44  ;;  %v440_v46 = vrot.slane %v5596_v16, %v5822_v44  ;;  %v321_v9 = vrot.slane %v307_v52, %v5822_v44 }
0x1aab   :  { %v448_v16 = vrot.slane %v440_v46, %v5822_v44  ;;  %v441_v57 = vcombine.high %v440_v46, %v440_v46 }
0x1aad   :  { %431 = vbcast.lane.b32.xlu0 %v429_v34, 256  ;;  %v1011_v34 = vrot.slane %v1000_v30, %v5774_v4 }
0x1ab1   :  { %568 = vbcast.lane.b32.xlu0 %v566_v36, 256  ;;  %v1124_v36 = vpop.permute.xlu1 %1123 }
0x1ab5   :  { %704 = vbcast.lane.b32.xlu0 %v702_v38, 256  ;;  %v1271_v40 = vpop.permute.xlu1 %1270 }
0x1ab6   :  { %v1312_v27 = vmul.f32 %v1305_v41, %v1271_v40 }
0x1ab9   :  { %840 = vbcast.lane.b32.xlu0 %v838_v39, 256  ;;  %v1158_v39 = vrot.slane %v1147_v33, %v5774_v4  ;;  %v722_v33 = vrot.slane %v714_v58, %v5822_v44 }
0x1abb   :  { %v1165_v37 = vmul.f32 %v1158_v39, %v1124_v36 }
0x1aff   :  { %v1536_v54 = vpop.permute.xlu0 %1535 }
0x1b00   :  { %v1538_v56 = vmul.f32 %v1536_v54, %v1533_v53  ;;  %v571_v54 = vcombine.high %v5615_v47, %v5615_v47 }
0x1b02   :  { %v1544_v8 = vadd.f32 %v1543_v55, %v1538_v56 }
0x1b03   :  { %v977_v60 = vpop.permute.xlu0 %976 }
0x1b04   :  { %v1546_v15 = vrot.slane %v1544_v8, 2  ;;  %v1018_v38 = vmul.f32 %v1011_v34, %v977_v60  ;;  %v1447_v8 = vrot.slane %v1436_v48, %v5774_v4 }
0x1b06   :  { %1547 = vrot.lane.b32.xlu1 %v1546_v15, %s5438_s2 }
0x1b07   :  { %v984_v1 = vpop.permute.xlu0 %983 }
0x1b08   :  { %v1019_v21 = vmul.f32 %v1015_v31, %v984_v1  ;;  %v456_v31 = vcombine.high %v448_v16, %v448_v16  ;;  %v715_v1 = vcombine.high %v714_v58, %v714_v58  ;;  %v849_v58 = vrot.slane %v5653_v42, %v5822_v44 }
0x1b0a   :  { %1024 = vrot.lane.b32.xlu0 %v1019_v21, %s5437_s1  ;;  %1412 = vbcast.lane.b32.xlu1 %v1410_v63, 256  ;;  %v455_v63 = vrot.slane %v441_v57, %v5822_v44  ;;  %v314_v21 = vrot.slane %v306_v12, %v5822_v44 }
0x1b0b   :  { %v1131_v7 = vpop.permute.xlu0 %1130 }
0x1b0c   :  { %v1166_v13 = vmul.f32 %v1162_v3, %v1131_v7  ;;  %v325_v29 = vrot.slane %v314_v21, %v5774_v4 }
0x1b0e   :  { %1171 = vrot.lane.b32.xlu0 %v1166_v13, %s5437_s1  ;;  %1559 = vbcast.lane.b32.xlu1 %v1557_v50, 256  ;;  %v461_v13 = vrot.slane %v456_v31, %v5774_v4 }
0x1b0f   :  { %v1278_v18 = vpop.permute.xlu0 %1277 }
0x1b10   :  { %v1313_v28 = vmul.f32 %v1309_v62, %v1278_v18  ;;  %v457_v62 = vcombine.high %v455_v63, %v455_v63 }
0x1b12   :  { %1318 = vrot.lane.b32.xlu0 %v1313_v28, %s5437_s1  ;;  %290 = vbcast.lane.b32.xlu1 %v288_v17, 256  ;;  %v729_v17 = vrot.slane %v715_v1, %v5822_v44 }
0x1b13   :  { %v1420_v20 = vpop.permute.xlu0 %1419 }
0x1b14   :  { %v1455_v24 = vmul.f32 %v1451_v22, %v1420_v20  ;;  %v731_v30 = vcombine.high %v729_v17, %v729_v17 }
0x1b16   :  { %297 = vbcast.lane.b32.xlu1 %v295_v23, 256  ;;  %1460 = vrot.lane.b32.xlu0 %v1455_v24, %s5437_s1  ;;  %v329_v24 = vrot.slane %v321_v9, %v5774_v4  ;;  %v739_v41 = vrot.slane %v731_v30, %v5774_v4 }
0x1b17   :  { %v1567_v43 = vpop.permute.xlu0 %1566 }
0x1b1a   :  { %561 = vbcast.lane.b32.xlu1 %v559_v25, 256 }
0x1b1b   :  { %v425_v51 = vpop.permute.xlu0 %424 }
0x1b1c   :  { %v468_v22 = vmul.f32 %v461_v13, %v425_v51 }
0x1b1e   :  { %697 = vbcast.lane.b32.xlu1 %v695_v26, 256  ;;  %v465_v26 = vrot.slane %v457_v62, %v5774_v4 }
0x1b1f   :  { %v432_v61 = vpop.permute.xlu0 %431 }
0x1b20   :  { %v469_v36 = vmul.f32 %v465_v26, %v432_v61 }
0x1b22   :  { %833 = vbcast.lane.b32.xlu1 %v831_v32, 256 }
0x1b23   :  { %v569_v18 = vpop.permute.xlu0 %568 }
0x1b26   :  { %1022 = vrot.lane.b32.xlu1 %v1018_v38, %s5437_s1 }
0x1b27   :  { %v705_v35 = vpop.permute.xlu0 %704 }
0x1b28   :  { %v743_v46 = vmul.f32 %v739_v41, %v705_v35 }
0x1b2a   :  { %1169 = vrot.lane.b32.xlu1 %v1165_v37, %s5437_s1 }
0x1b2e   :  { %1316 = vrot.lane.b32.xlu1 %v1312_v27, %s5437_s1 }
0x1b78   :  { %v1548_v53 = vpop.permute.xlu1 %1547 }
0x1b79   :  { %v5883_v55 = vsel %vm179_vm4, %v5679_v11, %v1548_v53  ;;  %v578_v11 = vrot.slane %v571_v54, %v5822_v44  ;;  %vm1961_vm4 = vcmask 124928  }
0x1b7a   :  { %v1575_v56 = vrot.slane %v5883_v55, %v5822_v44 }
0x1b7b   :  { %v579_v50 = vcombine.high %v578_v11, %v578_v11  ;;  %v586_v25 = vrot.slane %v578_v11, %v5822_v44 }
0x1b7c   :  { %v1576_v59 = vcombine.high %v1575_v56, %v1575_v56  ;;  %v1583_v47 = vrot.slane %v1575_v56, %v5822_v44  ;;  %v1413_v60 = vpop.permute.xlu1 %1412 }
0x1b7d   :  { %v1454_v15 = vmul.f32 %v1447_v8, %v1413_v60  ;;  %v593_v23 = vrot.slane %v579_v50, %v5822_v44  ;;  %v597_v37 = vrot.slane %v586_v25, %v5774_v4  ;;  %v850_v8 = vcombine.high %v849_v58, %v849_v58 }
0x1b7e   :  { %v1590_v49 = vrot.slane %v1576_v59, %v5822_v44  ;;  %v5896_v14 = vrot.slane %v1583_v47, %v5774_v4  ;;  %v841_v47 = vpop.permute.xlu0 %840 }
0x1b7f   :  { %1458 = vrot.lane.b32.xlu1 %v1454_v15, %s5437_s1  ;;  %v601_v38 = vrot.slane %v593_v23, %v5774_v4  ;;  %v864_v60 = vrot.slane %v850_v8, %v5822_v44  ;;  %v857_v15 = vrot.slane %v849_v58, %v5822_v44  ;;  %v5193_v8 = vld [vmem:[#allocation2 + $0x28] sm:$0xff]  }
0x1b80   :  { %v5902_v3 = vrot.slane %v1590_v49, %v5774_v4  ;;  %v1560_v5 = vpop.permute.xlu1 %1559  ;;  %5055 = vmatpush3.bf16.msra.mxu1 %v5193_v8 }
0x1b81   :  { %v1601_v6 = vmul.f32 %v5896_v14, %v1560_v5  ;;  %v605_v40 = vmul.f32 %v601_v38, %v569_v18  ;;  %v872_v61 = vrot.slane %v864_v60, %v5774_v4  ;;  %v868_v31 = vrot.slane %v857_v15, %v5774_v4  ;;  %5056 = vmatprep.subr.bf16.mxu1 %v5435_v0 }
0x1b82   :  { %v1602_v7 = vmul.f32 %v5902_v3, %v1567_v43  ;;  %v730_v43 = vcombine.high %v722_v33, %v722_v33  ;;  %v1025_v11 = vpop.permute.xlu0 %1024  ;;  %v1843_v15 = vrot.slane %v5896_v14, %v5822_v44 }
0x1b83   :  { %1605 = vrot.lane.b32.xlu1 %v1601_v6, %s5437_s1  ;;  %v876_v52 = vmul.f32 %v872_v61, %v841_v47  ;;  %v5194_v47 = vld [vmem:[#allocation2 + $0x30] sm:$0xff]   ;;  %v5195_v61 = vld [vmem:[#allocation2 + $0x38] sm:$0xff]  }
0x1b84   :  { %v291_v28 = vpop.permute.xlu1 %290  ;;  %1607 = vrot.lane.b32.xlu0 %v1602_v7, %s5437_s1  ;;  %v735_v56 = vrot.slane %v730_v43, %v5774_v4  ;;  %5057 = vmatpush3.bf16.msra.mxu1 %v5194_v47 }
0x1b85   :  { %v332_v20 = vmul.f32 %v325_v29, %v291_v28  ;;  %5058 = vmatprep.subr.bf16.mxu1 %v5435_v0 }
0x1b86   :  { %v1172_v1 = vpop.permute.xlu0 %1171 }
0x1b87   :  { %v470_v32 = vadd.f32 %v468_v22, %v332_v20  ;;  %v5192_v22 = vld [vmem:[#allocation2 + $0x20] sm:$0xff]  }
0x1b88   :  { %v298_v34 = vpop.permute.xlu1 %297  ;;  %1968 = vrot.lane.b32.xlu0 %v5896_v14, %s5440_s7  ;;  %5049 = vmatpush3.bf16.msra.mxu0 %v5192_v22 }
0x1b89   :  { %v333_v39 = vmul.f32 %v329_v24, %v298_v34  ;;  %5066 = vmatprep.subr.bf16.mxu0 %v5435_v0  ;;  %5059 = vmatpush3.bf16.msra.mxu1 %v5195_v61 }
0x1b8a   :  { %v1319_v6 = vpop.permute.xlu0 %1318  ;;  %5060 = vmatprep.subr.bf16.mxu1 %v5435_v0 }
0x1b8b   :  { %v471_v27 = vadd.f32 %v469_v36, %v333_v39 }
0x1b8c   :  { %v562_v45 = vpop.permute.xlu1 %561 }
0x1b8d   :  { %v607_v48 = vadd.f32 %v605_v40, %v471_v27  ;;  %v604_v51 = vmul.f32 %v597_v37, %v562_v45 }
0x1b8e   :  { %v1461_v18 = vpop.permute.xlu0 %1460 }
0x1b8f   :  { %v745_v53 = vadd.f32 %v743_v46, %v607_v48  ;;  %v606_v54 = vadd.f32 %v604_v51, %v470_v32 }
0x1b90   :  { %v698_v12 = vpop.permute.xlu1 %697 }
0x1b91   :  { %v742_v16 = vmul.f32 %v735_v56, %v698_v12  ;;  %v878_v63 = vadd.f32 %v876_v52, %v745_v53  ;;  %v1851_v52 = vrot.slane %v1843_v15, %v5822_v44 }
0x1b93   :  { %v744_v57 = vadd.f32 %v742_v16, %v606_v54  ;;  %v1029_v50 = vadd.f32 %v1025_v11, %v878_v63  ;;  %v5196_v63 = vld [vmem:[#allocation2 + $0x40] sm:$0xff]  }
0x1b94   :  { %v834_v59 = vpop.permute.xlu1 %833  ;;  %5061 = vmatpush3.bf16.msra.mxu1 %v5196_v63 }
0x1b95   :  { %v875_v21 = vmul.f32 %v868_v31, %v834_v59  ;;  %v1176_v7 = vadd.f32 %v1172_v1, %v1029_v50  ;;  %v1866_v31 = vrot.slane %v5902_v3, %v5822_v44  ;;  %5076 = vmatprep.subr.bf16.mxu1 %v5435_v0  ;;  %v1859_v50 = vcombine.high %v1851_v52, %v1851_v52 }
0x1b97   :  { %v877_v42 = vadd.f32 %v875_v21, %v744_v57  ;;  %v1323_v17 = vadd.f32 %v1319_v6, %v1176_v7  ;;  %v1874_v21 = vrot.slane %v1866_v31, %v5822_v44  ;;  %v1844_v6 = vcombine.high %v1843_v15, %v1843_v15  ;;  %v5997_v7 = vld [vmem:[#allocation2 + $0x58] sm:$0xff]  }
0x1b98   :  { %v1023_v49 = vpop.permute.xlu1 %1022 }
0x1b99   :  { %v1028_v13 = vadd.f32 %v1023_v49, %v877_v42  ;;  %v1465_v20 = vadd.f32 %v1461_v18, %v1323_v17  ;;  %v1882_v17 = vcombine.high %v1874_v21, %v1874_v21 }
0x1b9c   :  { %v1170_v5 = vpop.permute.xlu1 %1169 }
0x1b9d   :  { %v1175_v62 = vadd.f32 %v1170_v5, %v1028_v13  ;;  %v1867_v13 = vcombine.high %v1866_v31, %v1866_v31 }
0x1ba0   :  { %v1317_v9 = vpop.permute.xlu1 %1316 }
0x1ba1   :  { %v1322_v28 = vadd.f32 %v1317_v9, %v1175_v62  ;;  %v1858_v9 = vrot.slane %v1844_v6, %v5822_v44  ;;  %v1881_v62 = vrot.slane %v1867_v13, %v5822_v44 }
0x1bf1   :  { %v1459_v29 = vpop.permute.xlu1 %1458 }
0x1bf2   :  { %v1464_v23 = vadd.f32 %v1459_v29, %v1322_v28 }
0x1bf5   :  { %v1606_v24 = vpop.permute.xlu1 %1605 }
0x1bf6   :  { %v5930_v25 = vadd.f32 %v1606_v24, %v1464_v23  ;;  %v1608_v26 = vpop.permute.xlu0 %1607 }
0x1bf7   :  { %v5932_v30 = vadd.f32 %v1608_v26, %v1465_v20 }
0x1bf8   :  { %1980 = vrot.lane.b32.xlu0 %v5930_v25, %s5438_s2  ;;  %v1648_v32 = vrot.slane %v5930_v25, %v5822_v44 }
0x1bf9   :  { %v1671_v33 = vrot.slane %v5932_v30, %v5822_v44 }
0x1bfa   :  { %v1649_v34 = vcombine.high %v1648_v32, %v1648_v32  ;;  %v1656_v36 = vrot.slane %v1648_v32, %v5822_v44  ;;  %v5946_v45 = vpop.permute.xlu0 %1968 }
0x1bfb   :  { %v1672_v38 = vcombine.high %v1671_v33, %v1671_v33  ;;  %v1679_v39 = vrot.slane %v1671_v33, %v5822_v44  ;;  %v1974_v54 = vmul.f32 %v5946_v45, %v5930_v25  ;;  %v1976_v49 = vsub.f32 %v5930_v25, %v5946_v45 }
0x1bfc   :  { %1982 = vrot.lane.b32.xlu0 %v5932_v30, %s5438_s2  ;;  %v1663_v35 = vrot.slane %v1649_v34, %v5822_v44  ;;  %v1664_v37 = vcombine.high %v1656_v36, %v1656_v36 }
0x1bfd   :  { %v1686_v40 = vrot.slane %v1672_v38, %v5822_v44  ;;  %v1687_v41 = vcombine.high %v1679_v39, %v1679_v39  ;;  %v1978_v1 = vand.u32 2147483647, %v1976_v49 }
0x1bfe   :  { %v1688_v27 = vcombine.low %v1656_v36, %v1663_v35  ;;  %v1689_v43 = vcombine.low %v1664_v37, %v1679_v39 }
0x1bff   :  { %v1690_v46 = vcombine.low %v1686_v40, %v1687_v41 }
0x1c00   :  { %1994 = vrot.lane.b32.xlu0 %v5896_v14, %s5437_s1  ;;  %v1697_v48 = vrot.slane %v1688_v27, %v5822_v44  ;;  %v1704_v51 = vrot.slane %v1689_v43, %v5822_v44  ;;  %v5984_v14 = vld [vmem:[#allocation2 + $0x48] sm:$0xff]  }
0x1c01   :  { %v1711_v53 = vrot.slane %v1690_v46, %v5822_v44 }
0x1c02   :  { %v1712_v56 = vcombine.low %v1697_v48, %v1704_v51 }
0x1c03   :  { %v1726_v12 = vrot.slane %v1711_v53, %v5822_v44 }
0x1c04   :  { %2325 = vrot.lane.b32.xlu0 %v1974_v54, %s5438_s2  ;;  %v1719_v16 = vrot.slane %v1712_v56, %v5822_v44 }
0x1c06   :  { %v1727_v57 = vcombine.low %v1719_v16, %v1726_v12 }
0x1c08   :  { %v1729_v58 = vpack.c.bf16 %v1727_v57, %v1727_v57 }
0x1c0a   :  { %1731 = vrot.lane.b32.xlu1 %v1729_v58, %s5438_s2 }
0x1c0e   :  { %1970 = vrot.lane.b32.xlu1 %v5902_v3, %s5440_s7 }
0x1c12   :  { %1988 = vrot.lane.b32.xlu1 %v1974_v54, %s5441_s14 }
0x1c6a   :  { %v1981_v29 = vpop.permute.xlu0 %1980 }
0x1c6e   :  { %v1983_v28 = vpop.permute.xlu0 %1982 }
0x1c72   :  { %v1995_v20 = vpop.permute.xlu0 %1994 }
0x1c76   :  { %v2326_v41 = vpop.permute.xlu0 %2325 }
0x1c7c   :  { %v1732_v59 = vpop.permute.xlu1 %1731 }
0x1c7d   :  { %5051 = vmatmul.mubr.msk.bf16.vlgmr.msra.gmra.mrb[24].mxu0 %vm1739_vm15, %v1732_v59 }
0x1c7e   :  { %5072 = vmatprep.mubr.msk.bf16.mxu0 %vm5436_vm0, %v5435_v0  ;;  %5067 = vmatpush3.bf16.msra.mxu0 %v5984_v14 }
0x1c7f   :  { %5068 = vmatprep.subr.bf16.mxu0 %v5435_v0 }
0x1c80   :  { %v5966_v60 = vpop.permute.xlu1 %1970 }
0x1c81   :  { %v1975_v11 = vmul.f32 %v5966_v60, %v5932_v30  ;;  %v1977_v5 = vsub.f32 %v5932_v30, %v5966_v60 }
0x1c83   :  { %2327 = vrot.lane.b32.xlu0 %v1975_v11, %s5438_s2  ;;  %1990 = vrot.lane.b32.xlu1 %v1975_v11, %s5441_s14  ;;  %v1979_v42 = vand.u32 2147483647, %v1977_v5 }
0x1c84   :  { %v1989_v18 = vpop.permute.xlu1 %1988 }
0x1c85   :  { %v2000_v22 = vsel %vm1739_vm15, %v1981_v29, %v1989_v18 }
0x1c86   :  { %v2002_v23 = vsel %vm199_vm3, %v2000_v22, %v1978_v1 }
0x1c87   :  { %1883 = vrot.lane.b32.xlu0 %v1851_v52, %s5441_s14  ;;  %1996 = vrot.lane.b32.xlu1 %v5902_v3, %s5437_s1  ;;  %v5994_v3 = vld [vmem:[#allocation2 + $0x50] sm:$0xff]   ;;  %v2005_v24 = vsel %vm2004_vm1, %v2002_v23, %v1995_v20 }
0x1c88   :  { %5069 = vmatpush3.bf16.msra.mxu0 %v5994_v3  ;;  %v2015_v26 = vrot.slane %v2005_v24, %v5822_v44 }
0x1c89   :  { %5070 = vmatprep.subr.bf16.mxu0 %v5435_v0 }
0x1c8a   :  { %v2016_v32 = vcombine.high %v2015_v26, %v2015_v26  ;;  %v2023_v36 = vrot.slane %v2015_v26, %v5822_v44 }
0x1c8b   :  { %1889 = vrot.lane.b32.xlu0 %v1874_v21, %s5441_s14  ;;  %2333 = vrot.lane.b32.xlu1 %v1978_v1, %s5441_s14 }
0x1c8c   :  { %5071 = vmatpush3.bf16.msra.mxu0 %v5997_v7  ;;  %v2030_v38 = vrot.slane %v2016_v32, %v5822_v44  ;;  %v2031_v43 = vcombine.high %v2023_v36, %v2023_v36 }
0x1c8d   :  { %5082 = vmatprep.subr.bf16.mxu0 %v5435_v0 }
0x1c8e   :  { %v2055_v27 = vcombine.low %v2023_v36, %v2030_v38 }
0x1c8f   :  { %1887 = vrot.lane.b32.xlu0 %v1859_v50, %s5441_s14  ;;  %2335 = vrot.lane.b32.xlu1 %v1979_v42, %s5441_s14 }
0x1c90   :  { %v2064_v59 = vrot.slane %v2055_v27, %v5822_v44 }
0x1c93   :  { %1885 = vrot.lane.b32.xlu1 %v1858_v9, %s5441_s14 }
0x1c97   :  { %1891 = vrot.lane.b32.xlu1 %v1881_v62, %s5441_s14 }
0x1c9b   :  { %1893 = vrot.lane.b32.xlu1 %v1882_v17, %s5441_s14 }
0x1cf5   :  { %v1991_v33 = vpop.permute.xlu1 %1990  ;;  %v2328_v58 = vpop.permute.xlu0 %2327 }
0x1cf6   :  { %v2001_v34 = vsel %vm1739_vm15, %v1983_v28, %v1991_v33 }
0x1cf7   :  { %v2003_v35 = vsel %vm199_vm3, %v2001_v34, %v1979_v42 }
0x1cf9   :  { %v1997_v39 = vpop.permute.xlu1 %1996  ;;  %v1884_v34 = vpop.permute.xlu0 %1883 }
0x1cfa   :  { %v2006_v37 = vsel %vm2004_vm1, %v2003_v35, %v1997_v39 }
0x1cfb   :  { %v2038_v40 = vrot.slane %v2006_v37, %v5822_v44 }
0x1cfd   :  { %v2039_v46 = vcombine.high %v2038_v40, %v2038_v40  ;;  %v2046_v48 = vrot.slane %v2038_v40, %v5822_v44  ;;  %v2334_v51 = vpop.permute.xlu1 %2333  ;;  %v1890_v39 = vpop.permute.xlu0 %1889 }
0x1cfe   :  { %v2339_v53 = vsel %vm1739_vm15, %v2326_v41, %v2334_v51 }
0x1cff   :  { %v2053_v54 = vrot.slane %v2039_v46, %v5822_v44  ;;  %v2054_v56 = vcombine.high %v2046_v48, %v2046_v48  ;;  %v2056_v12 = vcombine.low %v2031_v43, %v2046_v48  ;;  %v2341_v16 = vsel %vm199_vm3, %v2339_v53, %v5946_v45 }
0x1d00   :  { %v2351_v57 = vrot.slane %v2341_v16, %v5822_v44 }
0x1d01   :  { %v2057_v8 = vcombine.low %v2053_v54, %v2054_v56  ;;  %v2071_v47 = vrot.slane %v2056_v12, %v5822_v44  ;;  %v2336_v11 = vpop.permute.xlu1 %2335  ;;  %v1888_v16 = vpop.permute.xlu0 %1887 }
0x1d02   :  { %v2352_v15 = vcombine.high %v2351_v57, %v2351_v57  ;;  %v2359_v61 = vrot.slane %v2351_v57, %v5822_v44  ;;  %v2340_v49 = vsel %vm1739_vm15, %v2328_v58, %v2336_v11 }
0x1d03   :  { %v2078_v52 = vrot.slane %v2057_v8, %v5822_v44  ;;  %v2079_v31 = vcombine.low %v2064_v59, %v2071_v47  ;;  %v2342_v45 = vsel %vm199_vm3, %v2340_v49, %v5966_v60 }
0x1d04   :  { %v2366_v63 = vrot.slane %v2352_v15, %v5822_v44  ;;  %v2374_v1 = vrot.slane %v2342_v45, %v5822_v44  ;;  %v2367_v50 = vcombine.high %v2359_v61, %v2359_v61 }
0x1d05   :  { %v2086_v21 = vrot.slane %v2079_v31, %v5822_v44  ;;  %v2093_v5 = vrot.slane %v2078_v52, %v5822_v44  ;;  %v1886_v36 = vpop.permute.xlu1 %1885 }
0x1d06   :  { %v2391_v42 = vcombine.low %v2359_v61, %v2366_v63  ;;  %v2375_v6 = vcombine.high %v2374_v1, %v2374_v1  ;;  %v2382_v9 = vrot.slane %v2374_v1, %v5822_v44 }
0x1d07   :  { %v2094_v13 = vcombine.low %v2086_v21, %v2093_v5 }
0x1d08   :  { %v2389_v62 = vrot.slane %v2375_v6, %v5822_v44  ;;  %v2390_v17 = vcombine.high %v2382_v9, %v2382_v9  ;;  %v2392_v29 = vcombine.low %v2367_v50, %v2382_v9  ;;  %v2400_v18 = vrot.slane %v2391_v42, %v5822_v44 }
0x1d09   :  { %v2096_v60 = vpack.c.bf16 %v2094_v13, %v2094_v13  ;;  %v1892_v41 = vpop.permute.xlu1 %1891 }
0x1d0a   :  { %v2393_v28 = vcombine.low %v2389_v62, %v2390_v17  ;;  %v2407_v22 = vrot.slane %v2392_v29, %v5822_v44  ;;  %v1637_v62 = vld [vmem:[#allocation5 + $0x30] sm:$0x1] }
0x1d0b   :  { %5063 = vmatmul.mubr.msk.bf16.vlgmr.msra.gmra.mrb[24].mxu1 %vm2121_vm2, %v2096_v60  ;;  %5169 = vpush %v1637_v62 }
0x1d0c   :  { %v2414_v23 = vrot.slane %v2393_v28, %v5822_v44  ;;  %v2415_v20 = vcombine.low %v2400_v18, %v2407_v22  ;;  %5078 = vmatprep.mubr.msk.bf16.mxu1 %vm5436_vm0, %v5435_v0  ;;  %v4842_v28 = vld [vmem:[#allocation5 + $0x20] ss:$0 sm:$0xff] }
0x1d0d   :  { %v1894_v47 = vpop.permute.xlu1 %1893 }
0x1d0e   :  { %v2422_v24 = vrot.slane %v2415_v20, %v5822_v44  ;;  %v2429_v26 = vrot.slane %v2414_v23, %v5822_v44 }
0x1d10   :  { %v2430_v32 = vcombine.low %v2422_v24, %v2429_v26 }
0x1d12   :  { %v2432_v33 = vpack.c.bf16 %v2430_v32, %v2430_v32  ;;  %v2296_v32 = vrot.slane %v4842_v28, %v5822_v44 }
0x1d14   :  { %5073 = vmatmul.mubr.msk.bf16.vlgmr.msra.gmra.mrb[28].mxu0 %vm2004_vm1, %v2432_v33 }
0x1d15   :  { %5084 = vmatprep.mubr.msk.bf16.mxu0 %vm5436_vm0, %v5435_v0 }
0x1d3c   :  { %s5170_s15 = spop %5169 }
0x1d50   :  { %v1777_v38 = vpop.f32.mrb[24].mxu0 }
0x1d51   :  { %v1784_v35 = vcombine.high %v1777_v38, %v1777_v38  ;;  %v1791_v37 = vrot.slane %v1777_v38, %v5822_v44  ;;  %v5052_v40 = vpop.f32.mrb[25].mxu0 }
0x1d52   :  { %v1780_v27 = vpop.f32.mrb[26].mxu0  ;;  %v2297_v40 = vcombine.high %v2296_v32, %v2296_v32 }
0x1d53   :  { %v1798_v43 = vrot.slane %v1784_v35, %v5822_v44  ;;  %v1799_v46 = vcombine.high %v1791_v37, %v1791_v37  ;;  %v6051_v48 = vrot.slane %v1791_v37, %v5822_v44  ;;  %v5053_v51 = vpop.f32.mrb[27].mxu0  ;;  %v4841_v35 = vld [vmem:[#allocation5 + $0x10] ss:$0 sm:$0xff]  ;;  %v6088_v37 = vld [vmem:[#allocation5 + $0x18] ss:$0 sm:$0xff] }
0x1d54   :  { %v4849_v27 = vld [vmem:[#allocation5 + $0x28] ss:$0 sm:$0xff] }
0x1d55   :  { %v1800_v53 = vcombine.high %v1798_v43, %v1798_v43  ;;  %v6054_v54 = vrot.slane %v1798_v43, %v5822_v44  ;;  %v6057_v56 = vrot.slane %v1799_v46, %v5822_v44  ;;  %v6061_v12 = vcombine.high %v6051_v48, %v6051_v48 }
0x1d56   :  { %v1901_v8 = vmul.f32 %v1884_v34, %v6051_v48 }
0x1d57   :  { %v6064_v57 = vrot.slane %v1800_v53, %v5822_v44  ;;  %v6068_v58 = vcombine.high %v6057_v56, %v6057_v56  ;;  %v1902_v59 = vmul.f32 %v1886_v36, %v6057_v56  ;;  %v1903_v11 = vmul.f32 %v1888_v16, %v6061_v12 }
0x1d58   :  { %v1905_v15 = vmul.f32 %v1892_v41, %v6054_v54  ;;  %v2304_v41 = vrot.slane %v2296_v32, %v5822_v44 }
0x1d59   :  { %v1913_v61 = vcombine.low %v1901_v8, %v1902_v59  ;;  %v1904_v49 = vmul.f32 %v1890_v39, %v6068_v58  ;;  %v1906_v52 = vmul.f32 %v1894_v47, %v6064_v57  ;;  %v1927_v45 = vrot.slane %v1903_v11, %v5822_v44 }
0x1d5a   :  { %v2311_v11 = vrot.slane %v2297_v40, %v5822_v44 }
0x1d5b   :  { %v1920_v31 = vrot.slane %v1913_v61, %v5822_v44  ;;  %v1936_v63 = vcombine.low %v1904_v49, %v1905_v15  ;;  %v1950_v5 = vrot.slane %v1906_v52, %v5822_v44  ;;  %v2312_v15 = vcombine.high %v2304_v41, %v2304_v41 }
0x1d5c   :  { %v6097_v49 = vrot.slane %v4849_v27, %v5822_v44 }
0x1d5d   :  { %v1928_v1 = vcombine.low %v1920_v31, %v1927_v45  ;;  %v1943_v21 = vrot.slane %v1936_v63, %v5822_v44 }
0x1d5f   :  { %v1935_v50 = vrot.slane %v1928_v1, %v5822_v44  ;;  %v1951_v42 = vcombine.low %v1943_v21, %v1950_v5 }
0x1d61   :  { %v1962_v6 = vsel %vm1961_vm4, %v1935_v50, 0.0  ;;  %v1958_v9 = vrot.slane %v1951_v42, %v5822_v44 }
0x1d62   :  { %1963 = vadd.xlane.f32.xlu0 %v1962_v6 }
0x1d63   :  { %v1965_v13 = vsel %vm1961_vm4, %v1958_v9, 0.0 }
0x1d64   :  { %1966 = vadd.xlane.f32.xlu1 %v1965_v13 }
0x1dde   :  { %v2159_v17 = vpop.f32.mrb[24].mxu1 }
0x1ddf   :  { %v5064_v29 = vpop.f32.mrb[25].mxu1  ;;  %v2166_v23 = vcombine.high %v2159_v17, %v2159_v17  ;;  %v2173_v20 = vrot.slane %v2159_v17, %v5822_v44 }
0x1de0   :  { %v2162_v60 = vpop.f32.mrb[26].mxu1 }
0x1de1   :  { %v5065_v18 = vpop.f32.mrb[27].mxu1  ;;  %v2180_v36 = vrot.slane %v2166_v23, %v5822_v44  ;;  %v2181_v38 = vcombine.high %v2173_v20, %v2173_v20  ;;  %v2189_v43 = vrot.slane %v2173_v20, %v5822_v44 }
0x1de3   :  { %v2182_v53 = vcombine.high %v2180_v36, %v2180_v36  ;;  %v2203_v16 = vrot.slane %v2181_v38, %v5822_v44  ;;  %v2196_v1 = vrot.slane %v2180_v36, %v5822_v44  ;;  %v2211_v21 = vcombine.high %v2189_v43, %v2189_v43 }
0x1de5   :  { %v2210_v42 = vrot.slane %v2182_v53, %v5822_v44  ;;  %v2212_v6 = vcombine.high %v2203_v16, %v2203_v16 }
0x1de7   :  { %v2488_v22 = vpop.f32.mrb[28].mxu0 }
0x1de8   :  { %v5074_v24 = vpop.f32.mrb[29].mxu0  ;;  %v2502_v34 = vrot.slane %v2488_v22, %v5822_v44  ;;  %v2495_v39 = vcombine.high %v2488_v22, %v2488_v22 }
0x1de9   :  { %v2491_v26 = vpop.f32.mrb[30].mxu0 }
0x1dea   :  { %v5075_v33 = vpop.f32.mrb[31].mxu0  ;;  %v2510_v46 = vcombine.high %v2502_v34, %v2502_v34  ;;  %v2509_v47 = vrot.slane %v2495_v39, %v5822_v44  ;;  %v2518_v5 = vrot.slane %v2502_v34, %v5822_v44 }
0x1dec   :  { %v2532_v50 = vrot.slane %v2510_v46, %v5822_v44  ;;  %v2511_v62 = vcombine.high %v2509_v47, %v2509_v47  ;;  %v2525_v17 = vrot.slane %v2509_v47, %v5822_v44  ;;  %v2540_v20 = vcombine.high %v2518_v5, %v2518_v5 }
0x1dee   :  { %v2541_v24 = vcombine.high %v2532_v50, %v2532_v50 }
0x1def   :  { %v1964_v51 = vpop.xlane.xlu0 %1963 }
0x1df0   :  { %v2223_v8 = vmul.f32 %v4841_v35, %v1964_v51  ;;  %v2558_v59 = vmul.f32 %v6088_v37, %v1964_v51 }
0x1df1   :  { %v1967_v61 = vpop.xlane.xlu1 %1966 }
0x1df2   :  { %v2233_v52 = vrot.slane %v2223_v8, %v5822_v44  ;;  %v2568_v31 = vrot.slane %v2558_v59, %v5822_v44  ;;  %v2224_v45 = vmul.f32 %v4841_v35, %v1967_v61  ;;  %v2559_v63 = vmul.f32 %v6088_v37, %v1967_v61 }
0x1df4   :  { %v2234_v9 = vcombine.high %v2233_v52, %v2233_v52  ;;  %v2241_v13 = vrot.slane %v2233_v52, %v5822_v44  ;;  %v2569_v29 = vcombine.high %v2568_v31, %v2568_v31  ;;  %v2256_v60 = vrot.slane %v2224_v45, %v5822_v44 }
0x1df5   :  { %v2591_v23 = vrot.slane %v2559_v63, %v5822_v44  ;;  %v2576_v38 = vrot.slane %v2568_v31, %v5822_v44  ;;  %v2539_v63 = vrot.slane %v2511_v62, %v5822_v44 }
0x1df6   :  { %v2248_v18 = vrot.slane %v2234_v9, %v5822_v44  ;;  %v2249_v28 = vcombine.high %v2241_v13, %v2241_v13  ;;  %v2279_v22 = vadd.f32 %v2241_v13, %v2189_v43  ;;  %v2257_v26 = vcombine.high %v2256_v60, %v2256_v60 }
0x1df7   :  { %v2264_v32 = vrot.slane %v2256_v60, %v5822_v44  ;;  %v2583_v39 = vrot.slane %v2569_v29, %v5822_v44  ;;  %v2592_v53 = vcombine.high %v2591_v23, %v2591_v23  ;;  %v2599_v47 = vrot.slane %v2591_v23, %v5822_v44 }
0x1df8   :  { %v2280_v33 = vadd.f32 %v2248_v18, %v2203_v16  ;;  %v2281_v34 = vadd.f32 %v2249_v28, %v2211_v21  ;;  %v6112_v36 = vadd.f32 %v2304_v41, %v2279_v22  ;;  %v2271_v35 = vrot.slane %v2257_v26, %v5822_v44 }
0x1df9   :  { %v2272_v40 = vcombine.high %v2264_v32, %v2264_v32  ;;  %v2282_v27 = vadd.f32 %v2264_v32, %v2212_v6  ;;  %v2584_v31 = vcombine.high %v2576_v38, %v2576_v38  ;;  %v2607_v13 = vcombine.high %v2599_v47, %v2599_v47 }
0x1dfa   :  { %v6117_v43 = vadd.f32 %v2311_v11, %v2280_v33  ;;  %v6119_v46 = vadd.f32 %v2312_v15, %v2281_v34  ;;  %v2548_v51 = vadd.f32 %v2518_v5, %v6112_v36  ;;  %v2283_v8 = vadd.f32 %v2271_v35, %v2196_v1 }
0x1dfb   :  { %v2284_v16 = vadd.f32 %v2272_v40, %v2210_v42  ;;  %v6122_v59 = vadd.f32 %v2304_v41, %v2282_v27  ;;  %v2606_v41 = vrot.slane %v2592_v53, %v5822_v44  ;;  %v6140_v60 = vrot.slane %v6097_v49, %v5822_v44 }
0x1dfc   :  { %v2549_v61 = vadd.f32 %v2532_v50, %v6117_v43  ;;  %v2550_v52 = vadd.f32 %v2540_v20, %v6119_v46  ;;  %v2614_v45 = vadd.f32 %v2576_v38, %v2548_v51  ;;  %v6128_v21 = vadd.f32 %v2311_v11, %v2283_v8 }
0x1dfd   :  { %v6130_v6 = vadd.f32 %v2312_v15, %v2284_v16  ;;  %v2551_v5 = vadd.f32 %v2541_v24, %v6122_v59  ;;  %v2638_v15 = vcombine.high %v6097_v49, %v6097_v49  ;;  %v6147_v28 = vcombine.high %v6140_v60, %v6140_v60 }
0x1dfe   :  { %v2615_v1 = vadd.f32 %v2583_v39, %v2549_v61  ;;  %v2616_v42 = vadd.f32 %v2584_v31, %v2550_v52  ;;  %5264 = vtanh.f32 %v2614_v45  ;;  %v2552_v9 = vadd.f32 %v2525_v17, %v6128_v21 }
0x1dff   :  { %v2553_v50 = vadd.f32 %v2539_v63, %v6130_v6  ;;  %v2617_v29 = vadd.f32 %v2599_v47, %v2551_v5  ;;  %v6143_v17 = vrot.slane %v2638_v15, %v5822_v44  ;;  %v6163_v63 = vstv %s5170_s15 }
0x1e00   :  { %5266 = vtanh.f32 %v2615_v1  ;;  %v2618_v62 = vadd.f32 %v2606_v41, %v2552_v9  ;;  %v6167_v1 = vsub.s32 %v5676_v10, %v5769_v2 }
0x1e01   :  { %5268 = vtanh.f32 %v2616_v42  ;;  %v2619_v11 = vadd.f32 %v2607_v13, %v2553_v50 }
0x1e02   :  { %5270 = vtanh.f32 %v2617_v29  ;;  %v6176_v29 = vld [vmem:[%s6591_s3] sm:$0x3]  ;;  %s5442_s3 = smov 124  }
0x1e03   :  { %5272 = vtanh.f32 %v2618_v62  ;;  %vm2322_vm7 = vcmp.ge.s32.totalorder %v6176_v29, 0 }
0x1e04   :  { %5274 = vtanh.f32 %v2619_v11 }
0x1e08   :  { %v5265_v18 = vpop.eup %5264 }
0x1e09   :  { %v2657_v20 = vmul.f32 %v5265_v18, %v6140_v60 }
0x1e0a   :  { %v5267_v22 = vpop.eup %5266 }
0x1e0b   :  { %v5269_v23 = vpop.eup %5268  ;;  %v2658_v24 = vmul.f32 %v5267_v22, %v6143_v17  ;;  %v6186_v22 = vsel %vm2322_vm7, 1.0, %v5435_v0 }
0x1e0c   :  { %v5271_v26 = vpop.eup %5270  ;;  %v2659_v32 = vmul.f32 %v5269_v23, %v6147_v28 }
0x1e0d   :  { %v5273_v33 = vpop.eup %5272  ;;  %v2669_v49 = vcombine.low %v2657_v20, %v2658_v24  ;;  %v2660_v38 = vmul.f32 %v5271_v26, %v6140_v60 }
0x1e0e   :  { %v5275_v34 = vpop.eup %5274  ;;  %v2661_v39 = vmul.f32 %v5273_v33, %v6143_v17  ;;  %v2683_v40 = vrot.slane %v2659_v32, %v5822_v44  ;;  %v6190_v33 = vld [vmem:[#allocation2 + $0x68] sm:$0xff]  }
0x1e0f   :  { %v2676_v35 = vrot.slane %v2669_v49, %v5822_v44  ;;  %v2662_v27 = vmul.f32 %v5275_v34, %v6147_v28  ;;  %5083 = vmatpush3.bf16.msra.mxu0 %v6190_v33 }
0x1e10   :  { %v2692_v51 = vcombine.low %v2660_v38, %v2661_v39  ;;  %5098 = vmatprep.subr.bf16.mxu0 %v5435_v0 }
0x1e11   :  { %v2684_v53 = vcombine.low %v2676_v35, %v2683_v40  ;;  %v2706_v16 = vrot.slane %v2662_v27, %v5822_v44  ;;  %v2852_v35 = vpack.c.bf16 %v5883_v55, %v5883_v55  ;;  %v4856_v40 = vld [vmem:[#allocation5 + $0x40] ss:$0 sm:$0xff]  ;;  %v6203_v27 = vld [vmem:[#allocation2 + $0x60] sm:$0xff]  }
0x1e12   :  { %v2699_v8 = vrot.slane %v2692_v51, %v5822_v44  ;;  %5077 = vmatpush3.bf16.msra.mxu1 %v6203_v27 }
0x1e13   :  { %v2691_v47 = vrot.slane %v2684_v53, %v5822_v44  ;;  %5088 = vmatprep.subr.bf16.mxu1 %v5435_v0 }
0x1e14   :  { %v2707_v61 = vcombine.low %v2699_v8, %v2706_v16 }
0x1e15   :  { %v2718_v52 = vsel %vm2717_vm5, %v2691_v47, 0.0 }
0x1e16   :  { %2719 = vadd.xlane.f32.xlu0 %v2718_v52  ;;  %v2714_v31 = vrot.slane %v2707_v61, %v5822_v44 }
0x1e18   :  { %v2721_v45 = vsel %vm2717_vm5, %v2714_v31, 0.0 }
0x1e1a   :  { %2722 = vadd.xlane.f32.xlu0 %v2721_v45 }
0x1ea3   :  { %v2720_v5 = vpop.xlane.xlu0 %2719 }
0x1ea4   :  { %v2728_v42 = vadd.f32 %v6163_v63, %v2720_v5 }
0x1ea6   :  { %v2735_v50 = vrot.slane %v2728_v42, %v6167_v1 }
0x1ea7   :  { %v2723_v41 = vpop.xlane.xlu0 %2722 }
0x1ea8   :  { %v2729_v9 = vadd.f32 %v6163_v63, %v2723_v41 }
0x1eaa   :  { %v2739_v13 = vrot.slane %v2729_v9, %v6167_v1 }
0x1eac   :  { %v2741_v10 = vsel %vm2740_vm6, %v2739_v13, %v2735_v50 }
0x1ead   :  { %v2743_v2 = vsel %vm2322_vm7, %v2741_v10, -1e+30 }
0x1eae   :  { %v2745_v62 = vsel %vm2744_vm8, %v2743_v2, -inf }
0x1eaf   :  { %2746 = vmax.xlane.f32.xlu1 %v2745_v62 }
0x1f3c   :  { %v2747_v11 = vpop.xlane.xlu1 %2746 }
0x1f3d   :  { %v2748_v15 = vsub.f32 %v2743_v2, %v2747_v11 }
0x1f3f   :  { %v2749_v18 = vmul.f32 1.442695, %v2748_v15 }
0x1f41   :  { %5276 = vpow2.f32 %v2749_v18 }
0x1f4b   :  { %v5277_v23 = vpop.eup %5276 }
0x1f4c   :  { %v2751_v20 = vmul.f32 %v5277_v23, %v6186_v22 }
0x1f4e   :  { %v2752_v24 = vsel %vm2744_vm8, %v2751_v20, 0.0 }
0x1f4f   :  { %2753 = vadd.xlane.f32.xlu0 %v2752_v24 }
0x1fdc   :  { %v2754_v26 = vpop.xlane.xlu0 %2753 }
0x1fdd   :  { %v2755_v32 = vmax.f32 %v2754_v26, 1e-30 }
0x1fdf   :  { %5278 = vrcp.f32 %v2755_v32 }
0x1fe9   :  { %v5279_v49 = vpop.eup %5278 }
0x1fea   :  { %v6194_v34 = vmul.f32 %v5279_v49, %v2751_v20 }
0x1fec   :  { %v2768_v38 = vrot.slane %v6194_v34, %v5786_v19  ;;  %v2761_v39 = vrot.slane %v6194_v34, %v5774_v4 }
0x1fee   :  { %2770 = vbcast.lane.b32.xlu0 %v2768_v38, 256  ;;  %2763 = vbcast.lane.b32.xlu1 %v2761_v39, 256 }
0x1ff2   :  { %2854 = vrot.lane.b32.xlu1 %v2852_v35, %s5441_s14  ;;  %2917 = vrot.lane.b32.xlu0 %v4856_v40, %s5437_s1 }
0x2060   :  { %v2771_v51 = vpop.permute.xlu0 %2770  ;;  %v2764_v53 = vpop.permute.xlu1 %2763 }
0x2061   :  { %v2773_v8 = vmul.f32 %v2771_v51, %v5932_v30  ;;  %v2772_v16 = vmul.f32 %v2764_v53, %v5930_v25  ;;  %v6235_v53 = vld [vmem:[#allocation5 + $0x38] ss:$0 sm:$0xff] }
0x2063   :  { %v2782_v47 = vsel %vm2774_vm9, %v2773_v8, 0.0  ;;  %v2775_v61 = vsel %vm2774_vm9, %v2772_v16, 0.0 }
0x2064   :  { %v2783_v52 = vrot.slane %v2782_v47, 4  ;;  %v2776_v31 = vrot.slane %v2775_v61, 4  ;;  %v6212_v45 = vpop.permute.xlu1 %2854  ;;  %v6231_v49 = vpop.permute.xlu0 %2917 }
0x2065   :  { %5085 = vmatmul.mubr.msk.bf16.vlgmr.msra.gmra.mrb[32].mxu0 %vm1739_vm15, %v6212_v45 }
0x2066   :  { %v2784_v5 = vadd.f32 %v2783_v52, %v2782_v47  ;;  %v2777_v42 = vadd.f32 %v2776_v31, %v2775_v61  ;;  %5099 = vmatpush3.bf16.msra.mxu0 %v6203_v27  ;;  %5100 = vmatprep.mubr.msk.bf16.mxu0 %vm5436_vm0, %v5435_v0 }
0x2067   :  { %5104 = vmatprep.subr.bf16.mxu0 %v5435_v0 }
0x2068   :  { %v2785_v41 = vrot.slane %v2784_v5, 2  ;;  %v2778_v9 = vrot.slane %v2777_v42, 2 }
0x206a   :  { %v2786_v50 = vadd.f32 %v2785_v41, %v2784_v5  ;;  %v2779_v13 = vadd.f32 %v2778_v9, %v2777_v42 }
0x206c   :  { %v2787_v10 = vrot.slane %v2786_v50, 1  ;;  %v2780_v2 = vrot.slane %v2779_v13, 1 }
0x206e   :  { %v2788_v62 = vadd.f32 %v2787_v10, %v2786_v50  ;;  %v2781_v11 = vadd.f32 %v2780_v2, %v2779_v13 }
0x2070   :  { %v2790_v15 = vpack.c.bf16 %v2788_v62, %v2788_v62  ;;  %v2789_v18 = vpack.c.bf16 %v2781_v11, %v2781_v11 }
0x2072   :  { %v2798_v23 = vunpack.c.l.b16 %v2790_v15  ;;  %v2797_v20 = vunpack.c.l.b16 %v2789_v18 }
0x2074   :  { %v2799_v24 = vsel %vm2740_vm6, %v2798_v23, %v2797_v20 }
0x2075   :  { %v2800_v26 = vpack.c.b16 %v2799_v24, %v2799_v24 }
0x2077   :  { %2801 = vrot.lane.b32.xlu1 %v2800_v26, %s5438_s2 }
0x20e9   :  { %v2802_v32 = vpop.permute.xlu1 %2801 }
0x20ea   :  { %5079 = vmatmul.mubr.msk.bf16.vlgmr.msra.gmra.mrb[28].mxu1 %vm1739_vm15, %v2802_v32 }
0x20eb   :  { %5089 = vmatpush3.bf16.msra.mxu1 %v5984_v14  ;;  %5094 = vmatprep.mubr.msk.bf16.mxu1 %vm5436_vm0, %v5435_v0 }
0x20ec   :  { %5090 = vmatprep.subr.bf16.mxu1 %v5435_v0 }
0x20ef   :  { %5091 = vmatpush3.bf16.msra.mxu1 %v5994_v3 }
0x20f0   :  { %5092 = vmatprep.subr.bf16.mxu1 %v5435_v0 }
0x20f3   :  { %5093 = vmatpush3.bf16.msra.mxu1 %v5997_v7 }
0x20f4   :  { %5110 = vmatprep.subr.bf16.mxu1 %v5435_v0 }
0x2138   :  { %v2899_v38 = vpop.f32.mrb[32].mxu0 }
0x2139   :  { %v2920_v39 = vadd.f32 %v6231_v49, %v2899_v38  ;;  %v5086_v35 = vpop.f32.mrb[33].mxu0 }
0x213a   :  { %v2902_v40 = vpop.f32.mrb[34].mxu0 }
0x213b   :  { %2922 = vrot.lane.b32.xlu1 %v2920_v39, %s5438_s2  ;;  %v5087_v51 = vpop.f32.mrb[35].mxu0 }
0x21ad   :  { %v2923_v50 = vpop.permute.xlu1 %2922 }
0x21bd   :  { %v2846_v8 = vpop.f32.mrb[28].mxu1 }
0x21be   :  { %v2847_v16 = vadd.f32 %v6235_v53, %v2846_v8  ;;  %v5080_v47 = vpop.f32.mrb[29].mxu1 }
0x21bf   :  { %v2849_v61 = vpop.f32.mrb[30].mxu1 }
0x21c0   :  { %v2905_v52 = vadd.f32 %v2899_v38, %v2847_v16  ;;  %v5081_v31 = vpop.f32.mrb[31].mxu1 }
0x21c2   :  { %v4855_v5 = vmul.f32 -1.442695, %v2905_v52 }
0x21c4   :  { %5280 = vpow2.f32 %v4855_v5 }
0x21ce   :  { %v5281_v42 = vpop.eup %5280 }
0x21cf   :  { %v2909_v41 = vadd.f32 1.0, %v5281_v42 }
0x21d1   :  { %5282 = vrcp.f32 %v2909_v41 }
0x21db   :  { %v5283_v9 = vpop.eup %5282 }
0x21dc   :  { %v2925_v13 = vmul.f32 %v5283_v9, %v2923_v50  ;;  %v2932_v11 = vsub.f32 1.0, %v5283_v9  ;;  %v2938_v18 = vmul.f32 %v5283_v9, %v5883_v55 }
0x21de   :  { %2927 = vrot.lane.b32.xlu0 %v2925_v13, %s5437_s1 }
0x2250   :  { %v2928_v10 = vpop.permute.xlu0 %2927 }
0x2251   :  { %v2930_v2 = vadd.f32 %v2928_v10, %v2847_v16 }
0x2253   :  { %5284 = vtanh.f32 %v2930_v2 }
0x225d   :  { %v5285_v62 = vpop.eup %5284 }
0x225e   :  { %2934 = vrot.lane.b32.xlu1 %v5285_v62, %s5441_s14 }
0x22d0   :  { %v2935_v15 = vpop.permute.xlu1 %2934 }
0x22d1   :  { %v2937_v23 = vmul.f32 %v2935_v15, %v2932_v11 }
0x22d3   :  { %v6241_v20 = vadd.f32 %v2938_v18, %v2937_v23 }
0x22d5   :  { %v2947_v24 = vrot.slane %v6241_v20, %v5822_v44 }
0x22d7   :  { %v2948_v26 = vcombine.high %v2947_v24, %v2947_v24  ;;  %v2955_v32 = vrot.slane %v2947_v24, %v5822_v44 }
0x22d9   :  { %v2966_v38 = vrot.slane %v2955_v32, %v5774_v4  ;;  %v2962_v39 = vrot.slane %v2948_v26, %v5822_v44 }
0x22db   :  { %3101 = vrot.lane.b32.xlu0 %v2966_v38, %s5440_s7  ;;  %v2970_v35 = vrot.slane %v2962_v39, %v5774_v4  ;;  %v2977_v61 = vrot.slane %v2966_v38, %v5822_v44 }
0x22dd   :  { %3103 = vrot.lane.b32.xlu1 %v2970_v35, %s5440_s7  ;;  %v2978_v5 = vcombine.high %v2977_v61, %v2977_v61  ;;  %v3000_v42 = vrot.slane %v2970_v35, %v5822_v44  ;;  %v2985_v41 = vrot.slane %v2977_v61, %v5822_v44 }
0x22df   :  { %v2992_v9 = vrot.slane %v2978_v5, %v5822_v44  ;;  %v3001_v50 = vcombine.high %v3000_v42, %v3000_v42  ;;  %v3008_v13 = vrot.slane %v3000_v42, %v5822_v44  ;;  %v2993_v2 = vcombine.high %v2985_v41, %v2985_v41 }
0x22e1   :  { %v3015_v10 = vrot.slane %v3001_v50, %v5822_v44  ;;  %v3016_v62 = vcombine.high %v3008_v13, %v3008_v13 }
0x234d   :  { %v3102_v55 = vpop.permute.xlu0 %3101 }
0x234e   :  { %v3107_v40 = vmul.f32 %v3102_v55, %v5930_v25  ;;  %v3109_v51 = vsub.f32 %v5930_v25, %v3102_v55 }
0x234f   :  { %v3104_v8 = vpop.permute.xlu1 %3103 }
0x2350   :  { %v3111_v16 = vand.u32 2147483647, %v3109_v51  ;;  %v3110_v47 = vsub.f32 %v5932_v30, %v3104_v8  ;;  %3115 = vrot.lane.b32.xlu0 %v3107_v40, %s5438_s2  ;;  %v3108_v52 = vmul.f32 %v3104_v8, %v5932_v30 }
0x2352   :  { %3123 = vrot.lane.b32.xlu1 %v3111_v16, %s5441_s14  ;;  %v3112_v31 = vand.u32 2147483647, %v3110_v47 }
0x2354   :  { %3117 = vrot.lane.b32.xlu0 %v3108_v52, %s5438_s2 }
0x2356   :  { %3125 = vrot.lane.b32.xlu1 %v3112_v31, %s5441_s14 }
0x2358   :  { %3017 = vrot.lane.b32.xlu0 %v2985_v41, %s5441_s14 }
0x235a   :  { %3019 = vrot.lane.b32.xlu1 %v2992_v9, %s5441_s14 }
0x235c   :  { %3023 = vrot.lane.b32.xlu0 %v3008_v13, %s5441_s14 }
0x235e   :  { %3025 = vrot.lane.b32.xlu1 %v3015_v10, %s5441_s14 }
0x2360   :  { %3021 = vrot.lane.b32.xlu0 %v2993_v2, %s5441_s14 }
0x2362   :  { %3027 = vrot.lane.b32.xlu1 %v3016_v62, %s5441_s14 }
0x23c2   :  { %v3116_v11 = vpop.permute.xlu0 %3115 }
0x23c4   :  { %v3124_v15 = vpop.permute.xlu1 %3123 }
0x23c5   :  { %v3129_v18 = vsel %vm1739_vm15, %v3116_v11, %v3124_v15 }
0x23c6   :  { %v3131_v23 = vsel %vm199_vm3, %v3129_v18, %v3102_v55  ;;  %v3118_v24 = vpop.permute.xlu0 %3117 }
0x23c7   :  { %v3141_v26 = vrot.slane %v3131_v23, %v5822_v44 }
0x23c8   :  { %v3126_v32 = vpop.permute.xlu1 %3125 }
0x23c9   :  { %v3142_v38 = vcombine.high %v3141_v26, %v3141_v26  ;;  %v3149_v39 = vrot.slane %v3141_v26, %v5822_v44  ;;  %v3130_v35 = vsel %vm1739_vm15, %v3118_v24, %v3126_v32 }
0x23ca   :  { %v3132_v40 = vsel %vm199_vm3, %v3130_v35, %v3104_v8  ;;  %v3018_v51 = vpop.permute.xlu0 %3017 }
0x23cb   :  { %v3156_v16 = vrot.slane %v3142_v38, %v5822_v44  ;;  %v3164_v47 = vrot.slane %v3132_v40, %v5822_v44  ;;  %v3157_v61 = vcombine.high %v3149_v39, %v3149_v39  ;;  %v3035_v41 = vmul.f32 %v3018_v51, %v6051_v48 }
0x23cc   :  { %v3020_v52 = vpop.permute.xlu1 %3019 }
0x23cd   :  { %v3181_v31 = vcombine.low %v3149_v39, %v3156_v16  ;;  %v3165_v55 = vcombine.high %v3164_v47, %v3164_v47  ;;  %v3172_v5 = vrot.slane %v3164_v47, %v5822_v44  ;;  %v3036_v42 = vmul.f32 %v3020_v52, %v6057_v56 }
0x23ce   :  { %v3024_v9 = vpop.permute.xlu0 %3023 }
0x23cf   :  { %v3179_v50 = vrot.slane %v3165_v55, %v5822_v44  ;;  %v3180_v13 = vcombine.high %v3172_v5, %v3172_v5  ;;  %v3182_v8 = vcombine.low %v3157_v61, %v3172_v5  ;;  %v3190_v10 = vrot.slane %v3181_v31, %v5822_v44 }
0x23d0   :  { %v3047_v2 = vcombine.low %v3035_v41, %v3036_v42  ;;  %v3026_v62 = vpop.permute.xlu1 %3025  ;;  %v3038_v18 = vmul.f32 %v3024_v9, %v6068_v58 }
0x23d1   :  { %v3183_v11 = vcombine.low %v3179_v50, %v3180_v13  ;;  %v3197_v15 = vrot.slane %v3182_v8, %v5822_v44  ;;  %v3039_v23 = vmul.f32 %v3026_v62, %v6054_v54 }
0x23d2   :  { %v3022_v24 = vpop.permute.xlu0 %3021  ;;  %v3054_v40 = vrot.slane %v3047_v2, %v5822_v44 }
0x23d3   :  { %v3204_v26 = vrot.slane %v3183_v11, %v5822_v44  ;;  %v3205_v32 = vcombine.low %v3190_v10, %v3197_v15  ;;  %v3070_v38 = vcombine.low %v3038_v18, %v3039_v23  ;;  %v3037_v39 = vmul.f32 %v3022_v24, %v6061_v12 }
0x23d4   :  { %v3028_v35 = vpop.permute.xlu1 %3027 }
0x23d5   :  { %v3061_v51 = vrot.slane %v3037_v39, %v5822_v44  ;;  %v3040_v16 = vmul.f32 %v3028_v35, %v6064_v57  ;;  %v3212_v47 = vrot.slane %v3205_v32, %v5822_v44  ;;  %v3219_v61 = vrot.slane %v3204_v26, %v5822_v44 }
0x23d6   :  { %v3077_v52 = vrot.slane %v3070_v38, %v5822_v44 }
0x23d7   :  { %v3062_v31 = vcombine.low %v3054_v40, %v3061_v51  ;;  %v3084_v55 = vrot.slane %v3040_v16, %v5822_v44  ;;  %v3220_v5 = vcombine.low %v3212_v47, %v3219_v61 }
0x23d9   :  { %v3085_v42 = vcombine.low %v3077_v52, %v3084_v55  ;;  %v3069_v41 = vrot.slane %v3062_v31, %v5822_v44  ;;  %v3222_v9 = vpack.c.bf16 %v3220_v5, %v3220_v5 }
0x23db   :  { %v3095_v50 = vsel %vm1961_vm4, %v3069_v41, 0.0  ;;  %v3092_v13 = vrot.slane %v3085_v42, %v5822_v44  ;;  %5095 = vmatmul.mubr.msk.bf16.vlgmr.msra.gmra.mrb[32].mxu1 %vm2004_vm1, %v3222_v9 }
0x23dc   :  { %3096 = vadd.xlane.f32.xlu0 %v3095_v50  ;;  %5111 = vmatpush3.bf16.msra.mxu1 %v5984_v14 }
0x23dd   :  { %v3098_v8 = vsel %vm1961_vm4, %v3092_v13, 0.0  ;;  %5116 = vmatprep.mubr.msk.bf16.mxu1 %vm5436_vm0, %v5435_v0  ;;  %5112 = vmatprep.subr.bf16.mxu1 %v5435_v0 }
0x23de   :  { %3099 = vadd.xlane.f32.xlu1 %v3098_v8 }
0x23e0   :  { %5113 = vmatpush3.bf16.msra.mxu1 %v5994_v3 }
0x23e1   :  { %5114 = vmatprep.subr.bf16.mxu1 %v5435_v0 }
0x23e4   :  { %5115 = vmatpush3.bf16.msra.mxu1 %v5997_v7 }
0x23e5   :  { %5126 = vmatprep.subr.bf16.mxu1 %v5435_v0 }
0x2469   :  { %v3097_v10 = vpop.xlane.xlu0 %3096 }
0x246a   :  { %v3326_v62 = vmul.f32 %v6088_v37, %v3097_v10 }
0x246b   :  { %v3100_v2 = vpop.xlane.xlu1 %3099 }
0x246c   :  { %v3327_v14 = vmul.f32 %v6088_v37, %v3100_v2  ;;  %v3336_v11 = vrot.slane %v3326_v62, %v5822_v44 }
0x246e   :  { %v3359_v15 = vrot.slane %v3327_v14, %v5822_v44  ;;  %v3337_v26 = vcombine.high %v3336_v11, %v3336_v11  ;;  %v3344_v7 = vrot.slane %v3336_v11, %v5822_v44 }
0x2470   :  { %v3360_v37 = vcombine.high %v3359_v15, %v3359_v15  ;;  %v3367_v51 = vrot.slane %v3359_v15, %v5822_v44  ;;  %v3351_v31 = vrot.slane %v3337_v26, %v5822_v44  ;;  %v3352_v55 = vcombine.high %v3344_v7, %v3344_v7 }
0x2472   :  { %v3374_v13 = vrot.slane %v3360_v37, %v5822_v44  ;;  %v3375_v8 = vcombine.high %v3367_v51, %v3367_v51 }
0x24ae   :  { %v3260_v18 = vpop.f32.mrb[32].mxu1 }
0x24af   :  { %v3267_v23 = vcombine.high %v3260_v18, %v3260_v18  ;;  %v3274_v3 = vrot.slane %v3260_v18, %v5822_v44  ;;  %v5096_v24 = vpop.f32.mrb[33].mxu1 }
0x24b0   :  { %v3263_v32 = vpop.f32.mrb[34].mxu1 }
0x24b1   :  { %v3281_v38 = vrot.slane %v3267_v23, %v5822_v44  ;;  %v3282_v39 = vcombine.high %v3274_v3, %v3274_v3  ;;  %v3290_v35 = vrot.slane %v3274_v3, %v5822_v44  ;;  %v5097_v40 = vpop.f32.mrb[35].mxu1 }
0x24b3   :  { %v3283_v16 = vcombine.high %v3281_v38, %v3281_v38  ;;  %v3297_v47 = vrot.slane %v3281_v38, %v5822_v44  ;;  %v3304_v61 = vrot.slane %v3282_v39, %v5822_v44  ;;  %v3312_v52 = vcombine.high %v3290_v35, %v3290_v35 }
0x24b4   :  { %v3320_v5 = vadd.f32 %v3290_v35, %v6112_v36 }
0x24b5   :  { %v3311_v42 = vrot.slane %v3283_v16, %v5822_v44  ;;  %v3313_v41 = vcombine.high %v3304_v61, %v3304_v61  ;;  %v3321_v9 = vadd.f32 %v3304_v61, %v6117_v43  ;;  %v3322_v50 = vadd.f32 %v3312_v52, %v6119_v46 }
0x24b6   :  { %v3324_v10 = vadd.f32 %v3297_v47, %v6128_v21  ;;  %v3382_v2 = vadd.f32 %v3344_v7, %v3320_v5 }
0x24b7   :  { %v3323_v62 = vadd.f32 %v3313_v41, %v6122_v59  ;;  %v3325_v14 = vadd.f32 %v3311_v42, %v6130_v6  ;;  %v3383_v11 = vadd.f32 %v3351_v31, %v3321_v9  ;;  %v3384_v15 = vadd.f32 %v3352_v55, %v3322_v50 }
0x24b8   :  { %v3386_v18 = vadd.f32 %v3374_v13, %v3324_v10  ;;  %5286 = vtanh.f32 %v3382_v2 }
0x24b9   :  { %v3385_v23 = vadd.f32 %v3367_v51, %v3323_v62  ;;  %v3387_v3 = vadd.f32 %v3375_v8, %v3325_v14  ;;  %5288 = vtanh.f32 %v3383_v11 }
0x24ba   :  { %5290 = vtanh.f32 %v3384_v15 }
0x24bb   :  { %5292 = vtanh.f32 %v3385_v23 }
0x24bc   :  { %5294 = vtanh.f32 %v3386_v18 }
0x24bd   :  { %5296 = vtanh.f32 %v3387_v3 }
0x24c2   :  { %v5287_v24 = vpop.eup %5286 }
0x24c3   :  { %v5289_v26 = vpop.eup %5288  ;;  %v3394_v7 = vmul.f32 %v5287_v24, %v6140_v60 }
0x24c4   :  { %v5291_v32 = vpop.eup %5290  ;;  %v3395_v38 = vmul.f32 %v5289_v26, %v6143_v17 }
0x24c5   :  { %v5293_v39 = vpop.eup %5292  ;;  %v3396_v35 = vmul.f32 %v5291_v32, %v6147_v28 }
0x24c6   :  { %v5295_v40 = vpop.eup %5294  ;;  %v3406_v37 = vcombine.low %v3394_v7, %v3395_v38  ;;  %v3397_v51 = vmul.f32 %v5293_v39, %v6140_v60 }
0x24c7   :  { %v5297_v16 = vpop.eup %5296  ;;  %v3398_v47 = vmul.f32 %v5295_v40, %v6143_v17  ;;  %v3420_v52 = vrot.slane %v3396_v35, %v5822_v44 }
0x24c8   :  { %v3413_v61 = vrot.slane %v3406_v37, %v5822_v44  ;;  %v3399_v31 = vmul.f32 %v5297_v16, %v6147_v28 }
0x24c9   :  { %v3429_v55 = vcombine.low %v3397_v51, %v3398_v47 }
0x24ca   :  { %v3421_v5 = vcombine.low %v3413_v61, %v3420_v52  ;;  %v3443_v41 = vrot.slane %v3399_v31, %v5822_v44 }
0x24cb   :  { %v3436_v42 = vrot.slane %v3429_v55, %v5822_v44 }
0x24cc   :  { %v3428_v9 = vrot.slane %v3421_v5, %v5822_v44 }
0x24cd   :  { %v3444_v50 = vcombine.low %v3436_v42, %v3443_v41 }
0x24ce   :  { %v3454_v13 = vsel %vm2717_vm5, %v3428_v9, 0.0 }
0x24cf   :  { %3455 = vadd.xlane.f32.xlu0 %v3454_v13  ;;  %v3451_v8 = vrot.slane %v3444_v50, %v5822_v44 }
0x24d1   :  { %v3457_v10 = vsel %vm2717_vm5, %v3451_v8, 0.0 }
0x24d3   :  { %3458 = vadd.xlane.f32.xlu0 %v3457_v10 }
0x255c   :  { %v3456_v2 = vpop.xlane.xlu0 %3455 }
0x255d   :  { %v3460_v62 = vadd.f32 %v3456_v2, %v6163_v63 }
0x255f   :  { %v3467_v15 = vrot.slane %v3460_v62, %v6167_v1 }
0x2560   :  { %v3459_v14 = vpop.xlane.xlu0 %3458 }
0x2561   :  { %v3461_v11 = vadd.f32 %v3459_v14, %v6163_v63 }
0x2563   :  { %v3471_v18 = vrot.slane %v3461_v11, %v6167_v1 }
0x2565   :  { %v3472_v23 = vsel %vm2740_vm6, %v3471_v18, %v3467_v15 }
0x2566   :  { %v3474_v3 = vsel %vm2322_vm7, %v3472_v23, -1e+30 }
0x2567   :  { %v3475_v24 = vsel %vm2744_vm8, %v3474_v3, -inf }
0x2568   :  { %3476 = vmax.xlane.f32.xlu1 %v3475_v24 }
0x25f5   :  { %v3477_v26 = vpop.xlane.xlu1 %3476 }
0x25f6   :  { %v3478_v32 = vsub.f32 %v3474_v3, %v3477_v26 }
0x25f8   :  { %v3479_v7 = vmul.f32 1.442695, %v3478_v32 }
0x25fa   :  { %5298 = vpow2.f32 %v3479_v7 }
0x2604   :  { %v5299_v38 = vpop.eup %5298 }
0x2605   :  { %v3481_v39 = vmul.f32 %v5299_v38, %v6186_v22 }
0x2607   :  { %v3482_v35 = vsel %vm2744_vm8, %v3481_v39, 0.0 }
0x2608   :  { %3483 = vadd.xlane.f32.xlu0 %v3482_v35 }
0x2695   :  { %v3484_v40 = vpop.xlane.xlu0 %3483 }
0x2696   :  { %v3485_v37 = vmax.f32 %v3484_v40, 1e-30 }
0x2698   :  { %5300 = vrcp.f32 %v3485_v37 }
0x26a2   :  { %v5301_v51 = vpop.eup %5300 }
0x26a3   :  { %v6353_v16 = vmul.f32 %v5301_v51, %v3481_v39  ;;  %v3571_v39 = vpack.c.bf16 %v6241_v20, %v6241_v20 }
0x26a5   :  { %v3498_v47 = vrot.slane %v6353_v16, %v5786_v19  ;;  %v3491_v61 = vrot.slane %v6353_v16, %v5774_v4 }
0x26a7   :  { %3500 = vbcast.lane.b32.xlu0 %v3498_v47, 256  ;;  %3493 = vbcast.lane.b32.xlu1 %v3491_v61, 256 }
0x2719   :  { %v3501_v52 = vpop.permute.xlu0 %3500  ;;  %v3494_v31 = vpop.permute.xlu1 %3493 }
0x271a   :  { %v3503_v55 = vmul.f32 %v3501_v52, %v5932_v30  ;;  %v3502_v5 = vmul.f32 %v3494_v31, %v5930_v25 }
0x271c   :  { %v3511_v42 = vsel %vm2774_vm9, %v3503_v55, 0.0  ;;  %v3504_v41 = vsel %vm2774_vm9, %v3502_v5, 0.0 }
0x271d   :  { %v3512_v9 = vrot.slane %v3511_v42, 4  ;;  %v3505_v50 = vrot.slane %v3504_v41, 4 }
0x271f   :  { %v3513_v13 = vadd.f32 %v3512_v9, %v3511_v42  ;;  %v3506_v8 = vadd.f32 %v3505_v50, %v3504_v41 }
0x2721   :  { %v3514_v10 = vrot.slane %v3513_v13, 2  ;;  %v3507_v2 = vrot.slane %v3506_v8, 2 }
0x2723   :  { %v3515_v62 = vadd.f32 %v3514_v10, %v3513_v13  ;;  %v3508_v14 = vadd.f32 %v3507_v2, %v3506_v8 }
0x2725   :  { %v3516_v11 = vrot.slane %v3515_v62, 1  ;;  %v3509_v15 = vrot.slane %v3508_v14, 1 }
0x2727   :  { %v3517_v18 = vadd.f32 %v3516_v11, %v3515_v62  ;;  %v3510_v23 = vadd.f32 %v3509_v15, %v3508_v14 }
0x2729   :  { %v3519_v3 = vpack.c.bf16 %v3517_v18, %v3517_v18  ;;  %v3518_v24 = vpack.c.bf16 %v3510_v23, %v3510_v23 }
0x272b   :  { %v3523_v26 = vunpack.c.l.b16 %v3519_v3  ;;  %v3522_v32 = vunpack.c.l.b16 %v3518_v24 }
0x272d   :  { %v3524_v7 = vsel %vm2740_vm6, %v3523_v26, %v3522_v32 }
0x272e   :  { %v3525_v38 = vpack.c.b16 %v3524_v7, %v3524_v7 }
0x2730   :  { %3526 = vrot.lane.b32.xlu1 %v3525_v38, %s5438_s2 }
0x2734   :  { %3573 = vrot.lane.b32.xlu1 %v3571_v39, %s5441_s14 }
0x27a2   :  { %v3527_v35 = vpop.permute.xlu1 %3526 }
0x27a3   :  { %5101 = vmatmul.mubr.msk.bf16.vlgmr.msra.gmra.mrb[36].mxu0 %vm1739_vm15, %v3527_v35 }
0x27a4   :  { %5105 = vmatpush3.bf16.msra.mxu0 %v6190_v33  ;;  %5106 = vmatprep.mubr.msk.bf16.mxu0 %vm5436_vm0, %v5435_v0 }
0x27a5   :  { %5120 = vmatprep.subr.bf16.mxu0 %v5435_v0 }
0x27a6   :  { %v3574_v40 = vpop.permute.xlu1 %3573 }
0x27ab   :  { %5107 = vmatmul.mubr.msk.bf16.vlgmr.msra.gmra.mrb[40].mxu0 %vm1739_vm15, %v3574_v40 }
0x27ac   :  { %5121 = vmatpush3.bf16.msra.mxu0 %v6203_v27  ;;  %5122 = vmatprep.mubr.msk.bf16.mxu0 %vm5436_vm0, %v5435_v0 }
0x27ad   :  { %5132 = vmatprep.subr.bf16.mxu0 %v5435_v0 }
0x2876   :  { %v3565_v37 = vpop.f32.mrb[36].mxu0 }
0x2877   :  { %v5102_v51 = vpop.f32.mrb[37].mxu0  ;;  %v3566_v41 = vadd.f32 %v6235_v53, %v3565_v37 }
0x2878   :  { %v3568_v47 = vpop.f32.mrb[38].mxu0 }
0x2879   :  { %v5103_v61 = vpop.f32.mrb[39].mxu0 }
0x287e   :  { %v3612_v52 = vpop.f32.mrb[40].mxu0 }
0x287f   :  { %v3625_v31 = vadd.f32 %v3612_v52, %v6231_v49  ;;  %v5108_v55 = vpop.f32.mrb[41].mxu0  ;;  %v3618_v27 = vadd.f32 %v3612_v52, %v3566_v41 }
0x2880   :  { %v3615_v5 = vpop.f32.mrb[42].mxu0 }
0x2881   :  { %3627 = vrot.lane.b32.xlu0 %v3625_v31, %s5438_s2  ;;  %v5109_v42 = vpop.f32.mrb[43].mxu0  ;;  %v4860_v9 = vmul.f32 -1.442695, %v3618_v27 }
0x2883   :  { %5302 = vpow2.f32 %v4860_v9 }
0x288d   :  { %v5303_v50 = vpop.eup %5302 }
0x288e   :  { %v3622_v13 = vadd.f32 1.0, %v5303_v50 }
0x2890   :  { %5304 = vrcp.f32 %v3622_v13 }
0x289a   :  { %v5305_v8 = vpop.eup %5304 }
0x289b   :  { %v3637_v15 = vsub.f32 1.0, %v5305_v8  ;;  %v3643_v53 = vmul.f32 %v5305_v8, %v6241_v20 }
0x28f3   :  { %v3628_v10 = vpop.permute.xlu0 %3627 }
0x28f4   :  { %v3630_v2 = vmul.f32 %v5305_v8, %v3628_v10 }
0x28f6   :  { %3632 = vrot.lane.b32.xlu1 %v3630_v2, %s5437_s1 }
0x2968   :  { %v3633_v62 = vpop.permute.xlu1 %3632 }
0x2969   :  { %v3635_v14 = vadd.f32 %v3633_v62, %v3566_v41 }
0x296b   :  { %5306 = vtanh.f32 %v3635_v14 }
0x2975   :  { %v5307_v11 = vpop.eup %5306 }
0x2976   :  { %3639 = vrot.lane.b32.xlu0 %v5307_v11, %s5441_s14 }
0x29e8   :  { %v3640_v18 = vpop.permute.xlu0 %3639 }
0x29e9   :  { %v3642_v23 = vmul.f32 %v3640_v18, %v3637_v15 }
0x29eb   :  { %v6384_v3 = vadd.f32 %v3643_v53, %v3642_v23 }
0x29ed   :  { %v3652_v24 = vrot.slane %v6384_v3, %v5822_v44 }
0x29ef   :  { %v3653_v26 = vcombine.high %v3652_v24, %v3652_v24  ;;  %v3660_v32 = vrot.slane %v3652_v24, %v5822_v44 }
0x29f1   :  { %v3671_v7 = vrot.slane %v3660_v32, %v5774_v4  ;;  %v3667_v38 = vrot.slane %v3653_v26, %v5822_v44 }
0x29f3   :  { %3806 = vrot.lane.b32.xlu1 %v3671_v7, %s5440_s7  ;;  %v3675_v39 = vrot.slane %v3667_v38, %v5774_v4  ;;  %v3682_v61 = vrot.slane %v3671_v7, %v5822_v44 }
0x29f5   :  { %3808 = vrot.lane.b32.xlu0 %v3675_v39, %s5440_s7  ;;  %v3683_v55 = vcombine.high %v3682_v61, %v3682_v61  ;;  %v3705_v5 = vrot.slane %v3675_v39, %v5822_v44  ;;  %v3690_v42 = vrot.slane %v3682_v61, %v5822_v44 }
0x29f7   :  { %v3697_v41 = vrot.slane %v3683_v55, %v5822_v44  ;;  %v3706_v27 = vcombine.high %v3705_v5, %v3705_v5  ;;  %v3713_v9 = vrot.slane %v3705_v5, %v5822_v44  ;;  %v3698_v13 = vcombine.high %v3690_v42, %v3690_v42 }
0x29f9   :  { %v3720_v50 = vrot.slane %v3706_v27, %v5822_v44  ;;  %v3721_v8 = vcombine.high %v3713_v9, %v3713_v9 }
0x2a65   :  { %v3807_v20 = vpop.permute.xlu1 %3806 }
0x2a66   :  { %v3812_v35 = vmul.f32 %v3807_v20, %v5930_v25  ;;  %v3814_v40 = vsub.f32 %v5930_v25, %v3807_v20 }
0x2a67   :  { %v3809_v37 = vpop.permute.xlu0 %3808 }
0x2a68   :  { %v3816_v51 = vand.u32 2147483647, %v3814_v40  ;;  %v3815_v47 = vsub.f32 %v5932_v30, %v3809_v37  ;;  %3820 = vrot.lane.b32.xlu1 %v3812_v35, %s5438_s2  ;;  %v3813_v52 = vmul.f32 %v3809_v37, %v5932_v30 }
0x2a6a   :  { %3828 = vrot.lane.b32.xlu0 %v3816_v51, %s5441_s14  ;;  %v3817_v31 = vand.u32 2147483647, %v3815_v47 }
0x2a6c   :  { %3822 = vrot.lane.b32.xlu1 %v3813_v52, %s5438_s2 }
0x2a6e   :  { %3830 = vrot.lane.b32.xlu0 %v3817_v31, %s5441_s14 }
0x2a70   :  { %3722 = vrot.lane.b32.xlu1 %v3690_v42, %s5441_s14 }
0x2a72   :  { %3724 = vrot.lane.b32.xlu0 %v3697_v41, %s5441_s14 }
0x2a74   :  { %3728 = vrot.lane.b32.xlu1 %v3713_v9, %s5441_s14 }
0x2a76   :  { %3730 = vrot.lane.b32.xlu0 %v3720_v50, %s5441_s14 }
0x2a78   :  { %3726 = vrot.lane.b32.xlu1 %v3698_v13, %s5441_s14 }
0x2a7a   :  { %3732 = vrot.lane.b32.xlu0 %v3721_v8, %s5441_s14 }
0x2ada   :  { %v3821_v10 = vpop.permute.xlu1 %3820 }
0x2adc   :  { %v3829_v2 = vpop.permute.xlu0 %3828 }
0x2add   :  { %v3834_v62 = vsel %vm1739_vm15, %v3821_v10, %v3829_v2 }
0x2ade   :  { %v3836_v14 = vsel %vm199_vm3, %v3834_v62, %v3807_v20  ;;  %v3823_v11 = vpop.permute.xlu1 %3822 }
0x2adf   :  { %v3846_v15 = vrot.slane %v3836_v14, %v5822_v44 }
0x2ae0   :  { %v3831_v18 = vpop.permute.xlu0 %3830 }
0x2ae1   :  { %v3847_v53 = vcombine.high %v3846_v15, %v3846_v15  ;;  %v3854_v23 = vrot.slane %v3846_v15, %v5822_v44  ;;  %v3835_v24 = vsel %vm1739_vm15, %v3823_v11, %v3831_v18 }
0x2ae2   :  { %v3837_v26 = vsel %vm199_vm3, %v3835_v24, %v3809_v37  ;;  %v3723_v32 = vpop.permute.xlu1 %3722  ;;  %vm4462_vm3 = vcmask 25600  }
0x2ae3   :  { %v3861_v7 = vrot.slane %v3847_v53, %v5822_v44  ;;  %v3869_v38 = vrot.slane %v3837_v26, %v5822_v44  ;;  %v3862_v39 = vcombine.high %v3854_v23, %v3854_v23  ;;  %v3740_v61 = vmul.f32 %v3723_v32, %v6051_v48 }
0x2ae4   :  { %v3725_v35 = vpop.permute.xlu0 %3724 }
0x2ae5   :  { %v3886_v40 = vcombine.low %v3854_v23, %v3861_v7  ;;  %v3870_v20 = vcombine.high %v3869_v38, %v3869_v38  ;;  %v3877_v51 = vrot.slane %v3869_v38, %v5822_v44  ;;  %v3741_v47 = vmul.f32 %v3725_v35, %v6057_v56 }
0x2ae6   :  { %v3729_v52 = vpop.permute.xlu1 %3728 }
0x2ae7   :  { %v3884_v31 = vrot.slane %v3870_v20, %v5822_v44  ;;  %v3885_v55 = vcombine.high %v3877_v51, %v3877_v51  ;;  %v3887_v37 = vcombine.low %v3862_v39, %v3877_v51  ;;  %v3895_v5 = vrot.slane %v3886_v40, %v5822_v44  ;;  %v5355_v40 = vld [vmem:[#allocation5 + $0x18] ss:$0 sm:$0xff] }
0x2ae8   :  { %v3752_v42 = vcombine.low %v3740_v61, %v3741_v47  ;;  %v3731_v41 = vpop.permute.xlu0 %3730  ;;  %v3743_v50 = vmul.f32 %v3729_v52, %v6068_v58 }
0x2ae9   :  { %v3888_v27 = vcombine.low %v3884_v31, %v3885_v55  ;;  %v3902_v9 = vrot.slane %v3887_v37, %v5822_v44  ;;  %v3744_v13 = vmul.f32 %v3731_v41, %v6054_v54 }
0x2aea   :  { %v3727_v8 = vpop.permute.xlu1 %3726  ;;  %v3759_v14 = vrot.slane %v3752_v42, %v5822_v44 }
0x2aeb   :  { %v3909_v56 = vrot.slane %v3888_v27, %v5822_v44  ;;  %v3910_v48 = vcombine.low %v3895_v5, %v3902_v9  ;;  %v3775_v10 = vcombine.low %v3743_v50, %v3744_v13  ;;  %v3742_v2 = vmul.f32 %v3727_v8, %v6061_v12 }
0x2aec   :  { %v3733_v62 = vpop.permute.xlu0 %3732 }
0x2aed   :  { %v3766_v11 = vrot.slane %v3742_v2, %v5822_v44  ;;  %v3745_v15 = vmul.f32 %v3733_v62, %v6064_v57  ;;  %v3917_v18 = vrot.slane %v3910_v48, %v5822_v44  ;;  %v3924_v58 = vrot.slane %v3909_v56, %v5822_v44 }
0x2aee   :  { %v3782_v54 = vrot.slane %v3775_v10, %v5822_v44 }
0x2aef   :  { %v3767_v53 = vcombine.low %v3759_v14, %v3766_v11  ;;  %v3789_v23 = vrot.slane %v3745_v15, %v5822_v44  ;;  %v3925_v24 = vcombine.low %v3917_v18, %v3924_v58 }
0x2af1   :  { %v3790_v26 = vcombine.low %v3782_v54, %v3789_v23  ;;  %v3774_v12 = vrot.slane %v3767_v53, %v5822_v44  ;;  %v3927_v32 = vpack.c.bf16 %v3925_v24, %v3925_v24 }
0x2af3   :  { %v3800_v7 = vsel %vm1961_vm4, %v3774_v12, 0.0  ;;  %v3797_v38 = vrot.slane %v3790_v26, %v5822_v44  ;;  %5117 = vmatmul.mubr.msk.bf16.vlgmr.msra.gmra.mrb[36].mxu1 %vm2004_vm1, %v3927_v32 }
0x2af4   :  { %3801 = vadd.xlane.f32.xlu1 %v3800_v7  ;;  %5127 = vmatpush3.bf16.msra.mxu1 %v6190_v33 }
0x2af5   :  { %v3803_v57 = vsel %vm1961_vm4, %v3797_v38, 0.0  ;;  %5128 = vmatprep.mubr.msk.bf16.mxu1 %vm5436_vm0, %v5435_v0  ;;  %5138 = vmatprep.subr.bf16.mxu1 %v5435_v0 }
0x2af6   :  { %3804 = vadd.xlane.f32.xlu0 %v3803_v57 }
0x2b81   :  { %v3802_v39 = vpop.xlane.xlu1 %3801 }
0x2b82   :  { %v4031_v20 = vmul.f32 %v5355_v40, %v3802_v39 }
0x2b83   :  { %v3805_v35 = vpop.xlane.xlu0 %3804 }
0x2b84   :  { %v4032_v51 = vmul.f32 %v5355_v40, %v3805_v35  ;;  %v4041_v47 = vrot.slane %v4031_v20, %v5822_v44 }
0x2b86   :  { %v4064_v61 = vrot.slane %v4032_v51, %v5822_v44  ;;  %v4042_v37 = vcombine.high %v4041_v47, %v4041_v47  ;;  %v4049_v5 = vrot.slane %v4041_v47, %v5822_v44 }
0x2b88   :  { %v4065_v13 = vcombine.high %v4064_v61, %v4064_v61  ;;  %v4072_v8 = vrot.slane %v4064_v61, %v5822_v44  ;;  %v4056_v62 = vrot.slane %v4042_v37, %v5822_v44  ;;  %v4057_v14 = vcombine.high %v4049_v5, %v4049_v5 }
0x2b8a   :  { %v4079_v53 = vrot.slane %v4065_v13, %v5822_v44  ;;  %v4080_v23 = vcombine.high %v4072_v8, %v4072_v8 }
0x2bc6   :  { %v3965_v52 = vpop.f32.mrb[36].mxu1 }
0x2bc7   :  { %v3972_v31 = vcombine.high %v3965_v52, %v3965_v52  ;;  %v3979_v55 = vrot.slane %v3965_v52, %v5822_v44  ;;  %v5118_v33 = vpop.f32.mrb[37].mxu1 }
0x2bc8   :  { %v3968_v42 = vpop.f32.mrb[38].mxu1 }
0x2bc9   :  { %v3986_v41 = vrot.slane %v3972_v31, %v5822_v44  ;;  %v3987_v27 = vcombine.high %v3979_v55, %v3979_v55  ;;  %v3995_v9 = vrot.slane %v3979_v55, %v5822_v44  ;;  %v5119_v50 = vpop.f32.mrb[39].mxu1 }
0x2bcb   :  { %v3988_v56 = vcombine.high %v3986_v41, %v3986_v41  ;;  %v4002_v48 = vrot.slane %v3986_v41, %v5822_v44  ;;  %v4009_v10 = vrot.slane %v3987_v27, %v5822_v44  ;;  %v4017_v2 = vcombine.high %v3995_v9, %v3995_v9 }
0x2bcc   :  { %v4025_v11 = vadd.f32 %v3995_v9, %v6112_v36 }
0x2bcd   :  { %v4016_v15 = vrot.slane %v3988_v56, %v5822_v44  ;;  %v4018_v18 = vcombine.high %v4009_v10, %v4009_v10  ;;  %v4026_v58 = vadd.f32 %v4009_v10, %v6117_v43  ;;  %v4027_v54 = vadd.f32 %v4017_v2, %v6119_v46 }
0x2bce   :  { %v4029_v24 = vadd.f32 %v4002_v48, %v6128_v21  ;;  %v4087_v26 = vadd.f32 %v4049_v5, %v4025_v11 }
0x2bcf   :  { %v4028_v12 = vadd.f32 %v4018_v18, %v6122_v59  ;;  %v4030_v32 = vadd.f32 %v4016_v15, %v6130_v6  ;;  %v4088_v7 = vadd.f32 %v4056_v62, %v4026_v58  ;;  %v4089_v38 = vadd.f32 %v4057_v14, %v4027_v54 }
0x2bd0   :  { %v4091_v36 = vadd.f32 %v4079_v53, %v4029_v24  ;;  %5308 = vtanh.f32 %v4087_v26 }
0x2bd1   :  { %v4090_v57 = vadd.f32 %v4072_v8, %v4028_v12  ;;  %v4092_v39 = vadd.f32 %v4080_v23, %v4030_v32  ;;  %5310 = vtanh.f32 %v4088_v7 }
0x2bd2   :  { %5312 = vtanh.f32 %v4089_v38 }
0x2bd3   :  { %5314 = vtanh.f32 %v4090_v57 }
0x2bd4   :  { %5316 = vtanh.f32 %v4091_v36 }
0x2bd5   :  { %5318 = vtanh.f32 %v4092_v39 }
0x2bda   :  { %v5309_v43 = vpop.eup %5308 }
0x2bdb   :  { %v5311_v46 = vpop.eup %5310  ;;  %v4099_v21 = vmul.f32 %v5309_v43, %v6140_v60 }
0x2bdc   :  { %v5313_v35 = vpop.eup %5312  ;;  %v4100_v59 = vmul.f32 %v5311_v46, %v6143_v17 }
0x2bdd   :  { %v5315_v40 = vpop.eup %5314  ;;  %v4101_v6 = vmul.f32 %v5313_v35, %v6147_v28 }
0x2bde   :  { %v5317_v20 = vpop.eup %5316  ;;  %v4111_v51 = vcombine.low %v4099_v21, %v4100_v59  ;;  %v4102_v47 = vmul.f32 %v5315_v40, %v6140_v60 }
0x2bdf   :  { %v5319_v61 = vpop.eup %5318  ;;  %v4103_v52 = vmul.f32 %v5317_v20, %v6143_v17  ;;  %v4125_v55 = vrot.slane %v4101_v6, %v5822_v44 }
0x2be0   :  { %v4118_v31 = vrot.slane %v4111_v51, %v5822_v44  ;;  %v4104_v33 = vmul.f32 %v5319_v61, %v6147_v28 }
0x2be1   :  { %v4134_v37 = vcombine.low %v4102_v47, %v4103_v52 }
0x2be2   :  { %v4126_v5 = vcombine.low %v4118_v31, %v4125_v55  ;;  %v4148_v41 = vrot.slane %v4104_v33, %v5822_v44  ;;  %v5202_v55 = vld [vmem:[#allocation2 + $0x80] sm:$0xff]  }
0x2be3   :  { %v4141_v42 = vrot.slane %v4134_v37, %v5822_v44 }
0x2be4   :  { %v4133_v27 = vrot.slane %v4126_v5, %v5822_v44 }
0x2be5   :  { %v4149_v9 = vcombine.low %v4141_v42, %v4148_v41 }
0x2be6   :  { %v4159_v60 = vsel %vm2717_vm5, %v4133_v27, 0.0 }
0x2be7   :  { %4160 = vadd.xlane.f32.xlu0 %v4159_v60  ;;  %v4156_v17 = vrot.slane %v4149_v9, %v5822_v44  ;;  %v5356_v60 = vld [vmem:[#allocation5 + $0x38] ss:$0 sm:$0xff] }
0x2be9   :  { %v4162_v50 = vsel %vm2717_vm5, %v4156_v17, 0.0 }
0x2bea   :  { %4163 = vadd.xlane.f32.xlu1 %v4162_v50 }
0x2c74   :  { %v4161_v13 = vpop.xlane.xlu0 %4160 }
0x2c75   :  { %v4165_v28 = vadd.f32 %v4161_v13, %v6163_v63 }
0x2c77   :  { %v4164_v8 = vpop.xlane.xlu1 %4163  ;;  %v4172_v48 = vrot.slane %v4165_v28, %v6167_v1 }
0x2c78   :  { %v4166_v56 = vadd.f32 %v4164_v8, %v6163_v63 }
0x2c7a   :  { %v4176_v10 = vrot.slane %v4166_v56, %v6167_v1 }
0x2c7c   :  { %v4177_v2 = vsel %vm2740_vm6, %v4176_v10, %v4172_v48 }
0x2c7d   :  { %v4179_v62 = vsel %vm2322_vm7, %v4177_v2, -1e+30 }
0x2c7e   :  { %v4180_v44 = vsel %vm2744_vm8, %v4179_v62, -inf }
0x2c7f   :  { %4181 = vmax.xlane.f32.xlu0 %v4180_v44 }
0x2d0c   :  { %v4182_v14 = vpop.xlane.xlu0 %4181 }
0x2d0d   :  { %v4183_v11 = vsub.f32 %v4179_v62, %v4182_v14 }
0x2d0f   :  { %v4184_v15 = vmul.f32 1.442695, %v4183_v11 }
0x2d11   :  { %5320 = vpow2.f32 %v4184_v15 }
0x2d1b   :  { %v5321_v18 = vpop.eup %5320 }
0x2d1c   :  { %v4186_v58 = vmul.f32 %v5321_v18, %v6186_v22  ;;  %v4276_v22 = vpack.c.bf16 %v6384_v3, %v6384_v3 }
0x2d1e   :  { %v4187_v63 = vsel %vm2744_vm8, %v4186_v58, 0.0 }
0x2d1f   :  { %4188 = vadd.xlane.f32.xlu1 %v4187_v63 }
0x2dac   :  { %v4189_v54 = vpop.xlane.xlu1 %4188 }
0x2dad   :  { %v4190_v1 = vmax.f32 %v4189_v54, 1e-30 }
0x2daf   :  { %5322 = vrcp.f32 %v4190_v1 }
0x2db9   :  { %v5323_v53 = vpop.eup %5322 }
0x2dba   :  { %v6490_v23 = vmul.f32 %v5323_v53, %v4186_v58  ;;  %v6521_v58 = vld [vmem:[#allocation2 + $0x70] sm:$0xff]  }
0x2dbc   :  { %v4203_v29 = vrot.slane %v6490_v23, %v5786_v19  ;;  %v4196_v24 = vrot.slane %v6490_v23, %v5774_v4 }
0x2dbe   :  { %4205 = vbcast.lane.b32.xlu1 %v4203_v29, 256  ;;  %4198 = vbcast.lane.b32.xlu0 %v4196_v24, 256 }
0x2dc2   :  { %4278 = vrot.lane.b32.xlu1 %v4276_v22, %s5441_s14 }
0x2e30   :  { %v4206_v26 = vpop.permute.xlu1 %4205  ;;  %v4199_v12 = vpop.permute.xlu0 %4198 }
0x2e31   :  { %v4208_v32 = vmul.f32 %v4206_v26, %v5932_v30  ;;  %v4207_v7 = vmul.f32 %v4199_v12, %v5930_v25  ;;  %v6537_v12 = vld [vmem:[#allocation5 + $0x48] ss:$0 sm:$0xff] }
0x2e33   :  { %v4216_v38 = vsel %vm2774_vm9, %v4208_v32, 0.0  ;;  %v4209_v19 = vsel %vm2774_vm9, %v4207_v7, 0.0 }
0x2e34   :  { %v4217_v36 = vrot.slane %v4216_v38, 4  ;;  %v4210_v57 = vrot.slane %v4209_v19, 4  ;;  %v4279_v4 = vpop.permute.xlu1 %4278 }
0x2e35   :  { %5129 = vmatmul.mubr.msk.bf16.vlgmr.msra.gmra.mrb[40].mxu1 %vm1739_vm15, %v4279_v4 }
0x2e36   :  { %v4218_v39 = vadd.f32 %v4217_v36, %v4216_v38  ;;  %v4211_v43 = vadd.f32 %v4210_v57, %v4209_v19  ;;  %5140 = vmatprep.mubr.msk.bf16.mxu1 %vm5436_vm0, %v5435_v0  ;;  %5139 = vmatpush3.bf16.msra.mxu1 %v6521_v58 }
0x2e37   :  { %5150 = vmatprep.subr.bf16.mxu1 %v5435_v0 }
0x2e38   :  { %v4219_v46 = vrot.slane %v4218_v39, 2  ;;  %v4212_v35 = vrot.slane %v4211_v43, 2 }
0x2e3a   :  { %v4220_v21 = vadd.f32 %v4219_v46, %v4218_v39  ;;  %v4213_v30 = vadd.f32 %v4212_v35, %v4211_v43  ;;  %v4873_v35 = vld [vmem:[#allocation5 + $0x58] ss:$0 sm:$0xff] }
0x2e3c   :  { %v4221_v59 = vrot.slane %v4220_v21, 1  ;;  %v4214_v25 = vrot.slane %v4213_v30, 1 }
0x2e3e   :  { %v4222_v40 = vadd.f32 %v4221_v59, %v4220_v21  ;;  %v4215_v6 = vadd.f32 %v4214_v25, %v4213_v30  ;;  %v4352_v21 = vld [vmem:[#allocation2 + $0x78] sm:$0x3] }
0x2e3f   :  { %v4481_v30 = vsel %vm4479_vm10, %v4352_v21, 0 }
0x2e40   :  { %v4224_v20 = vpack.c.bf16 %v4222_v40, %v4222_v40  ;;  %v4223_v51 = vpack.c.bf16 %v4215_v6, %v4215_v6 }
0x2e42   :  { %v4228_v47 = vunpack.c.l.b16 %v4224_v20  ;;  %v4227_v61 = vunpack.c.l.b16 %v4223_v51 }
0x2e44   :  { %v4229_v52 = vsel %vm2740_vm6, %v4228_v47, %v4227_v61  ;;  %v4871_v47 = vld [vmem:[#allocation5 + $0x50] ss:$0 sm:$0xff] }
0x2e45   :  { %v4230_v31 = vpack.c.b16 %v4229_v52, %v4229_v52 }
0x2e47   :  { %4231 = vrot.lane.b32.xlu0 %v4230_v31, %s5438_s2 }
0x2eb9   :  { %v4232_v33 = vpop.permute.xlu0 %4231 }
0x2eba   :  { %5123 = vmatmul.mubr.msk.bf16.vlgmr.msra.gmra.mrb[44].mxu0 %vm1739_vm15, %v4232_v33 }
0x2ebb   :  { %5133 = vmatpush3.bf16.msra.mxu0 %v5202_v55  ;;  %5134 = vmatprep.mubr.msk.bf16.mxu0 %vm5436_vm0, %v5435_v0 }
0x2ebc   :  { %5144 = vmatprep.subr.bf16.mxu0 %v5435_v0 }
0x2ec2   :  { %5135 = vmatmul.mubr.msk.bf16.vlgmr.msra.gmra.mrb[48].mxu0 %vm1739_vm15, %v6212_v45 }
0x2ec3   :  { %5146 = vmatprep.mubr.msk.bf16.mxu0 %vm5436_vm0, %v5435_v0  ;;  %5145 = vmatpush3.bf16.msra.mxu0 %v4481_v30 }
0x2ec4   :  { %5156 = vmatprep.subr.bf16.mxu0 %v5435_v0 }
0x2f08   :  { %v4317_v37 = vpop.f32.mrb[40].mxu1 }
0x2f09   :  { %v4330_v5 = vadd.f32 %v4317_v37, %v6231_v49  ;;  %v5130_v42 = vpop.f32.mrb[41].mxu1 }
0x2f0a   :  { %v4320_v41 = vpop.f32.mrb[42].mxu1 }
0x2f0b   :  { %4332 = vrot.lane.b32.xlu1 %v4330_v5, %s5438_s2  ;;  %v5131_v27 = vpop.f32.mrb[43].mxu1 }
0x2f7d   :  { %v4333_v14 = vpop.permute.xlu1 %4332 }
0x2f8d   :  { %v4270_v9 = vpop.f32.mrb[44].mxu0 }
0x2f8e   :  { %v4271_v17 = vadd.f32 %v5356_v60, %v4270_v9  ;;  %v5124_v50 = vpop.f32.mrb[45].mxu0 }
0x2f8f   :  { %v4273_v13 = vpop.f32.mrb[46].mxu0 }
0x2f90   :  { %v4323_v28 = vadd.f32 %v4317_v37, %v4271_v17  ;;  %v5125_v8 = vpop.f32.mrb[47].mxu0 }
0x2f92   :  { %v4864_v56 = vmul.f32 -1.442695, %v4323_v28 }
0x2f94   :  { %5324 = vpow2.f32 %v4864_v56 }
0x2f95   :  { %v6518_v45 = vpop.f32.mrb[48].mxu0 }
0x2f96   :  { %v5136_v48 = vpop.f32.mrb[49].mxu0 }
0x2f97   :  { %v4401_v10 = vpop.f32.mrb[50].mxu0 }
0x2f98   :  { %v5137_v2 = vpop.f32.mrb[51].mxu0 }
0x2f9e   :  { %v5325_v49 = vpop.eup %5324 }
0x2f9f   :  { %v4327_v62 = vadd.f32 1.0, %v5325_v49 }
0x2fa1   :  { %5326 = vrcp.f32 %v4327_v62 }
0x2fab   :  { %v5327_v44 = vpop.eup %5326 }
0x2fac   :  { %v4335_v11 = vmul.f32 %v5327_v44, %v4333_v14  ;;  %v4342_v54 = vsub.f32 1.0, %v5327_v44  ;;  %v4348_v53 = vmul.f32 %v5327_v44, %v6384_v3 }
0x2fae   :  { %4337 = vrot.lane.b32.xlu0 %v4335_v11, %s5437_s1 }
0x3020   :  { %v4338_v15 = vpop.permute.xlu0 %4337 }
0x3021   :  { %v4340_v18 = vadd.f32 %v4338_v15, %v4271_v17 }
0x3023   :  { %5328 = vtanh.f32 %v4340_v18 }
0x302d   :  { %v5329_v63 = vpop.eup %5328 }
0x302e   :  { %4344 = vrot.lane.b32.xlu1 %v5329_v63, %s5441_s14 }
0x30a0   :  { %v4345_v1 = vpop.permute.xlu1 %4344 }
0x30a1   :  { %v4347_v29 = vmul.f32 %v4345_v1, %v4342_v54 }
0x30a3   :  { %v6527_v24 = vadd.f32 %v4348_v53, %v4347_v29 }
0x30a5   :  { %v4404_v22 = vpack.c.bf16 %v6527_v24, %v6527_v24 }
0x30a7   :  { %4406 = vrot.lane.b32.xlu0 %v4404_v22, %s5441_s14 }
0x3119   :  { %v4407_v26 = vpop.permute.xlu0 %4406 }
0x311a   :  { %5141 = vmatmul.mubr.msk.bf16.vlgmr.msra.gmra.mrb[44].mxu1 %vm1739_vm15, %v4407_v26 }
0x311b   :  { %5151 = vmatpush3.bf16.msra.mxu1 %v6521_v58  ;;  %5152 = vmatprep.mubr.msk.bf16.mxu1 %vm5436_vm0, %v5435_v0 }
0x311c   :  { %5162 = vmatprep.subr.bf16.mxu1 %v5435_v0 }
0x31ed   :  { %v4451_v3 = vpop.f32.mrb[44].mxu1 }
0x31ee   :  { %v4461_v32 = vadd.f32 %v6537_v12, %v4451_v3  ;;  %v5142_v7 = vpop.f32.mrb[45].mxu1 }
0x31ef   :  { %v4454_v38 = vpop.f32.mrb[46].mxu1 }
0x31f0   :  { %v5143_v19 = vpop.f32.mrb[47].mxu1  ;;  %v4463_v36 = vsel %vm4462_vm3, %v4461_v32, -inf }
0x31f1   :  { %4464 = vmax.xlane.f32.xlu1 %v4463_v36 }
0x3202   :  { %4529 = vrot.lane.b32.xlu1 %v4451_v3, %s5442_s3 }
0x327e   :  { %v4465_v57 = vpop.xlane.xlu1 %4464 }
0x327f   :  { %v4466_v4 = vsub.f32 %v4461_v32, %v4465_v57 }
0x3281   :  { %v4467_v39 = vmul.f32 1.442695, %v4466_v4 }
0x3282   :  { %v4530_v5 = vpop.permute.xlu1 %4529 }
0x3283   :  { %5330 = vpow2.f32 %v4467_v39 }
0x328d   :  { %v5331_v43 = vpop.eup %5330 }
0x328e   :  { %v4469_v46 = vsel %vm4462_vm3, %v5331_v43, 0.0 }
0x328f   :  { %4470 = vadd.xlane.f32.xlu0 %v4469_v46 }
0x32a5   :  { %4544 = vrot.lane.b32.xlu0 %v4873_v35, %s5443_s18 }
0x331c   :  { %v4471_v59 = vpop.xlane.xlu0 %4470 }
0x331d   :  { %5332 = vrcp.f32 %v4471_v59 }
0x3320   :  { %v4545_v25 = vpop.permute.xlu0 %4544 }
0x3321   :  { %v4547_v40 = vadd.f32 %v4545_v25, %v4451_v3 }
0x3323   :  { %4549 = vrot.lane.b32.xlu1 %v4547_v40, %s5444_s19 }
0x3327   :  { %v5333_v6 = vpop.eup %5332 }
0x3328   :  { %v4473_v20 = vmul.f32 %v5333_v6, %v5331_v43 }
0x332a   :  { %v4474_v51 = vpack.c.bf16 %v4473_v20, %v4473_v20 }
0x332c   :  { %5147 = vmatmul.mubr.msk.bf16.vlgmr.msra.gmra.mrb[52].mxu0 %vm4475_vm11, %v4474_v51 }
0x332d   :  { %5157 = vmatpush3.bf16.msra.mxu0 %v4481_v30  ;;  %5158 = vmatprep.mubr.msk.bf16.mxu0 %vm5436_vm0, %v5435_v0 }
0x3395   :  { %v4550_v17 = vpop.permute.xlu1 %4549 }
0x33ff   :  { %v4517_v61 = vpop.f32.mrb[52].mxu0 }
0x3400   :  { %v4518_v52 = vadd.f32 %v4517_v61, %v6518_v45  ;;  %v5148_v31 = vpop.f32.mrb[53].mxu0 }
0x3401   :  { %v4520_v55 = vpop.f32.mrb[54].mxu0 }
0x3402   :  { %v4527_v33 = vadd.f32 %v4871_v47, %v4518_v52  ;;  %v5149_v37 = vpop.f32.mrb[55].mxu0 }
0x3404   :  { %v4532_v42 = vadd.f32 %v4530_v5, %v4527_v33 }
0x3406   :  { %v4872_v41 = vmul.f32 -1.442695, %v4532_v42 }
0x3408   :  { %5334 = vpow2.f32 %v4872_v41 }
0x3412   :  { %v5335_v27 = vpop.eup %5334 }
0x3413   :  { %v4536_v9 = vadd.f32 1.0, %v5335_v27 }
0x3415   :  { %5336 = vrcp.f32 %v4536_v9 }
0x341f   :  { %v5337_v60 = vpop.eup %5336 }
0x3420   :  { %v4552_v50 = vmul.f32 %v5337_v60, %v4550_v17  ;;  %v4559_v56 = vsub.f32 1.0, %v5337_v60  ;;  %v4565_v10 = vmul.f32 %v5337_v60, %v6527_v24 }
0x3422   :  { %4554 = vrot.lane.b32.xlu0 %v4552_v50, %s5437_s1 }
0x3494   :  { %v4555_v13 = vpop.permute.xlu0 %4554 }
0x3495   :  { %v4557_v28 = vadd.f32 %v4555_v13, %v4527_v33 }
0x3497   :  { %5338 = vtanh.f32 %v4557_v28 }
0x34a1   :  { %v5339_v8 = vpop.eup %5338 }
0x34a2   :  { %4561 = vrot.lane.b32.xlu1 %v5339_v8, %s5441_s14 }
0x3514   :  { %v4562_v48 = vpop.permute.xlu1 %4561 }
0x3515   :  { %v4564_v2 = vmul.f32 %v4562_v48, %v4559_v56 }
0x3517   :  { %v4566_v49 = vadd.f32 %v4565_v10, %v4564_v2 }
0x3519   :  { %v4567_v62 = vpack.c.bf16 %v4566_v49, %v4566_v49 }
0x351b   :  { %4569 = vrot.lane.b32.xlu0 %v4567_v62, %s5441_s14 }
0x358d   :  { %v4570_v44 = vpop.permute.xlu0 %4569 }
0x358e   :  { %5153 = vmatmul.mubr.msk.bf16.vlgmr.msra.gmra.mrb[48].mxu1 %vm1739_vm15, %v4570_v44 }
0x358f   :  { %5163 = vmatpush3.bf16.msra.mxu1 %v6521_v58  ;;  %5164 = vmatprep.mubr.msk.bf16.mxu1 %vm5436_vm0, %v5435_v0  ;;  %vm4774_vm0 = vcmask 56320  }
0x3661   :  { %v4608_v14 = vpop.f32.mrb[48].mxu1 }
0x3662   :  { %v4614_v11 = vadd.f32 %v6537_v12, %v4608_v14  ;;  %v5154_v15 = vpop.f32.mrb[49].mxu1  ;;  %v4682_v1 = vadd.f32 %v4608_v14, %v4545_v25 }
0x3663   :  { %v4611_v18 = vpop.f32.mrb[50].mxu1 }
0x3664   :  { %v5155_v63 = vpop.f32.mrb[51].mxu1  ;;  %v4615_v54 = vsel %vm4462_vm3, %v4614_v11, -inf }
0x3665   :  { %4616 = vmax.xlane.f32.xlu1 %v4615_v54 }
0x3676   :  { %4684 = vrot.lane.b32.xlu1 %v4682_v1, %s5444_s19 }
0x36f2   :  { %v4617_v53 = vpop.xlane.xlu1 %4616 }
0x36f3   :  { %v4618_v29 = vsub.f32 %v4614_v11, %v4617_v53 }
0x36f5   :  { %v4619_v24 = vmul.f32 1.442695, %v4618_v29 }
0x36f6   :  { %v4685_v59 = vpop.permute.xlu1 %4684 }
0x36f7   :  { %5340 = vpow2.f32 %v4619_v24 }
0x3701   :  { %v5341_v58 = vpop.eup %5340 }
0x3702   :  { %v4621_v22 = vsel %vm4462_vm3, %v5341_v58, 0.0 }
0x3703   :  { %4622 = vadd.xlane.f32.xlu0 %v4621_v22 }
0x3719   :  { %4672 = vrot.lane.b32.xlu0 %v4608_v14, %s5442_s3 }
0x3790   :  { %v4623_v0 = vpop.xlane.xlu0 %4622 }
0x3791   :  { %5342 = vrcp.f32 %v4623_v0 }
0x3794   :  { %v4673_v39 = vpop.permute.xlu0 %4672 }
0x379b   :  { %v5343_v26 = vpop.eup %5342 }
0x379c   :  { %v4625_v3 = vmul.f32 %v5343_v26, %v5341_v58 }
0x379e   :  { %v4626_v32 = vpack.c.bf16 %v4625_v3, %v4625_v3 }
0x37a0   :  { %5159 = vmatmul.mubr.msk.bf16.vlgmr.msra.gmra.mrb[56].mxu0 %vm4475_vm11, %v4626_v32 }
0x3873   :  { %v4664_v7 = vpop.f32.mrb[56].mxu0 }
0x3874   :  { %v4665_v38 = vadd.f32 %v4664_v7, %v6518_v45  ;;  %v5160_v19 = vpop.f32.mrb[57].mxu0 }
0x3875   :  { %v4667_v36 = vpop.f32.mrb[58].mxu0 }
0x3876   :  { %v4670_v57 = vadd.f32 %v4871_v47, %v4665_v38  ;;  %v5161_v4 = vpop.f32.mrb[59].mxu0 }
0x3878   :  { %v4675_v43 = vadd.f32 %v4673_v39, %v4670_v57 }
0x387a   :  { %v4876_v46 = vmul.f32 -1.442695, %v4675_v43 }
0x387c   :  { %5344 = vpow2.f32 %v4876_v46 }
0x3886   :  { %v5345_v35 = vpop.eup %5344 }
0x3887   :  { %v4679_v21 = vadd.f32 1.0, %v5345_v35 }
0x3889   :  { %5346 = vrcp.f32 %v4679_v21 }
0x3893   :  { %v5347_v30 = vpop.eup %5346 }
0x3894   :  { %v4687_v25 = vmul.f32 %v5347_v30, %v4685_v59  ;;  %v4694_v20 = vsub.f32 1.0, %v5347_v30  ;;  %v4700_v47 = vmul.f32 %v5347_v30, %v4566_v49 }
0x3896   :  { %4689 = vrot.lane.b32.xlu1 %v4687_v25, %s5437_s1 }
0x3908   :  { %v4690_v40 = vpop.permute.xlu1 %4689 }
0x3909   :  { %v4692_v6 = vadd.f32 %v4690_v40, %v4670_v57 }
0x390b   :  { %5348 = vtanh.f32 %v4692_v6 }
0x3915   :  { %v5349_v45 = vpop.eup %5348 }
0x3916   :  { %4696 = vrot.lane.b32.xlu0 %v5349_v45, %s5441_s14 }
0x3988   :  { %v4697_v51 = vpop.permute.xlu0 %4696 }
0x3989   :  { %v4699_v61 = vmul.f32 %v4697_v51, %v4694_v20 }
0x398b   :  { %v4701_v52 = vadd.f32 %v4700_v47, %v4699_v61 }
0x398d   :  { %v4702_v31 = vpack.c.bf16 %v4701_v52, %v4701_v52 }
0x398f   :  { %4704 = vrot.lane.b32.xlu1 %v4702_v31, %s5441_s14 }
0x3a01   :  { %v4705_v55 = vpop.permute.xlu1 %4704 }
0x3a02   :  { %5165 = vmatmul.mubr.msk.bf16.vlgmr.msra.gmra.mrb[52].mxu1 %vm1739_vm15, %v4705_v55 }
0x3ad5   :  { %v4743_v33 = vpop.f32.mrb[52].mxu1 }
0x3ad6   :  { %v4749_v37 = vadd.f32 %v6537_v12, %v4743_v33  ;;  %v5166_v5 = vpop.f32.mrb[53].mxu1 }
0x3ad7   :  { %v4746_v42 = vpop.f32.mrb[54].mxu1 }
0x3ad8   :  { %v5167_v41 = vpop.f32.mrb[55].mxu1  ;;  %v4750_v27 = vsel %vm4462_vm3, %v4749_v37, -inf }
0x3ad9   :  { %4751 = vmax.xlane.f32.xlu0 %v4750_v27 }
0x3aef   :  { %4762 = vrot.lane.b32.xlu0 %v6194_v34, %s5431_s8  ;;  %s5447_s8 = smov [#allocation7]  }
0x3af0   :  { %s4787_s21 = sshll.u32 %s5447_s8, 4  ;;  %s4788_s21 = int_to_ptr.vmem [resolvable:$true] %s4787_s21 }
0x3af1   :  { %s5401_s22 = scalar_lea.vmem %s4788_s21, 32  ;;  %p5406_p3 = scmp.lt.s32.totalorder %s4788_s21, %s4788_s21 }
0x3af2   :  { %p5402_p2 = scmp.ne.s32.totalorder %s4788_s21, %s5401_s22  ;;  %p5407_p4 = scmp.lt.s32.totalorder %s5401_s22, %s5401_s22 }
0x3af3   :  { %4770 = vrot.lane.b32.xlu0 %v6490_v23, %s5445_s20 }
0x3af4   :  { %p5408_p5 = por %p5407_p4, %p5406_p3 }
0x3af6   :  { %p5409_p6 = pnand %p5408_p5, %p5402_p2 }
0x3b66   :  { %v4752_v9 = vpop.xlane.xlu0 %4751 }
0x3b67   :  { %v4753_v60 = vsub.f32 %v4749_v37, %v4752_v9 }
0x3b69   :  { %v4754_v17 = vmul.f32 1.442695, %v4753_v60 }
0x3b6a   :  { %v4763_v28 = vpop.permute.xlu0 %4762 }
0x3b6b   :  { %5350 = vpow2.f32 %v4754_v17 }
0x3b6e   :  { %v4771_v48 = vpop.permute.xlu0 %4770 }
0x3b75   :  { %v5351_v50 = vpop.eup %5350 }
0x3b76   :  { %v4756_v13 = vsel %vm4462_vm3, %v5351_v50, 0.0 }
0x3b77   :  { %4757 = vadd.xlane.f32.xlu1 %v4756_v13 }
0x3b88   :  { %4766 = vrot.lane.b32.xlu1 %v6353_v16, %s5446_s4 }
0x3c04   :  { %v4758_v12 = vpop.xlane.xlu1 %4757 }
0x3c05   :  { %5352 = vrcp.f32 %v4758_v12 }
0x3c08   :  { %v4767_v34 = vpop.permute.xlu1 %4766 }
0x3c0f   :  { %v5353_v8 = vpop.eup %5352 }
0x3c10   :  { %v4760_v56 = vmul.f32 %v5353_v8, %v5351_v50 }
0x3c12   :  { %v4773_v23 = vsel %vm4475_vm11, %v4760_v56, %v4763_v28 }
0x3c13   :  { %v4775_v10 = vsel %vm4774_vm0, %v4773_v23, %v4767_v34 }
0x3c14   :  { %v4777_v2 = vsel %vm4776_vm12, %v4775_v10, %v4771_v48 }
0x3c15   :  { %v4779_v49 = vsel %vm4778_vm13, %v4777_v2, 0.0 }
0x3c16   :  { %4780 = vst [vmem:[#allocation7] sm:$0x3] %v4779_v49 }
0x3c17   :  { %5412 = shalt.err (!%p5409_p6)
}
0x3c18   :  { %s5413_s25 = scalar_lea.hbm %s6594_s6, 32 }
0x3c19   :  { %p5414_p7 = scmp.ne.s32.totalorder %s6594_s6, %s5413_s25  ;;  %p5417_p8 = scmp.lt.u32.totalorder %s5413_s25, %s6594_s6 }
0x3c1b   :  { %p5419_p9 = pnand %p5417_p8, %p5414_p7 }
0x3c1d   :  { %5422 = shalt.err (!%p5419_p9)
}
0x3c1e   :  { %4790 = dma.vmem_to_hbm [thread:$0]  %s4788_s21, 32, %s6594_s6, [#allocation4]  }
0x3c1f   :  { %5427 = dma.done.wait [#allocation4], 32  }
0x3c20   :  { %5428 = vsyncadd [#allocation4], 4294967264 }
0x3c21   :  { %4794 = vsyncpa [#allocation3], 1 }
0x3c22   :  { %4795 = vsyncpa [#allocation6], 1 }
0x3c23   :  { %4796 = vsyncpa [#allocation4], 1 }

</bundles_post_ra>
